<compile_context>
chip_gen: v5e
topology: v5e:2x2
jax: 0.10.0
libtpu: 0.0.40
codegen_flags: <defaults>
</compile_context>

<pallas_src>
import jax
import jax.numpy as jnp
from jax.experimental import pallas as pl
from jax.experimental.pallas import tpu as pltpu


# ----------------------------------------------------------------------------
# Kernels
# ----------------------------------------------------------------------------
def _lstm_step(gates, c_prev, H):
    """PyTorch LSTMCell gate order: i, f, g, o (combined bias already added)."""
    i = jax.nn.sigmoid(gates[:, 0 * H:1 * H])
    f = jax.nn.sigmoid(gates[:, 1 * H:2 * H])
    g = jnp.tanh(gates[:, 2 * H:3 * H])
    o = jax.nn.sigmoid(gates[:, 3 * H:4 * H])
    c_new = f * c_prev + i * g
    h_new = o * jnp.tanh(c_new)
    return h_new, c_new


def butd_recurrent_kernel(
    # inputs
    emb_ref,        # (T*B, E)   time-major token embeddings, flattened
    fea_vec_ref,    # (B, D)
    fea_maps_ref,   # (B, P, D)
    w_init_ref,     # (D, 4H)    [init_h_A | init_c_A | init_h_L | init_c_L]
    b_init_ref,     # (1, 4H)
    wA_h_ref,       # (H, 4H)    Attention LSTM, h_L rows
    wA_v_ref,       # (D, 4H)    Attention LSTM, fea_vec rows
    wA_e_ref,       # (E, 4H)    Attention LSTM, embedding rows
    bA_ref,         # (1, 4H)
    wfa_ref, bfa_ref,   # fea_att   : (D, A), (1, A)
    wha_ref, bha_ref,   # hid_att   : (H, A), (1, A)
    ww_ref, bw_ref,     # att_weight: (1, A), (1, 1)
    wL_ref,         # (D+H, 4H)  [weighted_fea rows | h_A rows]
    bL_ref,         # (1, 4H)
    # output
    h_out_ref,      # (T, B, H)  h_L per timestep
    # scratch
    gemb_ref,       # (T*B, 4H)  hoisted embedding gate term
):
    fea_vec = fea_vec_ref[...]
    fea_maps = fea_maps_ref[...]
    B, P, D = fea_maps.shape
    H = wA_h_ref.shape[0]
    T = h_out_ref.shape[0]

    # -------- hoisted, timestep-invariant work (done once) ------------------
    # fea_init_state: four linears fused into one (B,D)@(D,4H) matmul.
    init = jnp.dot(fea_vec, w_init_ref[...],
                   preferred_element_type=jnp.float32) + b_init_ref[...]
    hA = init[:, 0 * H:1 * H]
    cA = init[:, 1 * H:2 * H]
    hL = init[:, 2 * H:3 * H]
    cL = init[:, 3 * H:4 * H]

    # Attention-LSTM gate contributions that do not depend on the recurrence.
    gA_const = jnp.dot(fea_vec, wA_v_ref[...],
                       preferred_element_type=jnp.float32) + bA_ref[...]      # (B, 4H)
    gemb_ref[...] = jnp.dot(emb_ref[...], wA_e_ref[...],
                            preferred_element_type=jnp.float32)               # (T*B, 4H)

    # BUTD_Attend "att1" term (fea_att(fea_maps)) is also timestep-invariant.
    att1 = (jnp.dot(fea_maps.reshape(B * P, D), wfa_ref[...],
                    preferred_element_type=jnp.float32)
            + bfa_ref[...]).reshape(B, P, -1)                                 # (B, P, A)

    wA_h = wA_h_ref[...]
    wha = wha_ref[...]
    bha = bha_ref[...]
    ww = ww_ref[...]
    bw = bw_ref[...]
    wL_f = wL_ref[pl.ds(0, D), :]    # (D, 4H)  weighted_fea rows
    wL_h = wL_ref[pl.ds(D, H), :]    # (H, 4H)  h_A rows
    bL = bL_ref[...]

    # -------- recurrent decode, statically unrolled over T ------------------
    for t in range(T):
        # Top-down Attention LSTM cell (only the recurrent h_L matmul remains).
        gates_A = (jnp.dot(hL, wA_h, preferred_element_type=jnp.float32)
                   + gA_const + gemb_ref[pl.ds(t * B, B), :])
        hA, cA = _lstm_step(gates_A, cA, H)

        # BUTD_Attend.
        att2 = jnp.dot(hA, wha, preferred_element_type=jnp.float32) + bha     # (B, A)
        e = jnp.maximum(att1 + att2[:, None, :], 0.0)                         # ReLU
        att = jnp.sum(e * ww, axis=-1) + bw                                   # (B, P)
        att = att - jnp.max(att, axis=-1, keepdims=True)
        p = jnp.exp(att)
        weight = p * pl.reciprocal(jnp.sum(p, axis=-1, keepdims=True),
                                   approx=True)                               # softmax over P
        weighted_fea = jnp.sum(fea_maps * weight[:, :, None], axis=1)         # (B, D)

        # Language LSTM cell (row-split slab weight -> two matmuls, no concat).
        gates_L = (jnp.dot(weighted_fea, wL_f, preferred_element_type=jnp.float32)
                   + jnp.dot(hA, wL_h, preferred_element_type=jnp.float32)
                   + bL)
        hL, cL = _lstm_step(gates_L, cL, H)

        h_out_ref[t] = hL


def butd_fc_kernel(h_ref, wfc_ref, bfc_ref, logit_ref):
    """One batched vocab projection over all T*B rows; Vpad is lane-dense."""
    logit_ref[...] = (jnp.dot(h_ref[...], wfc_ref[...],
                              preferred_element_type=jnp.float32)
                      + bfc_ref[...])


# ----------------------------------------------------------------------------
# Wrapper
# ----------------------------------------------------------------------------
def butd_forward(params, fea_vec, fea_maps, emb_tbe):
    """params: flat tuple (see butd_reference). Returns logits (B, T, V)."""
    (w_ihA, b_ihA, w_icA, b_icA, w_ihL, b_ihL, w_icL, b_icL,
     wA_h, wA_v, wA_e, bA,
     wfa, bfa, wha, bha, ww, bw,
     wL_f, wL_h, bL,
     wfc, bfc) = params

    T, B, E = emb_tbe.shape
    _, P, D = fea_maps.shape
    H = w_ihA.shape[-1]
    V = wfc.shape[-1]
    Vp = ((V + 127) // 128) * 128            # lane-dense (128-multiple) vocab pad

    # One-time parameter packing (outside the kernel): fuse the init linears and
    # Language-LSTM weights into slabs, pad the fc projection to lane width.
    w_init = jnp.concatenate([w_ihA, w_icA, w_ihL, w_icL], axis=1)    # (D, 4H)
    b_init = jnp.concatenate([b_ihA, b_icA, b_ihL, b_icL], axis=1)    # (1, 4H)
    wL = jnp.concatenate([wL_f, wL_h], axis=0)                         # (D+H, 4H)
    wfc_p = jnp.pad(wfc, ((0, 0), (0, Vp - V)))
    bfc_p = jnp.pad(bfc, ((0, 0), (0, Vp - V)))
    emb_flat = emb_tbe.reshape(T * B, E)                               # time-major rows

    rec_inputs = (emb_flat, fea_vec, fea_maps, w_init, b_init,
                  wA_h, wA_v, wA_e, bA, wfa, bfa, wha, bha, ww, bw, wL, bL)

    def full_spec(shape):
        return pl.BlockSpec(shape, lambda i, s=shape: (0,) * len(s))

    # Recurrent kernel: single invocation, T unrolled inside.
    h_states = pl.pallas_call(
        butd_recurrent_kernel,
        out_shape=jax.ShapeDtypeStruct((T, B, H), jnp.float32),
        grid_spec=pltpu.PrefetchScalarGridSpec(
            num_scalar_prefetch=0,
            grid=(1,),
            in_specs=[full_spec(x.shape) for x in rec_inputs],
            out_specs=full_spec((T, B, H)),
            scratch_shapes=[pltpu.VMEM((T * B, 4 * H), jnp.float32)],
        ),
        compiler_params=pltpu.CompilerParams(
            dimension_semantics=("arbitrary",),
        ),
    )(*rec_inputs)

    # fc projection over all timesteps in one lane-dense matmul.
    h_flat = h_states.reshape(T * B, H)
    logits_p = pl.pallas_call(
        butd_fc_kernel,
        out_shape=jax.ShapeDtypeStruct((T * B, Vp), jnp.float32),
    )(h_flat, wfc_p, bfc_p)

    logits = logits_p.reshape(T, B, Vp)[:, :, :V]
    return jnp.transpose(logits, (1, 0, 2))       # (B, T, V), matches PyTorch


# ----------------------------------------------------------------------------
# Pure-JAX reference (for correctness check)
# ----------------------------------------------------------------------------
def butd_reference(params, fea_vec, fea_maps, emb_tbe):
    (w_ihA, b_ihA, w_icA, b_icA, w_ihL, b_ihL, w_icL, b_icL,
     wA_h, wA_v, wA_e, bA,
     wfa, bfa, wha, bha, ww, bw,
     wL_f, wL_h, bL,
     wfc, bfc) = params
    H = w_ihA.shape[-1]

    def lstm(gates, c_prev):
        i = jax.nn.sigmoid(gates[:, 0 * H:1 * H])
        f = jax.nn.sigmoid(gates[:, 1 * H:2 * H])
        g = jnp.tanh(gates[:, 2 * H:3 * H])
        o = jax.nn.sigmoid(gates[:, 3 * H:4 * H])
        c = f * c_prev + i * g
        return o * jnp.tanh(c), c

    hA = fea_vec @ w_ihA + b_ihA
    cA = fea_vec @ w_icA + b_icA
    hL = fea_vec @ w_ihL + b_ihL
    cL = fea_vec @ w_icL + b_icL

    outs = []
    for t in range(emb_tbe.shape[0]):
        emb_t = emb_tbe[t]
        gA = hL @ wA_h + fea_vec @ wA_v + emb_t @ wA_e + bA
        hA, cA = lstm(gA, cA)
        att1 = jnp.einsum("bpd,da->bpa", fea_maps, wfa) + bfa
        att2 = hA @ wha + bha
        e = jnp.maximum(att1 + att2[:, None, :], 0.0)
        att = jnp.sum(e * ww, axis=-1) + bw
        weight = jax.nn.softmax(att, axis=1)
        weighted = jnp.sum(fea_maps * weight[:, :, None], axis=1)
        gL = weighted @ wL_f + hA @ wL_h + bL
        hL, cL = lstm(gL, cL)
        outs.append(hL @ wfc + bfc)
    return jnp.stack(outs, axis=1)   # (B, T, V)


# ----------------------------------------------------------------------------
# Main
# ----------------------------------------------------------------------------
if __name__ == "__main__":
    # Small config consistent with the module.
    B = 2          # batch
    P = 36         # number of region features
    D = 32         # image_dim
    E = 16         # embed_dim
    H = 32         # hidden_dim
    A = 32         # att_dim
    V = 48         # vocab_size
    T = 6          # max(cap_len)

    key = jax.random.PRNGKey(0)
    ks = iter(jax.random.split(key, 64))

    def rnd(shape, scale=0.05):
        return jax.random.normal(next(ks), shape, dtype=jnp.float32) * scale

    # Parameters (weight_norm at init reduces to the raw weight).  All Linear
    # weights stored pre-transposed as (in, out); LSTMCell bias = b_ih + b_hh.
    params = (
        rnd((D, H)), rnd((1, H)),            # init_h_A
        rnd((D, H)), rnd((1, H)),            # init_c_A
        rnd((D, H)), rnd((1, H)),            # init_h_L
        rnd((D, H)), rnd((1, H)),            # init_c_L
        rnd((H, 4 * H)), rnd((D, 4 * H)), rnd((E, 4 * H)), rnd((1, 4 * H)),  # Attn LSTM
        rnd((D, A)), rnd((1, A)),            # fea_att
        rnd((H, A)), rnd((1, A)),            # hid_att
        rnd((1, A)), rnd((1, 1)),            # att_weight
        rnd((D, 4 * H)), rnd((H, 4 * H)), rnd((1, 4 * H)),                   # Lang LSTM
        jax.random.uniform(next(ks), (H, V), jnp.float32, -0.1, 0.1),        # fc weight
        jnp.zeros((1, V), jnp.float32),      # fc bias (init_weight fills 0)
    )

    # Inputs.
    fea_vec = rnd((B, D), scale=1.0)
    fea_maps = rnd((B, P, D), scale=1.0)
    cap = jax.random.randint(next(ks), (B, T), 0, V)
    cap_len = jnp.array([T, T - 2], dtype=jnp.int32)   # max(cap_len) == T

    # Embedding lookup (gather) stays in plain JAX glue.
    embed_w = jax.random.uniform(next(ks), (V, E), jnp.float32, -0.1, 0.1)
    emb_bte = embed_w[cap]                       # (B, T, E)
    emb_tbe = jnp.transpose(emb_bte, (1, 0, 2))  # (T, B, E) time-major

    # TODO(synk): dropout layers are identity here (eval-mode semantics).
    logits = butd_forward(params, fea_vec, fea_maps, emb_tbe)
    logits = jax.block_until_ready(logits)

    ref = butd_reference(params, fea_vec, fea_maps, emb_tbe)
    assert logits.shape == (B, T, V)
    assert jnp.allclose(logits, ref, rtol=1e-2, atol=1e-2), (
        float(jnp.max(jnp.abs(logits - ref))))

    print("KERNEL_OK")
</pallas_src>

<mosaic_0001>
module attributes {stable_mosaic.version = 11 : i64} {
  func.func @butd_recurrent_kernel(%arg0: i32, %arg1: memref<12x16xf32, #tpu.memory_space<vmem>>, %arg2: memref<2x32xf32, #tpu.memory_space<vmem>>, %arg3: memref<2x36x32xf32, #tpu.memory_space<vmem>>, %arg4: memref<32x128xf32, #tpu.memory_space<vmem>>, %arg5: memref<1x128xf32, #tpu.memory_space<vmem>>, %arg6: memref<32x128xf32, #tpu.memory_space<vmem>>, %arg7: memref<32x128xf32, #tpu.memory_space<vmem>>, %arg8: memref<16x128xf32, #tpu.memory_space<vmem>>, %arg9: memref<1x128xf32, #tpu.memory_space<vmem>>, %arg10: memref<32x32xf32, #tpu.memory_space<vmem>>, %arg11: memref<1x32xf32, #tpu.memory_space<vmem>>, %arg12: memref<32x32xf32, #tpu.memory_space<vmem>>, %arg13: memref<1x32xf32, #tpu.memory_space<vmem>>, %arg14: memref<1x32xf32, #tpu.memory_space<vmem>>, %arg15: memref<1x1xf32, #tpu.memory_space<vmem>>, %arg16: memref<64x128xf32, #tpu.memory_space<vmem>>, %arg17: memref<1x128xf32, #tpu.memory_space<vmem>>, %arg18: memref<6x2x32xf32, #tpu.memory_space<vmem>>, %arg19: memref<12x128xf32, #tpu.memory_space<vmem>>) attributes {dimension_semantics = [#tpu.dimension_semantics<arbitrary>], iteration_bounds = array<i64: 1>, scalar_prefetch = 0 : i64, scratch_operands = 1 : i64, tpu.core_type = #tpu.core_type<tc>, window_params = [{pipeline_mode = #tpu.pipeline_mode<synchronous>, transform_indices = @transform_0, window_bounds = array<i64: 12, 16>}, {pipeline_mode = #tpu.pipeline_mode<synchronous>, transform_indices = @transform_1, window_bounds = array<i64: 2, 32>}, {pipeline_mode = #tpu.pipeline_mode<synchronous>, transform_indices = @transform_2, window_bounds = array<i64: 2, 36, 32>}, {pipeline_mode = #tpu.pipeline_mode<synchronous>, transform_indices = @transform_3, window_bounds = array<i64: 32, 128>}, {pipeline_mode = #tpu.pipeline_mode<synchronous>, transform_indices = @transform_4, window_bounds = array<i64: 1, 128>}, {pipeline_mode = #tpu.pipeline_mode<synchronous>, transform_indices = @transform_5, window_bounds = array<i64: 32, 128>}, {pipeline_mode = #tpu.pipeline_mode<synchronous>, transform_indices = @transform_6, window_bounds = array<i64: 32, 128>}, {pipeline_mode = #tpu.pipeline_mode<synchronous>, transform_indices = @transform_7, window_bounds = array<i64: 16, 128>}, {pipeline_mode = #tpu.pipeline_mode<synchronous>, transform_indices = @transform_8, window_bounds = array<i64: 1, 128>}, {pipeline_mode = #tpu.pipeline_mode<synchronous>, transform_indices = @transform_9, window_bounds = array<i64: 32, 32>}, {pipeline_mode = #tpu.pipeline_mode<synchronous>, transform_indices = @transform_10, window_bounds = array<i64: 1, 32>}, {pipeline_mode = #tpu.pipeline_mode<synchronous>, transform_indices = @transform_11, window_bounds = array<i64: 32, 32>}, {pipeline_mode = #tpu.pipeline_mode<synchronous>, transform_indices = @transform_12, window_bounds = array<i64: 1, 32>}, {pipeline_mode = #tpu.pipeline_mode<synchronous>, transform_indices = @transform_13, window_bounds = array<i64: 1, 32>}, {pipeline_mode = #tpu.pipeline_mode<synchronous>, transform_indices = @transform_14, window_bounds = array<i64: 1, 1>}, {pipeline_mode = #tpu.pipeline_mode<synchronous>, transform_indices = @transform_15, window_bounds = array<i64: 64, 128>}, {pipeline_mode = #tpu.pipeline_mode<synchronous>, transform_indices = @transform_16, window_bounds = array<i64: 1, 128>}, {pipeline_mode = #tpu.pipeline_mode<synchronous>, transform_indices = @transform_17, window_bounds = array<i64: 6, 2, 32>}]} {
    %c0 = arith.constant 0 : index
    %c0_0 = arith.constant 0 : index
    %0 = vector.load %arg2[%c0, %c0_0] : memref<2x32xf32, #tpu.memory_space<vmem>>, vector<2x32xf32>
    %c0_1 = arith.constant 0 : index
    %c0_2 = arith.constant 0 : index
    %c0_3 = arith.constant 0 : index
    %1 = vector.load %arg3[%c0_1, %c0_2, %c0_3] : memref<2x36x32xf32, #tpu.memory_space<vmem>>, vector<2x36x32xf32>
    %c0_4 = arith.constant 0 : index
    %c0_5 = arith.constant 0 : index
    %2 = vector.load %arg4[%c0_4, %c0_5] : memref<32x128xf32, #tpu.memory_space<vmem>>, vector<32x128xf32>
    %cst = arith.constant dense<0.000000e+00> : vector<2x128xf32>
    %3 = tpu.matmul %0, %2, %cst {dimension_numbers = #tpu.dot_dimension_numbers<[1], [0], [0], [1], [0, 0, 1, 1], [], []>} : vector<2x32xf32>, vector<32x128xf32>, vector<2x128xf32> -> vector<2x128xf32>
    %c0_6 = arith.constant 0 : index
    %c0_7 = arith.constant 0 : index
    %4 = vector.load %arg5[%c0_6, %c0_7] : memref<1x128xf32, #tpu.memory_space<vmem>>, vector<1x128xf32>
    %5 = vector.broadcast %4 : vector<1x128xf32> to vector<2x128xf32>
    %6 = arith.addf %3, %5 : vector<2x128xf32>
    %7 = vector.extract_strided_slice %6 {offsets = [0, 32], sizes = [2, 32], strides = [1, 1]} : vector<2x128xf32> to vector<2x32xf32>
    %8 = vector.extract_strided_slice %6 {offsets = [0, 64], sizes = [2, 32], strides = [1, 1]} : vector<2x128xf32> to vector<2x32xf32>
    %9 = vector.extract_strided_slice %6 {offsets = [0, 96], sizes = [2, 32], strides = [1, 1]} : vector<2x128xf32> to vector<2x32xf32>
    %c0_8 = arith.constant 0 : index
    %c0_9 = arith.constant 0 : index
    %10 = vector.load %arg7[%c0_8, %c0_9] : memref<32x128xf32, #tpu.memory_space<vmem>>, vector<32x128xf32>
    %cst_10 = arith.constant dense<0.000000e+00> : vector<2x128xf32>
    %11 = tpu.matmul %0, %10, %cst_10 {dimension_numbers = #tpu.dot_dimension_numbers<[1], [0], [0], [1], [0, 0, 1, 1], [], []>} : vector<2x32xf32>, vector<32x128xf32>, vector<2x128xf32> -> vector<2x128xf32>
    %c0_11 = arith.constant 0 : index
    %c0_12 = arith.constant 0 : index
    %12 = vector.load %arg9[%c0_11, %c0_12] : memref<1x128xf32, #tpu.memory_space<vmem>>, vector<1x128xf32>
    %13 = vector.broadcast %12 : vector<1x128xf32> to vector<2x128xf32>
    %14 = arith.addf %11, %13 : vector<2x128xf32>
    %c0_13 = arith.constant 0 : index
    %c0_14 = arith.constant 0 : index
    %15 = vector.load %arg1[%c0_13, %c0_14] : memref<12x16xf32, #tpu.memory_space<vmem>>, vector<12x16xf32>
    %c0_15 = arith.constant 0 : index
    %c0_16 = arith.constant 0 : index
    %16 = vector.load %arg8[%c0_15, %c0_16] : memref<16x128xf32, #tpu.memory_space<vmem>>, vector<16x128xf32>
    %cst_17 = arith.constant dense<0.000000e+00> : vector<12x128xf32>
    %17 = tpu.matmul %15, %16, %cst_17 {dimension_numbers = #tpu.dot_dimension_numbers<[1], [0], [0], [1], [0, 0, 1, 1], [], []>} : vector<12x16xf32>, vector<16x128xf32>, vector<12x128xf32> -> vector<12x128xf32>
    %c0_18 = arith.constant 0 : index
    %c0_19 = arith.constant 0 : index
    %18 = vector.load %arg19[%c0_18, %c0_19] : memref<12x128xf32, #tpu.memory_space<vmem>>, vector<12x128xf32>
    tpu.vector_store %arg19[%c0_18, %c0_19], %17 {strides = array<i32>} : memref<12x128xf32, #tpu.memory_space<vmem>>, vector<12x128xf32>,
    %19 = vector.shape_cast %1 : vector<2x36x32xf32> to vector<72x32xf32>
    %c0_20 = arith.constant 0 : index
    %c0_21 = arith.constant 0 : index
    %20 = vector.load %arg10[%c0_20, %c0_21] : memref<32x32xf32, #tpu.memory_space<vmem>>, vector<32x32xf32>
    %cst_22 = arith.constant dense<0.000000e+00> : vector<72x32xf32>
    %21 = tpu.matmul %19, %20, %cst_22 {dimension_numbers = #tpu.dot_dimension_numbers<[1], [0], [0], [1], [0, 0, 1, 1], [], []>} : vector<72x32xf32>, vector<32x32xf32>, vector<72x32xf32> -> vector<72x32xf32>
    %c0_23 = arith.constant 0 : index
    %c0_24 = arith.constant 0 : index
    %22 = vector.load %arg11[%c0_23, %c0_24] : memref<1x32xf32, #tpu.memory_space<vmem>>, vector<1x32xf32>
    %23 = vector.broadcast %22 : vector<1x32xf32> to vector<72x32xf32>
    %24 = arith.addf %21, %23 : vector<72x32xf32>
    %25 = vector.shape_cast %24 : vector<72x32xf32> to vector<2x36x32xf32>
    %c0_25 = arith.constant 0 : index
    %c0_26 = arith.constant 0 : index
    %26 = vector.load %arg6[%c0_25, %c0_26] : memref<32x128xf32, #tpu.memory_space<vmem>>, vector<32x128xf32>
    %c0_27 = arith.constant 0 : index
    %c0_28 = arith.constant 0 : index
    %27 = vector.load %arg12[%c0_27, %c0_28] : memref<32x32xf32, #tpu.memory_space<vmem>>, vector<32x32xf32>
    %c0_29 = arith.constant 0 : index
    %c0_30 = arith.constant 0 : index
    %28 = vector.load %arg13[%c0_29, %c0_30] : memref<1x32xf32, #tpu.memory_space<vmem>>, vector<1x32xf32>
    %c0_31 = arith.constant 0 : index
    %c0_32 = arith.constant 0 : index
    %29 = vector.load %arg14[%c0_31, %c0_32] : memref<1x32xf32, #tpu.memory_space<vmem>>, vector<1x32xf32>
    %c0_33 = arith.constant 0 : index
    %c0_34 = arith.constant 0 : index
    %30 = vector.load %arg15[%c0_33, %c0_34] : memref<1x1xf32, #tpu.memory_space<vmem>>, vector<1x1xf32>
    %c0_35 = arith.constant 0 : index
    %c0_36 = arith.constant 0 : index
    %31 = vector.load %arg16[%c0_35, %c0_36] : memref<64x128xf32, #tpu.memory_space<vmem>>, vector<32x128xf32>
    %c32 = arith.constant 32 : index
    %c0_37 = arith.constant 0 : index
    %32 = vector.load %arg16[%c32, %c0_37] : memref<64x128xf32, #tpu.memory_space<vmem>>, vector<32x128xf32>
    %c0_38 = arith.constant 0 : index
    %c0_39 = arith.constant 0 : index
    %33 = vector.load %arg17[%c0_38, %c0_39] : memref<1x128xf32, #tpu.memory_space<vmem>>, vector<1x128xf32>
    %cst_40 = arith.constant dense<0.000000e+00> : vector<2x128xf32>
    %34 = tpu.matmul %8, %26, %cst_40 {dimension_numbers = #tpu.dot_dimension_numbers<[1], [0], [0], [1], [0, 0, 1, 1], [], []>} : vector<2x32xf32>, vector<32x128xf32>, vector<2x128xf32> -> vector<2x128xf32>
    %35 = arith.addf %34, %14 : vector<2x128xf32>
    %c0_41 = arith.constant 0 : index
    %c0_42 = arith.constant 0 : index
    %36 = vector.load %arg19[%c0_41, %c0_42] : memref<12x128xf32, #tpu.memory_space<vmem>>, vector<2x128xf32>
    %37 = arith.addf %35, %36 : vector<2x128xf32>
    %38 = vector.extract_strided_slice %37 {offsets = [0, 0], sizes = [2, 32], strides = [1, 1]} : vector<2x128xf32> to vector<2x32xf32>
    %39 = arith.negf %38 : vector<2x32xf32>
    %40 = math.exp %39 : vector<2x32xf32>
    %cst_43 = arith.constant 1.000000e+00 : f32
    %41 = vector.broadcast %cst_43 : f32 to vector<2x32xf32>
    %42 = arith.addf %41, %40 : vector<2x32xf32>
    %43 = arith.divf %41, %42 : vector<2x32xf32>
    %44 = vector.extract_strided_slice %37 {offsets = [0, 32], sizes = [2, 32], strides = [1, 1]} : vector<2x128xf32> to vector<2x32xf32>
    %45 = arith.negf %44 : vector<2x32xf32>
    %46 = math.exp %45 : vector<2x32xf32>
    %cst_44 = arith.constant 1.000000e+00 : f32
    %47 = vector.broadcast %cst_44 : f32 to vector<2x32xf32>
    %48 = arith.addf %47, %46 : vector<2x32xf32>
    %49 = arith.divf %47, %48 : vector<2x32xf32>
    %50 = vector.extract_strided_slice %37 {offsets = [0, 64], sizes = [2, 32], strides = [1, 1]} : vector<2x128xf32> to vector<2x32xf32>
    %51 = math.tanh %50 : vector<2x32xf32>
    %52 = vector.extract_strided_slice %37 {offsets = [0, 96], sizes = [2, 32], strides = [1, 1]} : vector<2x128xf32> to vector<2x32xf32>
    %53 = arith.negf %52 : vector<2x32xf32>
    %54 = math.exp %53 : vector<2x32xf32>
    %cst_45 = arith.constant 1.000000e+00 : f32
    %55 = vector.broadcast %cst_45 : f32 to vector<2x32xf32>
    %56 = arith.addf %55, %54 : vector<2x32xf32>
    %57 = arith.divf %55, %56 : vector<2x32xf32>
    %58 = arith.mulf %49, %7 : vector<2x32xf32>
    %59 = arith.mulf %43, %51 : vector<2x32xf32>
    %60 = arith.addf %58, %59 : vector<2x32xf32>
    %61 = math.tanh %60 : vector<2x32xf32>
    %62 = arith.mulf %57, %61 : vector<2x32xf32>
    %cst_46 = arith.constant dense<0.000000e+00> : vector<2x32xf32>
    %63 = tpu.matmul %62, %27, %cst_46 {dimension_numbers = #tpu.dot_dimension_numbers<[1], [0], [0], [1], [0, 0, 1, 1], [], []>} : vector<2x32xf32>, vector<32x32xf32>, vector<2x32xf32> -> vector<2x32xf32>
    %64 = vector.broadcast %28 : vector<1x32xf32> to vector<2x32xf32>
    %65 = arith.addf %63, %64 : vector<2x32xf32>
    %66 = vector.shape_cast %65 : vector<2x32xf32> to vector<2x1x32xf32>
    %67 = vector.broadcast %66 : vector<2x1x32xf32> to vector<2x36x32xf32>
    %68 = arith.addf %25, %67 : vector<2x36x32xf32>
    %cst_47 = arith.constant 0.000000e+00 : f32
    %69 = vector.broadcast %cst_47 : f32 to vector<2x36x32xf32>
    %70 = arith.maximumf %68, %69 : vector<2x36x32xf32>
    %71 = vector.shape_cast %29 : vector<1x32xf32> to vector<1x1x32xf32>
    %72 = vector.broadcast %71 : vector<1x1x32xf32> to vector<2x36x32xf32>
    %73 = arith.mulf %70, %72 : vector<2x36x32xf32>
    %cst_48 = arith.constant dense<0.000000e+00> : vector<2x36xf32>
    %74 = vector.multi_reduction <add>, %73, %cst_48 [2] : vector<2x36x32xf32> to vector<2x36xf32>
    %75 = vector.broadcast %30 : vector<1x1xf32> to vector<2x36xf32>
    %76 = arith.addf %74, %75 : vector<2x36xf32>
    %cst_49 = arith.constant dense<0xFF800000> : vector<2xf32>
    %77 = vector.multi_reduction <maximumf>, %76, %cst_49 [1] : vector<2x36xf32> to vector<2xf32>
    %78 = vector.shape_cast %77 : vector<2xf32> to vector<2x1xf32>
    %79 = vector.broadcast %78 : vector<2x1xf32> to vector<2x36xf32>
    %80 = arith.subf %76, %79 : vector<2x36xf32>
    %81 = math.exp %80 : vector<2x36xf32>
    %cst_50 = arith.constant dense<0.000000e+00> : vector<2xf32>
    %82 = vector.multi_reduction <add>, %81, %cst_50 [1] : vector<2x36xf32> to vector<2xf32>
    %83 = vector.shape_cast %82 : vector<2xf32> to vector<2x1xf32>
    %84 = tpu.reciprocal %83 {approx = true} : vector<2x1xf32> -> vector<2x1xf32>
    %85 = vector.broadcast %84 : vector<2x1xf32> to vector<2x36xf32>
    %86 = arith.mulf %81, %85 : vector<2x36xf32>
    %87 = vector.shape_cast %86 : vector<2x36xf32> to vector<2x36x1xf32>
    %88 = vector.broadcast %87 : vector<2x36x1xf32> to vector<2x36x32xf32>
    %89 = arith.mulf %1, %88 : vector<2x36x32xf32>
    %cst_51 = arith.constant dense<0.000000e+00> : vector<2x32xf32>
    %90 = vector.multi_reduction <add>, %89, %cst_51 [1] : vector<2x36x32xf32> to vector<2x32xf32>
    %cst_52 = arith.constant dense<0.000000e+00> : vector<2x128xf32>
    %91 = tpu.matmul %90, %31, %cst_52 {dimension_numbers = #tpu.dot_dimension_numbers<[1], [0], [0], [1], [0, 0, 1, 1], [], []>} : vector<2x32xf32>, vector<32x128xf32>, vector<2x128xf32> -> vector<2x128xf32>
    %cst_53 = arith.constant dense<0.000000e+00> : vector<2x128xf32>
    %92 = tpu.matmul %62, %32, %cst_53 {dimension_numbers = #tpu.dot_dimension_numbers<[1], [0], [0], [1], [0, 0, 1, 1], [], []>} : vector<2x32xf32>, vector<32x128xf32>, vector<2x128xf32> -> vector<2x128xf32>
    %93 = arith.addf %91, %92 : vector<2x128xf32>
    %94 = vector.broadcast %33 : vector<1x128xf32> to vector<2x128xf32>
    %95 = arith.addf %93, %94 : vector<2x128xf32>
    %96 = vector.extract_strided_slice %95 {offsets = [0, 0], sizes = [2, 32], strides = [1, 1]} : vector<2x128xf32> to vector<2x32xf32>
    %97 = arith.negf %96 : vector<2x32xf32>
    %98 = math.exp %97 : vector<2x32xf32>
    %cst_54 = arith.constant 1.000000e+00 : f32
    %99 = vector.broadcast %cst_54 : f32 to vector<2x32xf32>
    %100 = arith.addf %99, %98 : vector<2x32xf32>
    %101 = arith.divf %99, %100 : vector<2x32xf32>
    %102 = vector.extract_strided_slice %95 {offsets = [0, 32], sizes = [2, 32], strides = [1, 1]} : vector<2x128xf32> to vector<2x32xf32>
    %103 = arith.negf %102 : vector<2x32xf32>
    %104 = math.exp %103 : vector<2x32xf32>
    %cst_55 = arith.constant 1.000000e+00 : f32
    %105 = vector.broadcast %cst_55 : f32 to vector<2x32xf32>
    %106 = arith.addf %105, %104 : vector<2x32xf32>
    %107 = arith.divf %105, %106 : vector<2x32xf32>
    %108 = vector.extract_strided_slice %95 {offsets = [0, 64], sizes = [2, 32], strides = [1, 1]} : vector<2x128xf32> to vector<2x32xf32>
    %109 = math.tanh %108 : vector<2x32xf32>
    %110 = vector.extract_strided_slice %95 {offsets = [0, 96], sizes = [2, 32], strides = [1, 1]} : vector<2x128xf32> to vector<2x32xf32>
    %111 = arith.negf %110 : vector<2x32xf32>
    %112 = math.exp %111 : vector<2x32xf32>
    %cst_56 = arith.constant 1.000000e+00 : f32
    %113 = vector.broadcast %cst_56 : f32 to vector<2x32xf32>
    %114 = arith.addf %113, %112 : vector<2x32xf32>
    %115 = arith.divf %113, %114 : vector<2x32xf32>
    %116 = arith.mulf %107, %9 : vector<2x32xf32>
    %117 = arith.mulf %101, %109 : vector<2x32xf32>
    %118 = arith.addf %116, %117 : vector<2x32xf32>
    %119 = math.tanh %118 : vector<2x32xf32>
    %120 = arith.mulf %115, %119 : vector<2x32xf32>
    %c0_57 = arith.constant 0 : index
    %c0_58 = arith.constant 0 : index
    %c0_59 = arith.constant 0 : index
    %121 = vector.load %arg18[%c0_57, %c0_58, %c0_59] : memref<6x2x32xf32, #tpu.memory_space<vmem>>, vector<1x2x32xf32>
    %122 = vector.shape_cast %121 : vector<1x2x32xf32> to vector<2x32xf32>
    %123 = vector.shape_cast %120 : vector<2x32xf32> to vector<1x2x32xf32>
    tpu.vector_store %arg18[%c0_57, %c0_58, %c0_59], %123 {strides = array<i32>} : memref<6x2x32xf32, #tpu.memory_space<vmem>>, vector<1x2x32xf32>,
    %cst_60 = arith.constant dense<0.000000e+00> : vector<2x128xf32>
    %124 = tpu.matmul %120, %26, %cst_60 {dimension_numbers = #tpu.dot_dimension_numbers<[1], [0], [0], [1], [0, 0, 1, 1], [], []>} : vector<2x32xf32>, vector<32x128xf32>, vector<2x128xf32> -> vector<2x128xf32>
    %125 = arith.addf %124, %14 : vector<2x128xf32>
    %c2 = arith.constant 2 : index
    %c0_61 = arith.constant 0 : index
    %126 = vector.load %arg19[%c2, %c0_61] : memref<12x128xf32, #tpu.memory_space<vmem>>, vector<2x128xf32>
    %127 = arith.addf %125, %126 : vector<2x128xf32>
    %128 = vector.extract_strided_slice %127 {offsets = [0, 0], sizes = [2, 32], strides = [1, 1]} : vector<2x128xf32> to vector<2x32xf32>
    %129 = arith.negf %128 : vector<2x32xf32>
    %130 = math.exp %129 : vector<2x32xf32>
    %cst_62 = arith.constant 1.000000e+00 : f32
    %131 = vector.broadcast %cst_62 : f32 to vector<2x32xf32>
    %132 = arith.addf %131, %130 : vector<2x32xf32>
    %133 = arith.divf %131, %132 : vector<2x32xf32>
    %134 = vector.extract_strided_slice %127 {offsets = [0, 32], sizes = [2, 32], strides = [1, 1]} : vector<2x128xf32> to vector<2x32xf32>
    %135 = arith.negf %134 : vector<2x32xf32>
    %136 = math.exp %135 : vector<2x32xf32>
    %cst_63 = arith.constant 1.000000e+00 : f32
    %137 = vector.broadcast %cst_63 : f32 to vector<2x32xf32>
    %138 = arith.addf %137, %136 : vector<2x32xf32>
    %139 = arith.divf %137, %138 : vector<2x32xf32>
    %140 = vector.extract_strided_slice %127 {offsets = [0, 64], sizes = [2, 32], strides = [1, 1]} : vector<2x128xf32> to vector<2x32xf32>
    %141 = math.tanh %140 : vector<2x32xf32>
    %142 = vector.extract_strided_slice %127 {offsets = [0, 96], sizes = [2, 32], strides = [1, 1]} : vector<2x128xf32> to vector<2x32xf32>
    %143 = arith.negf %142 : vector<2x32xf32>
    %144 = math.exp %143 : vector<2x32xf32>
    %cst_64 = arith.constant 1.000000e+00 : f32
    %145 = vector.broadcast %cst_64 : f32 to vector<2x32xf32>
    %146 = arith.addf %145, %144 : vector<2x32xf32>
    %147 = arith.divf %145, %146 : vector<2x32xf32>
    %148 = arith.mulf %139, %60 : vector<2x32xf32>
    %149 = arith.mulf %133, %141 : vector<2x32xf32>
    %150 = arith.addf %148, %149 : vector<2x32xf32>
    %151 = math.tanh %150 : vector<2x32xf32>
    %152 = arith.mulf %147, %151 : vector<2x32xf32>
    %cst_65 = arith.constant dense<0.000000e+00> : vector<2x32xf32>
    %153 = tpu.matmul %152, %27, %cst_65 {dimension_numbers = #tpu.dot_dimension_numbers<[1], [0], [0], [1], [0, 0, 1, 1], [], []>} : vector<2x32xf32>, vector<32x32xf32>, vector<2x32xf32> -> vector<2x32xf32>
    %154 = vector.broadcast %28 : vector<1x32xf32> to vector<2x32xf32>
    %155 = arith.addf %153, %154 : vector<2x32xf32>
    %156 = vector.shape_cast %155 : vector<2x32xf32> to vector<2x1x32xf32>
    %157 = vector.broadcast %156 : vector<2x1x32xf32> to vector<2x36x32xf32>
    %158 = arith.addf %25, %157 : vector<2x36x32xf32>
    %cst_66 = arith.constant 0.000000e+00 : f32
    %159 = vector.broadcast %cst_66 : f32 to vector<2x36x32xf32>
    %160 = arith.maximumf %158, %159 : vector<2x36x32xf32>
    %161 = vector.shape_cast %29 : vector<1x32xf32> to vector<1x1x32xf32>
    %162 = vector.broadcast %161 : vector<1x1x32xf32> to vector<2x36x32xf32>
    %163 = arith.mulf %160, %162 : vector<2x36x32xf32>
    %cst_67 = arith.constant dense<0.000000e+00> : vector<2x36xf32>
    %164 = vector.multi_reduction <add>, %163, %cst_67 [2] : vector<2x36x32xf32> to vector<2x36xf32>
    %165 = vector.broadcast %30 : vector<1x1xf32> to vector<2x36xf32>
    %166 = arith.addf %164, %165 : vector<2x36xf32>
    %cst_68 = arith.constant dense<0xFF800000> : vector<2xf32>
    %167 = vector.multi_reduction <maximumf>, %166, %cst_68 [1] : vector<2x36xf32> to vector<2xf32>
    %168 = vector.shape_cast %167 : vector<2xf32> to vector<2x1xf32>
    %169 = vector.broadcast %168 : vector<2x1xf32> to vector<2x36xf32>
    %170 = arith.subf %166, %169 : vector<2x36xf32>
    %171 = math.exp %170 : vector<2x36xf32>
    %cst_69 = arith.constant dense<0.000000e+00> : vector<2xf32>
    %172 = vector.multi_reduction <add>, %171, %cst_69 [1] : vector<2x36xf32> to vector<2xf32>
    %173 = vector.shape_cast %172 : vector<2xf32> to vector<2x1xf32>
    %174 = tpu.reciprocal %173 {approx = true} : vector<2x1xf32> -> vector<2x1xf32>
    %175 = vector.broadcast %174 : vector<2x1xf32> to vector<2x36xf32>
    %176 = arith.mulf %171, %175 : vector<2x36xf32>
    %177 = vector.shape_cast %176 : vector<2x36xf32> to vector<2x36x1xf32>
    %178 = vector.broadcast %177 : vector<2x36x1xf32> to vector<2x36x32xf32>
    %179 = arith.mulf %1, %178 : vector<2x36x32xf32>
    %cst_70 = arith.constant dense<0.000000e+00> : vector<2x32xf32>
    %180 = vector.multi_reduction <add>, %179, %cst_70 [1] : vector<2x36x32xf32> to vector<2x32xf32>
    %cst_71 = arith.constant dense<0.000000e+00> : vector<2x128xf32>
    %181 = tpu.matmul %180, %31, %cst_71 {dimension_numbers = #tpu.dot_dimension_numbers<[1], [0], [0], [1], [0, 0, 1, 1], [], []>} : vector<2x32xf32>, vector<32x128xf32>, vector<2x128xf32> -> vector<2x128xf32>
    %cst_72 = arith.constant dense<0.000000e+00> : vector<2x128xf32>
    %182 = tpu.matmul %152, %32, %cst_72 {dimension_numbers = #tpu.dot_dimension_numbers<[1], [0], [0], [1], [0, 0, 1, 1], [], []>} : vector<2x32xf32>, vector<32x128xf32>, vector<2x128xf32> -> vector<2x128xf32>
    %183 = arith.addf %181, %182 : vector<2x128xf32>
    %184 = vector.broadcast %33 : vector<1x128xf32> to vector<2x128xf32>
    %185 = arith.addf %183, %184 : vector<2x128xf32>
    %186 = vector.extract_strided_slice %185 {offsets = [0, 0], sizes = [2, 32], strides = [1, 1]} : vector<2x128xf32> to vector<2x32xf32>
    %187 = arith.negf %186 : vector<2x32xf32>
    %188 = math.exp %187 : vector<2x32xf32>
    %cst_73 = arith.constant 1.000000e+00 : f32
    %189 = vector.broadcast %cst_73 : f32 to vector<2x32xf32>
    %190 = arith.addf %189, %188 : vector<2x32xf32>
    %191 = arith.divf %189, %190 : vector<2x32xf32>
    %192 = vector.extract_strided_slice %185 {offsets = [0, 32], sizes = [2, 32], strides = [1, 1]} : vector<2x128xf32> to vector<2x32xf32>
    %193 = arith.negf %192 : vector<2x32xf32>
    %194 = math.exp %193 : vector<2x32xf32>
    %cst_74 = arith.constant 1.000000e+00 : f32
    %195 = vector.broadcast %cst_74 : f32 to vector<2x32xf32>
    %196 = arith.addf %195, %194 : vector<2x32xf32>
    %197 = arith.divf %195, %196 : vector<2x32xf32>
    %198 = vector.extract_strided_slice %185 {offsets = [0, 64], sizes = [2, 32], strides = [1, 1]} : vector<2x128xf32> to vector<2x32xf32>
    %199 = math.tanh %198 : vector<2x32xf32>
    %200 = vector.extract_strided_slice %185 {offsets = [0, 96], sizes = [2, 32], strides = [1, 1]} : vector<2x128xf32> to vector<2x32xf32>
    %201 = arith.negf %200 : vector<2x32xf32>
    %202 = math.exp %201 : vector<2x32xf32>
    %cst_75 = arith.constant 1.000000e+00 : f32
    %203 = vector.broadcast %cst_75 : f32 to vector<2x32xf32>
    %204 = arith.addf %203, %202 : vector<2x32xf32>
    %205 = arith.divf %203, %204 : vector<2x32xf32>
    %206 = arith.mulf %197, %118 : vector<2x32xf32>
    %207 = arith.mulf %191, %199 : vector<2x32xf32>
    %208 = arith.addf %206, %207 : vector<2x32xf32>
    %209 = math.tanh %208 : vector<2x32xf32>
    %210 = arith.mulf %205, %209 : vector<2x32xf32>
    %c1 = arith.constant 1 : index
    %c0_76 = arith.constant 0 : index
    %c0_77 = arith.constant 0 : index
    %211 = vector.load %arg18[%c1, %c0_76, %c0_77] : memref<6x2x32xf32, #tpu.memory_space<vmem>>, vector<1x2x32xf32>
    %212 = vector.shape_cast %211 : vector<1x2x32xf32> to vector<2x32xf32>
    %213 = vector.shape_cast %210 : vector<2x32xf32> to vector<1x2x32xf32>
    tpu.vector_store %arg18[%c1, %c0_76, %c0_77], %213 {strides = array<i32>} : memref<6x2x32xf32, #tpu.memory_space<vmem>>, vector<1x2x32xf32>,
    %cst_78 = arith.constant dense<0.000000e+00> : vector<2x128xf32>
    %214 = tpu.matmul %210, %26, %cst_78 {dimension_numbers = #tpu.dot_dimension_numbers<[1], [0], [0], [1], [0, 0, 1, 1], [], []>} : vector<2x32xf32>, vector<32x128xf32>, vector<2x128xf32> -> vector<2x128xf32>
    %215 = arith.addf %214, %14 : vector<2x128xf32>
    %c4 = arith.constant 4 : index
    %c0_79 = arith.constant 0 : index
    %216 = vector.load %arg19[%c4, %c0_79] : memref<12x128xf32, #tpu.memory_space<vmem>>, vector<2x128xf32>
    %217 = arith.addf %215, %216 : vector<2x128xf32>
    %218 = vector.extract_strided_slice %217 {offsets = [0, 0], sizes = [2, 32], strides = [1, 1]} : vector<2x128xf32> to vector<2x32xf32>
    %219 = arith.negf %218 : vector<2x32xf32>
    %220 = math.exp %219 : vector<2x32xf32>
    %cst_80 = arith.constant 1.000000e+00 : f32
    %221 = vector.broadcast %cst_80 : f32 to vector<2x32xf32>
    %222 = arith.addf %221, %220 : vector<2x32xf32>
    %223 = arith.divf %221, %222 : vector<2x32xf32>
    %224 = vector.extract_strided_slice %217 {offsets = [0, 32], sizes = [2, 32], strides = [1, 1]} : vector<2x128xf32> to vector<2x32xf32>
    %225 = arith.negf %224 : vector<2x32xf32>
    %226 = math.exp %225 : vector<2x32xf32>
    %cst_81 = arith.constant 1.000000e+00 : f32
    %227 = vector.broadcast %cst_81 : f32 to vector<2x32xf32>
    %228 = arith.addf %227, %226 : vector<2x32xf32>
    %229 = arith.divf %227, %228 : vector<2x32xf32>
    %230 = vector.extract_strided_slice %217 {offsets = [0, 64], sizes = [2, 32], strides = [1, 1]} : vector<2x128xf32> to vector<2x32xf32>
    %231 = math.tanh %230 : vector<2x32xf32>
    %232 = vector.extract_strided_slice %217 {offsets = [0, 96], sizes = [2, 32], strides = [1, 1]} : vector<2x128xf32> to vector<2x32xf32>
    %233 = arith.negf %232 : vector<2x32xf32>
    %234 = math.exp %233 : vector<2x32xf32>
    %cst_82 = arith.constant 1.000000e+00 : f32
    %235 = vector.broadcast %cst_82 : f32 to vector<2x32xf32>
    %236 = arith.addf %235, %234 : vector<2x32xf32>
    %237 = arith.divf %235, %236 : vector<2x32xf32>
    %238 = arith.mulf %229, %150 : vector<2x32xf32>
    %239 = arith.mulf %223, %231 : vector<2x32xf32>
    %240 = arith.addf %238, %239 : vector<2x32xf32>
    %241 = math.tanh %240 : vector<2x32xf32>
    %242 = arith.mulf %237, %241 : vector<2x32xf32>
    %cst_83 = arith.constant dense<0.000000e+00> : vector<2x32xf32>
    %243 = tpu.matmul %242, %27, %cst_83 {dimension_numbers = #tpu.dot_dimension_numbers<[1], [0], [0], [1], [0, 0, 1, 1], [], []>} : vector<2x32xf32>, vector<32x32xf32>, vector<2x32xf32> -> vector<2x32xf32>
    %244 = vector.broadcast %28 : vector<1x32xf32> to vector<2x32xf32>
    %245 = arith.addf %243, %244 : vector<2x32xf32>
    %246 = vector.shape_cast %245 : vector<2x32xf32> to vector<2x1x32xf32>
    %247 = vector.broadcast %246 : vector<2x1x32xf32> to vector<2x36x32xf32>
    %248 = arith.addf %25, %247 : vector<2x36x32xf32>
    %cst_84 = arith.constant 0.000000e+00 : f32
    %249 = vector.broadcast %cst_84 : f32 to vector<2x36x32xf32>
    %250 = arith.maximumf %248, %249 : vector<2x36x32xf32>
    %251 = vector.shape_cast %29 : vector<1x32xf32> to vector<1x1x32xf32>
    %252 = vector.broadcast %251 : vector<1x1x32xf32> to vector<2x36x32xf32>
    %253 = arith.mulf %250, %252 : vector<2x36x32xf32>
    %cst_85 = arith.constant dense<0.000000e+00> : vector<2x36xf32>
    %254 = vector.multi_reduction <add>, %253, %cst_85 [2] : vector<2x36x32xf32> to vector<2x36xf32>
    %255 = vector.broadcast %30 : vector<1x1xf32> to vector<2x36xf32>
    %256 = arith.addf %254, %255 : vector<2x36xf32>
    %cst_86 = arith.constant dense<0xFF800000> : vector<2xf32>
    %257 = vector.multi_reduction <maximumf>, %256, %cst_86 [1] : vector<2x36xf32> to vector<2xf32>
    %258 = vector.shape_cast %257 : vector<2xf32> to vector<2x1xf32>
    %259 = vector.broadcast %258 : vector<2x1xf32> to vector<2x36xf32>
    %260 = arith.subf %256, %259 : vector<2x36xf32>
    %261 = math.exp %260 : vector<2x36xf32>
    %cst_87 = arith.constant dense<0.000000e+00> : vector<2xf32>
    %262 = vector.multi_reduction <add>, %261, %cst_87 [1] : vector<2x36xf32> to vector<2xf32>
    %263 = vector.shape_cast %262 : vector<2xf32> to vector<2x1xf32>
    %264 = tpu.reciprocal %263 {approx = true} : vector<2x1xf32> -> vector<2x1xf32>
    %265 = vector.broadcast %264 : vector<2x1xf32> to vector<2x36xf32>
    %266 = arith.mulf %261, %265 : vector<2x36xf32>
    %267 = vector.shape_cast %266 : vector<2x36xf32> to vector<2x36x1xf32>
    %268 = vector.broadcast %267 : vector<2x36x1xf32> to vector<2x36x32xf32>
    %269 = arith.mulf %1, %268 : vector<2x36x32xf32>
    %cst_88 = arith.constant dense<0.000000e+00> : vector<2x32xf32>
    %270 = vector.multi_reduction <add>, %269, %cst_88 [1] : vector<2x36x32xf32> to vector<2x32xf32>
    %cst_89 = arith.constant dense<0.000000e+00> : vector<2x128xf32>
    %271 = tpu.matmul %270, %31, %cst_89 {dimension_numbers = #tpu.dot_dimension_numbers<[1], [0], [0], [1], [0, 0, 1, 1], [], []>} : vector<2x32xf32>, vector<32x128xf32>, vector<2x128xf32> -> vector<2x128xf32>
    %cst_90 = arith.constant dense<0.000000e+00> : vector<2x128xf32>
    %272 = tpu.matmul %242, %32, %cst_90 {dimension_numbers = #tpu.dot_dimension_numbers<[1], [0], [0], [1], [0, 0, 1, 1], [], []>} : vector<2x32xf32>, vector<32x128xf32>, vector<2x128xf32> -> vector<2x128xf32>
    %273 = arith.addf %271, %272 : vector<2x128xf32>
    %274 = vector.broadcast %33 : vector<1x128xf32> to vector<2x128xf32>
    %275 = arith.addf %273, %274 : vector<2x128xf32>
    %276 = vector.extract_strided_slice %275 {offsets = [0, 0], sizes = [2, 32], strides = [1, 1]} : vector<2x128xf32> to vector<2x32xf32>
    %277 = arith.negf %276 : vector<2x32xf32>
    %278 = math.exp %277 : vector<2x32xf32>
    %cst_91 = arith.constant 1.000000e+00 : f32
    %279 = vector.broadcast %cst_91 : f32 to vector<2x32xf32>
    %280 = arith.addf %279, %278 : vector<2x32xf32>
    %281 = arith.divf %279, %280 : vector<2x32xf32>
    %282 = vector.extract_strided_slice %275 {offsets = [0, 32], sizes = [2, 32], strides = [1, 1]} : vector<2x128xf32> to vector<2x32xf32>
    %283 = arith.negf %282 : vector<2x32xf32>
    %284 = math.exp %283 : vector<2x32xf32>
    %cst_92 = arith.constant 1.000000e+00 : f32
    %285 = vector.broadcast %cst_92 : f32 to vector<2x32xf32>
    %286 = arith.addf %285, %284 : vector<2x32xf32>
    %287 = arith.divf %285, %286 : vector<2x32xf32>
    %288 = vector.extract_strided_slice %275 {offsets = [0, 64], sizes = [2, 32], strides = [1, 1]} : vector<2x128xf32> to vector<2x32xf32>
    %289 = math.tanh %288 : vector<2x32xf32>
    %290 = vector.extract_strided_slice %275 {offsets = [0, 96], sizes = [2, 32], strides = [1, 1]} : vector<2x128xf32> to vector<2x32xf32>
    %291 = arith.negf %290 : vector<2x32xf32>
    %292 = math.exp %291 : vector<2x32xf32>
    %cst_93 = arith.constant 1.000000e+00 : f32
    %293 = vector.broadcast %cst_93 : f32 to vector<2x32xf32>
    %294 = arith.addf %293, %292 : vector<2x32xf32>
    %295 = arith.divf %293, %294 : vector<2x32xf32>
    %296 = arith.mulf %287, %208 : vector<2x32xf32>
    %297 = arith.mulf %281, %289 : vector<2x32xf32>
    %298 = arith.addf %296, %297 : vector<2x32xf32>
    %299 = math.tanh %298 : vector<2x32xf32>
    %300 = arith.mulf %295, %299 : vector<2x32xf32>
    %c2_94 = arith.constant 2 : index
    %c0_95 = arith.constant 0 : index
    %c0_96 = arith.constant 0 : index
    %301 = vector.load %arg18[%c2_94, %c0_95, %c0_96] : memref<6x2x32xf32, #tpu.memory_space<vmem>>, vector<1x2x32xf32>
    %302 = vector.shape_cast %301 : vector<1x2x32xf32> to vector<2x32xf32>
    %303 = vector.shape_cast %300 : vector<2x32xf32> to vector<1x2x32xf32>
    tpu.vector_store %arg18[%c2_94, %c0_95, %c0_96], %303 {strides = array<i32>} : memref<6x2x32xf32, #tpu.memory_space<vmem>>, vector<1x2x32xf32>,
    %cst_97 = arith.constant dense<0.000000e+00> : vector<2x128xf32>
    %304 = tpu.matmul %300, %26, %cst_97 {dimension_numbers = #tpu.dot_dimension_numbers<[1], [0], [0], [1], [0, 0, 1, 1], [], []>} : vector<2x32xf32>, vector<32x128xf32>, vector<2x128xf32> -> vector<2x128xf32>
    %305 = arith.addf %304, %14 : vector<2x128xf32>
    %c6 = arith.constant 6 : index
    %c0_98 = arith.constant 0 : index
    %306 = vector.load %arg19[%c6, %c0_98] : memref<12x128xf32, #tpu.memory_space<vmem>>, vector<2x128xf32>
    %307 = arith.addf %305, %306 : vector<2x128xf32>
    %308 = vector.extract_strided_slice %307 {offsets = [0, 0], sizes = [2, 32], strides = [1, 1]} : vector<2x128xf32> to vector<2x32xf32>
    %309 = arith.negf %308 : vector<2x32xf32>
    %310 = math.exp %309 : vector<2x32xf32>
    %cst_99 = arith.constant 1.000000e+00 : f32
    %311 = vector.broadcast %cst_99 : f32 to vector<2x32xf32>
    %312 = arith.addf %311, %310 : vector<2x32xf32>
    %313 = arith.divf %311, %312 : vector<2x32xf32>
    %314 = vector.extract_strided_slice %307 {offsets = [0, 32], sizes = [2, 32], strides = [1, 1]} : vector<2x128xf32> to vector<2x32xf32>
    %315 = arith.negf %314 : vector<2x32xf32>
    %316 = math.exp %315 : vector<2x32xf32>
    %cst_100 = arith.constant 1.000000e+00 : f32
    %317 = vector.broadcast %cst_100 : f32 to vector<2x32xf32>
    %318 = arith.addf %317, %316 : vector<2x32xf32>
    %319 = arith.divf %317, %318 : vector<2x32xf32>
    %320 = vector.extract_strided_slice %307 {offsets = [0, 64], sizes = [2, 32], strides = [1, 1]} : vector<2x128xf32> to vector<2x32xf32>
    %321 = math.tanh %320 : vector<2x32xf32>
    %322 = vector.extract_strided_slice %307 {offsets = [0, 96], sizes = [2, 32], strides = [1, 1]} : vector<2x128xf32> to vector<2x32xf32>
    %323 = arith.negf %322 : vector<2x32xf32>
    %324 = math.exp %323 : vector<2x32xf32>
    %cst_101 = arith.constant 1.000000e+00 : f32
    %325 = vector.broadcast %cst_101 : f32 to vector<2x32xf32>
    %326 = arith.addf %325, %324 : vector<2x32xf32>
    %327 = arith.divf %325, %326 : vector<2x32xf32>
    %328 = arith.mulf %319, %240 : vector<2x32xf32>
    %329 = arith.mulf %313, %321 : vector<2x32xf32>
    %330 = arith.addf %328, %329 : vector<2x32xf32>
    %331 = math.tanh %330 : vector<2x32xf32>
    %332 = arith.mulf %327, %331 : vector<2x32xf32>
    %cst_102 = arith.constant dense<0.000000e+00> : vector<2x32xf32>
    %333 = tpu.matmul %332, %27, %cst_102 {dimension_numbers = #tpu.dot_dimension_numbers<[1], [0], [0], [1], [0, 0, 1, 1], [], []>} : vector<2x32xf32>, vector<32x32xf32>, vector<2x32xf32> -> vector<2x32xf32>
    %334 = vector.broadcast %28 : vector<1x32xf32> to vector<2x32xf32>
    %335 = arith.addf %333, %334 : vector<2x32xf32>
    %336 = vector.shape_cast %335 : vector<2x32xf32> to vector<2x1x32xf32>
    %337 = vector.broadcast %336 : vector<2x1x32xf32> to vector<2x36x32xf32>
    %338 = arith.addf %25, %337 : vector<2x36x32xf32>
    %cst_103 = arith.constant 0.000000e+00 : f32
    %339 = vector.broadcast %cst_103 : f32 to vector<2x36x32xf32>
    %340 = arith.maximumf %338, %339 : vector<2x36x32xf32>
    %341 = vector.shape_cast %29 : vector<1x32xf32> to vector<1x1x32xf32>
    %342 = vector.broadcast %341 : vector<1x1x32xf32> to vector<2x36x32xf32>
    %343 = arith.mulf %340, %342 : vector<2x36x32xf32>
    %cst_104 = arith.constant dense<0.000000e+00> : vector<2x36xf32>
    %344 = vector.multi_reduction <add>, %343, %cst_104 [2] : vector<2x36x32xf32> to vector<2x36xf32>
    %345 = vector.broadcast %30 : vector<1x1xf32> to vector<2x36xf32>
    %346 = arith.addf %344, %345 : vector<2x36xf32>
    %cst_105 = arith.constant dense<0xFF800000> : vector<2xf32>
    %347 = vector.multi_reduction <maximumf>, %346, %cst_105 [1] : vector<2x36xf32> to vector<2xf32>
    %348 = vector.shape_cast %347 : vector<2xf32> to vector<2x1xf32>
    %349 = vector.broadcast %348 : vector<2x1xf32> to vector<2x36xf32>
    %350 = arith.subf %346, %349 : vector<2x36xf32>
    %351 = math.exp %350 : vector<2x36xf32>
    %cst_106 = arith.constant dense<0.000000e+00> : vector<2xf32>
    %352 = vector.multi_reduction <add>, %351, %cst_106 [1] : vector<2x36xf32> to vector<2xf32>
    %353 = vector.shape_cast %352 : vector<2xf32> to vector<2x1xf32>
    %354 = tpu.reciprocal %353 {approx = true} : vector<2x1xf32> -> vector<2x1xf32>
    %355 = vector.broadcast %354 : vector<2x1xf32> to vector<2x36xf32>
    %356 = arith.mulf %351, %355 : vector<2x36xf32>
    %357 = vector.shape_cast %356 : vector<2x36xf32> to vector<2x36x1xf32>
    %358 = vector.broadcast %357 : vector<2x36x1xf32> to vector<2x36x32xf32>
    %359 = arith.mulf %1, %358 : vector<2x36x32xf32>
    %cst_107 = arith.constant dense<0.000000e+00> : vector<2x32xf32>
    %360 = vector.multi_reduction <add>, %359, %cst_107 [1] : vector<2x36x32xf32> to vector<2x32xf32>
    %cst_108 = arith.constant dense<0.000000e+00> : vector<2x128xf32>
    %361 = tpu.matmul %360, %31, %cst_108 {dimension_numbers = #tpu.dot_dimension_numbers<[1], [0], [0], [1], [0, 0, 1, 1], [], []>} : vector<2x32xf32>, vector<32x128xf32>, vector<2x128xf32> -> vector<2x128xf32>
    %cst_109 = arith.constant dense<0.000000e+00> : vector<2x128xf32>
    %362 = tpu.matmul %332, %32, %cst_109 {dimension_numbers = #tpu.dot_dimension_numbers<[1], [0], [0], [1], [0, 0, 1, 1], [], []>} : vector<2x32xf32>, vector<32x128xf32>, vector<2x128xf32> -> vector<2x128xf32>
    %363 = arith.addf %361, %362 : vector<2x128xf32>
    %364 = vector.broadcast %33 : vector<1x128xf32> to vector<2x128xf32>
    %365 = arith.addf %363, %364 : vector<2x128xf32>
    %366 = vector.extract_strided_slice %365 {offsets = [0, 0], sizes = [2, 32], strides = [1, 1]} : vector<2x128xf32> to vector<2x32xf32>
    %367 = arith.negf %366 : vector<2x32xf32>
    %368 = math.exp %367 : vector<2x32xf32>
    %cst_110 = arith.constant 1.000000e+00 : f32
    %369 = vector.broadcast %cst_110 : f32 to vector<2x32xf32>
    %370 = arith.addf %369, %368 : vector<2x32xf32>
    %371 = arith.divf %369, %370 : vector<2x32xf32>
    %372 = vector.extract_strided_slice %365 {offsets = [0, 32], sizes = [2, 32], strides = [1, 1]} : vector<2x128xf32> to vector<2x32xf32>
    %373 = arith.negf %372 : vector<2x32xf32>
    %374 = math.exp %373 : vector<2x32xf32>
    %cst_111 = arith.constant 1.000000e+00 : f32
    %375 = vector.broadcast %cst_111 : f32 to vector<2x32xf32>
    %376 = arith.addf %375, %374 : vector<2x32xf32>
    %377 = arith.divf %375, %376 : vector<2x32xf32>
    %378 = vector.extract_strided_slice %365 {offsets = [0, 64], sizes = [2, 32], strides = [1, 1]} : vector<2x128xf32> to vector<2x32xf32>
    %379 = math.tanh %378 : vector<2x32xf32>
    %380 = vector.extract_strided_slice %365 {offsets = [0, 96], sizes = [2, 32], strides = [1, 1]} : vector<2x128xf32> to vector<2x32xf32>
    %381 = arith.negf %380 : vector<2x32xf32>
    %382 = math.exp %381 : vector<2x32xf32>
    %cst_112 = arith.constant 1.000000e+00 : f32
    %383 = vector.broadcast %cst_112 : f32 to vector<2x32xf32>
    %384 = arith.addf %383, %382 : vector<2x32xf32>
    %385 = arith.divf %383, %384 : vector<2x32xf32>
    %386 = arith.mulf %377, %298 : vector<2x32xf32>
    %387 = arith.mulf %371, %379 : vector<2x32xf32>
    %388 = arith.addf %386, %387 : vector<2x32xf32>
    %389 = math.tanh %388 : vector<2x32xf32>
    %390 = arith.mulf %385, %389 : vector<2x32xf32>
    %c3 = arith.constant 3 : index
    %c0_113 = arith.constant 0 : index
    %c0_114 = arith.constant 0 : index
    %391 = vector.load %arg18[%c3, %c0_113, %c0_114] : memref<6x2x32xf32, #tpu.memory_space<vmem>>, vector<1x2x32xf32>
    %392 = vector.shape_cast %391 : vector<1x2x32xf32> to vector<2x32xf32>
    %393 = vector.shape_cast %390 : vector<2x32xf32> to vector<1x2x32xf32>
    tpu.vector_store %arg18[%c3, %c0_113, %c0_114], %393 {strides = array<i32>} : memref<6x2x32xf32, #tpu.memory_space<vmem>>, vector<1x2x32xf32>,
    %cst_115 = arith.constant dense<0.000000e+00> : vector<2x128xf32>
    %394 = tpu.matmul %390, %26, %cst_115 {dimension_numbers = #tpu.dot_dimension_numbers<[1], [0], [0], [1], [0, 0, 1, 1], [], []>} : vector<2x32xf32>, vector<32x128xf32>, vector<2x128xf32> -> vector<2x128xf32>
    %395 = arith.addf %394, %14 : vector<2x128xf32>
    %c8 = arith.constant 8 : index
    %c0_116 = arith.constant 0 : index
    %396 = vector.load %arg19[%c8, %c0_116] : memref<12x128xf32, #tpu.memory_space<vmem>>, vector<2x128xf32>
    %397 = arith.addf %395, %396 : vector<2x128xf32>
    %398 = vector.extract_strided_slice %397 {offsets = [0, 0], sizes = [2, 32], strides = [1, 1]} : vector<2x128xf32> to vector<2x32xf32>
    %399 = arith.negf %398 : vector<2x32xf32>
    %400 = math.exp %399 : vector<2x32xf32>
    %cst_117 = arith.constant 1.000000e+00 : f32
    %401 = vector.broadcast %cst_117 : f32 to vector<2x32xf32>
    %402 = arith.addf %401, %400 : vector<2x32xf32>
    %403 = arith.divf %401, %402 : vector<2x32xf32>
    %404 = vector.extract_strided_slice %397 {offsets = [0, 32], sizes = [2, 32], strides = [1, 1]} : vector<2x128xf32> to vector<2x32xf32>
    %405 = arith.negf %404 : vector<2x32xf32>
    %406 = math.exp %405 : vector<2x32xf32>
    %cst_118 = arith.constant 1.000000e+00 : f32
    %407 = vector.broadcast %cst_118 : f32 to vector<2x32xf32>
    %408 = arith.addf %407, %406 : vector<2x32xf32>
    %409 = arith.divf %407, %408 : vector<2x32xf32>
    %410 = vector.extract_strided_slice %397 {offsets = [0, 64], sizes = [2, 32], strides = [1, 1]} : vector<2x128xf32> to vector<2x32xf32>
    %411 = math.tanh %410 : vector<2x32xf32>
    %412 = vector.extract_strided_slice %397 {offsets = [0, 96], sizes = [2, 32], strides = [1, 1]} : vector<2x128xf32> to vector<2x32xf32>
    %413 = arith.negf %412 : vector<2x32xf32>
    %414 = math.exp %413 : vector<2x32xf32>
    %cst_119 = arith.constant 1.000000e+00 : f32
    %415 = vector.broadcast %cst_119 : f32 to vector<2x32xf32>
    %416 = arith.addf %415, %414 : vector<2x32xf32>
    %417 = arith.divf %415, %416 : vector<2x32xf32>
    %418 = arith.mulf %409, %330 : vector<2x32xf32>
    %419 = arith.mulf %403, %411 : vector<2x32xf32>
    %420 = arith.addf %418, %419 : vector<2x32xf32>
    %421 = math.tanh %420 : vector<2x32xf32>
    %422 = arith.mulf %417, %421 : vector<2x32xf32>
    %cst_120 = arith.constant dense<0.000000e+00> : vector<2x32xf32>
    %423 = tpu.matmul %422, %27, %cst_120 {dimension_numbers = #tpu.dot_dimension_numbers<[1], [0], [0], [1], [0, 0, 1, 1], [], []>} : vector<2x32xf32>, vector<32x32xf32>, vector<2x32xf32> -> vector<2x32xf32>
    %424 = vector.broadcast %28 : vector<1x32xf32> to vector<2x32xf32>
    %425 = arith.addf %423, %424 : vector<2x32xf32>
    %426 = vector.shape_cast %425 : vector<2x32xf32> to vector<2x1x32xf32>
    %427 = vector.broadcast %426 : vector<2x1x32xf32> to vector<2x36x32xf32>
    %428 = arith.addf %25, %427 : vector<2x36x32xf32>
    %cst_121 = arith.constant 0.000000e+00 : f32
    %429 = vector.broadcast %cst_121 : f32 to vector<2x36x32xf32>
    %430 = arith.maximumf %428, %429 : vector<2x36x32xf32>
    %431 = vector.shape_cast %29 : vector<1x32xf32> to vector<1x1x32xf32>
    %432 = vector.broadcast %431 : vector<1x1x32xf32> to vector<2x36x32xf32>
    %433 = arith.mulf %430, %432 : vector<2x36x32xf32>
    %cst_122 = arith.constant dense<0.000000e+00> : vector<2x36xf32>
    %434 = vector.multi_reduction <add>, %433, %cst_122 [2] : vector<2x36x32xf32> to vector<2x36xf32>
    %435 = vector.broadcast %30 : vector<1x1xf32> to vector<2x36xf32>
    %436 = arith.addf %434, %435 : vector<2x36xf32>
    %cst_123 = arith.constant dense<0xFF800000> : vector<2xf32>
    %437 = vector.multi_reduction <maximumf>, %436, %cst_123 [1] : vector<2x36xf32> to vector<2xf32>
    %438 = vector.shape_cast %437 : vector<2xf32> to vector<2x1xf32>
    %439 = vector.broadcast %438 : vector<2x1xf32> to vector<2x36xf32>
    %440 = arith.subf %436, %439 : vector<2x36xf32>
    %441 = math.exp %440 : vector<2x36xf32>
    %cst_124 = arith.constant dense<0.000000e+00> : vector<2xf32>
    %442 = vector.multi_reduction <add>, %441, %cst_124 [1] : vector<2x36xf32> to vector<2xf32>
    %443 = vector.shape_cast %442 : vector<2xf32> to vector<2x1xf32>
    %444 = tpu.reciprocal %443 {approx = true} : vector<2x1xf32> -> vector<2x1xf32>
    %445 = vector.broadcast %444 : vector<2x1xf32> to vector<2x36xf32>
    %446 = arith.mulf %441, %445 : vector<2x36xf32>
    %447 = vector.shape_cast %446 : vector<2x36xf32> to vector<2x36x1xf32>
    %448 = vector.broadcast %447 : vector<2x36x1xf32> to vector<2x36x32xf32>
    %449 = arith.mulf %1, %448 : vector<2x36x32xf32>
    %cst_125 = arith.constant dense<0.000000e+00> : vector<2x32xf32>
    %450 = vector.multi_reduction <add>, %449, %cst_125 [1] : vector<2x36x32xf32> to vector<2x32xf32>
    %cst_126 = arith.constant dense<0.000000e+00> : vector<2x128xf32>
    %451 = tpu.matmul %450, %31, %cst_126 {dimension_numbers = #tpu.dot_dimension_numbers<[1], [0], [0], [1], [0, 0, 1, 1], [], []>} : vector<2x32xf32>, vector<32x128xf32>, vector<2x128xf32> -> vector<2x128xf32>
    %cst_127 = arith.constant dense<0.000000e+00> : vector<2x128xf32>
    %452 = tpu.matmul %422, %32, %cst_127 {dimension_numbers = #tpu.dot_dimension_numbers<[1], [0], [0], [1], [0, 0, 1, 1], [], []>} : vector<2x32xf32>, vector<32x128xf32>, vector<2x128xf32> -> vector<2x128xf32>
    %453 = arith.addf %451, %452 : vector<2x128xf32>
    %454 = vector.broadcast %33 : vector<1x128xf32> to vector<2x128xf32>
    %455 = arith.addf %453, %454 : vector<2x128xf32>
    %456 = vector.extract_strided_slice %455 {offsets = [0, 0], sizes = [2, 32], strides = [1, 1]} : vector<2x128xf32> to vector<2x32xf32>
    %457 = arith.negf %456 : vector<2x32xf32>
    %458 = math.exp %457 : vector<2x32xf32>
    %cst_128 = arith.constant 1.000000e+00 : f32
    %459 = vector.broadcast %cst_128 : f32 to vector<2x32xf32>
    %460 = arith.addf %459, %458 : vector<2x32xf32>
    %461 = arith.divf %459, %460 : vector<2x32xf32>
    %462 = vector.extract_strided_slice %455 {offsets = [0, 32], sizes = [2, 32], strides = [1, 1]} : vector<2x128xf32> to vector<2x32xf32>
    %463 = arith.negf %462 : vector<2x32xf32>
    %464 = math.exp %463 : vector<2x32xf32>
    %cst_129 = arith.constant 1.000000e+00 : f32
    %465 = vector.broadcast %cst_129 : f32 to vector<2x32xf32>
    %466 = arith.addf %465, %464 : vector<2x32xf32>
    %467 = arith.divf %465, %466 : vector<2x32xf32>
    %468 = vector.extract_strided_slice %455 {offsets = [0, 64], sizes = [2, 32], strides = [1, 1]} : vector<2x128xf32> to vector<2x32xf32>
    %469 = math.tanh %468 : vector<2x32xf32>
    %470 = vector.extract_strided_slice %455 {offsets = [0, 96], sizes = [2, 32], strides = [1, 1]} : vector<2x128xf32> to vector<2x32xf32>
    %471 = arith.negf %470 : vector<2x32xf32>
    %472 = math.exp %471 : vector<2x32xf32>
    %cst_130 = arith.constant 1.000000e+00 : f32
    %473 = vector.broadcast %cst_130 : f32 to vector<2x32xf32>
    %474 = arith.addf %473, %472 : vector<2x32xf32>
    %475 = arith.divf %473, %474 : vector<2x32xf32>
    %476 = arith.mulf %467, %388 : vector<2x32xf32>
    %477 = arith.mulf %461, %469 : vector<2x32xf32>
    %478 = arith.addf %476, %477 : vector<2x32xf32>
    %479 = math.tanh %478 : vector<2x32xf32>
    %480 = arith.mulf %475, %479 : vector<2x32xf32>
    %c4_131 = arith.constant 4 : index
    %c0_132 = arith.constant 0 : index
    %c0_133 = arith.constant 0 : index
    %481 = vector.load %arg18[%c4_131, %c0_132, %c0_133] : memref<6x2x32xf32, #tpu.memory_space<vmem>>, vector<1x2x32xf32>
    %482 = vector.shape_cast %481 : vector<1x2x32xf32> to vector<2x32xf32>
    %483 = vector.shape_cast %480 : vector<2x32xf32> to vector<1x2x32xf32>
    tpu.vector_store %arg18[%c4_131, %c0_132, %c0_133], %483 {strides = array<i32>} : memref<6x2x32xf32, #tpu.memory_space<vmem>>, vector<1x2x32xf32>,
    %cst_134 = arith.constant dense<0.000000e+00> : vector<2x128xf32>
    %484 = tpu.matmul %480, %26, %cst_134 {dimension_numbers = #tpu.dot_dimension_numbers<[1], [0], [0], [1], [0, 0, 1, 1], [], []>} : vector<2x32xf32>, vector<32x128xf32>, vector<2x128xf32> -> vector<2x128xf32>
    %485 = arith.addf %484, %14 : vector<2x128xf32>
    %c10 = arith.constant 10 : index
    %c0_135 = arith.constant 0 : index
    %486 = vector.load %arg19[%c10, %c0_135] : memref<12x128xf32, #tpu.memory_space<vmem>>, vector<2x128xf32>
    %487 = arith.addf %485, %486 : vector<2x128xf32>
    %488 = vector.extract_strided_slice %487 {offsets = [0, 0], sizes = [2, 32], strides = [1, 1]} : vector<2x128xf32> to vector<2x32xf32>
    %489 = arith.negf %488 : vector<2x32xf32>
    %490 = math.exp %489 : vector<2x32xf32>
    %cst_136 = arith.constant 1.000000e+00 : f32
    %491 = vector.broadcast %cst_136 : f32 to vector<2x32xf32>
    %492 = arith.addf %491, %490 : vector<2x32xf32>
    %493 = arith.divf %491, %492 : vector<2x32xf32>
    %494 = vector.extract_strided_slice %487 {offsets = [0, 32], sizes = [2, 32], strides = [1, 1]} : vector<2x128xf32> to vector<2x32xf32>
    %495 = arith.negf %494 : vector<2x32xf32>
    %496 = math.exp %495 : vector<2x32xf32>
    %cst_137 = arith.constant 1.000000e+00 : f32
    %497 = vector.broadcast %cst_137 : f32 to vector<2x32xf32>
    %498 = arith.addf %497, %496 : vector<2x32xf32>
    %499 = arith.divf %497, %498 : vector<2x32xf32>
    %500 = vector.extract_strided_slice %487 {offsets = [0, 64], sizes = [2, 32], strides = [1, 1]} : vector<2x128xf32> to vector<2x32xf32>
    %501 = math.tanh %500 : vector<2x32xf32>
    %502 = vector.extract_strided_slice %487 {offsets = [0, 96], sizes = [2, 32], strides = [1, 1]} : vector<2x128xf32> to vector<2x32xf32>
    %503 = arith.negf %502 : vector<2x32xf32>
    %504 = math.exp %503 : vector<2x32xf32>
    %cst_138 = arith.constant 1.000000e+00 : f32
    %505 = vector.broadcast %cst_138 : f32 to vector<2x32xf32>
    %506 = arith.addf %505, %504 : vector<2x32xf32>
    %507 = arith.divf %505, %506 : vector<2x32xf32>
    %508 = arith.mulf %499, %420 : vector<2x32xf32>
    %509 = arith.mulf %493, %501 : vector<2x32xf32>
    %510 = arith.addf %508, %509 : vector<2x32xf32>
    %511 = math.tanh %510 : vector<2x32xf32>
    %512 = arith.mulf %507, %511 : vector<2x32xf32>
    %cst_139 = arith.constant dense<0.000000e+00> : vector<2x32xf32>
    %513 = tpu.matmul %512, %27, %cst_139 {dimension_numbers = #tpu.dot_dimension_numbers<[1], [0], [0], [1], [0, 0, 1, 1], [], []>} : vector<2x32xf32>, vector<32x32xf32>, vector<2x32xf32> -> vector<2x32xf32>
    %514 = vector.broadcast %28 : vector<1x32xf32> to vector<2x32xf32>
    %515 = arith.addf %513, %514 : vector<2x32xf32>
    %516 = vector.shape_cast %515 : vector<2x32xf32> to vector<2x1x32xf32>
    %517 = vector.broadcast %516 : vector<2x1x32xf32> to vector<2x36x32xf32>
    %518 = arith.addf %25, %517 : vector<2x36x32xf32>
    %cst_140 = arith.constant 0.000000e+00 : f32
    %519 = vector.broadcast %cst_140 : f32 to vector<2x36x32xf32>
    %520 = arith.maximumf %518, %519 : vector<2x36x32xf32>
    %521 = vector.shape_cast %29 : vector<1x32xf32> to vector<1x1x32xf32>
    %522 = vector.broadcast %521 : vector<1x1x32xf32> to vector<2x36x32xf32>
    %523 = arith.mulf %520, %522 : vector<2x36x32xf32>
    %cst_141 = arith.constant dense<0.000000e+00> : vector<2x36xf32>
    %524 = vector.multi_reduction <add>, %523, %cst_141 [2] : vector<2x36x32xf32> to vector<2x36xf32>
    %525 = vector.broadcast %30 : vector<1x1xf32> to vector<2x36xf32>
    %526 = arith.addf %524, %525 : vector<2x36xf32>
    %cst_142 = arith.constant dense<0xFF800000> : vector<2xf32>
    %527 = vector.multi_reduction <maximumf>, %526, %cst_142 [1] : vector<2x36xf32> to vector<2xf32>
    %528 = vector.shape_cast %527 : vector<2xf32> to vector<2x1xf32>
    %529 = vector.broadcast %528 : vector<2x1xf32> to vector<2x36xf32>
    %530 = arith.subf %526, %529 : vector<2x36xf32>
    %531 = math.exp %530 : vector<2x36xf32>
    %cst_143 = arith.constant dense<0.000000e+00> : vector<2xf32>
    %532 = vector.multi_reduction <add>, %531, %cst_143 [1] : vector<2x36xf32> to vector<2xf32>
    %533 = vector.shape_cast %532 : vector<2xf32> to vector<2x1xf32>
    %534 = tpu.reciprocal %533 {approx = true} : vector<2x1xf32> -> vector<2x1xf32>
    %535 = vector.broadcast %534 : vector<2x1xf32> to vector<2x36xf32>
    %536 = arith.mulf %531, %535 : vector<2x36xf32>
    %537 = vector.shape_cast %536 : vector<2x36xf32> to vector<2x36x1xf32>
    %538 = vector.broadcast %537 : vector<2x36x1xf32> to vector<2x36x32xf32>
    %539 = arith.mulf %1, %538 : vector<2x36x32xf32>
    %cst_144 = arith.constant dense<0.000000e+00> : vector<2x32xf32>
    %540 = vector.multi_reduction <add>, %539, %cst_144 [1] : vector<2x36x32xf32> to vector<2x32xf32>
    %cst_145 = arith.constant dense<0.000000e+00> : vector<2x128xf32>
    %541 = tpu.matmul %540, %31, %cst_145 {dimension_numbers = #tpu.dot_dimension_numbers<[1], [0], [0], [1], [0, 0, 1, 1], [], []>} : vector<2x32xf32>, vector<32x128xf32>, vector<2x128xf32> -> vector<2x128xf32>
    %cst_146 = arith.constant dense<0.000000e+00> : vector<2x128xf32>
    %542 = tpu.matmul %512, %32, %cst_146 {dimension_numbers = #tpu.dot_dimension_numbers<[1], [0], [0], [1], [0, 0, 1, 1], [], []>} : vector<2x32xf32>, vector<32x128xf32>, vector<2x128xf32> -> vector<2x128xf32>
    %543 = arith.addf %541, %542 : vector<2x128xf32>
    %544 = vector.broadcast %33 : vector<1x128xf32> to vector<2x128xf32>
    %545 = arith.addf %543, %544 : vector<2x128xf32>
    %546 = vector.extract_strided_slice %545 {offsets = [0, 0], sizes = [2, 32], strides = [1, 1]} : vector<2x128xf32> to vector<2x32xf32>
    %547 = arith.negf %546 : vector<2x32xf32>
    %548 = math.exp %547 : vector<2x32xf32>
    %cst_147 = arith.constant 1.000000e+00 : f32
    %549 = vector.broadcast %cst_147 : f32 to vector<2x32xf32>
    %550 = arith.addf %549, %548 : vector<2x32xf32>
    %551 = arith.divf %549, %550 : vector<2x32xf32>
    %552 = vector.extract_strided_slice %545 {offsets = [0, 32], sizes = [2, 32], strides = [1, 1]} : vector<2x128xf32> to vector<2x32xf32>
    %553 = arith.negf %552 : vector<2x32xf32>
    %554 = math.exp %553 : vector<2x32xf32>
    %cst_148 = arith.constant 1.000000e+00 : f32
    %555 = vector.broadcast %cst_148 : f32 to vector<2x32xf32>
    %556 = arith.addf %555, %554 : vector<2x32xf32>
    %557 = arith.divf %555, %556 : vector<2x32xf32>
    %558 = vector.extract_strided_slice %545 {offsets = [0, 64], sizes = [2, 32], strides = [1, 1]} : vector<2x128xf32> to vector<2x32xf32>
    %559 = math.tanh %558 : vector<2x32xf32>
    %560 = vector.extract_strided_slice %545 {offsets = [0, 96], sizes = [2, 32], strides = [1, 1]} : vector<2x128xf32> to vector<2x32xf32>
    %561 = arith.negf %560 : vector<2x32xf32>
    %562 = math.exp %561 : vector<2x32xf32>
    %cst_149 = arith.constant 1.000000e+00 : f32
    %563 = vector.broadcast %cst_149 : f32 to vector<2x32xf32>
    %564 = arith.addf %563, %562 : vector<2x32xf32>
    %565 = arith.divf %563, %564 : vector<2x32xf32>
    %566 = arith.mulf %557, %478 : vector<2x32xf32>
    %567 = arith.mulf %551, %559 : vector<2x32xf32>
    %568 = arith.addf %566, %567 : vector<2x32xf32>
    %569 = math.tanh %568 : vector<2x32xf32>
    %570 = arith.mulf %565, %569 : vector<2x32xf32>
    %c5 = arith.constant 5 : index
    %c0_150 = arith.constant 0 : index
    %c0_151 = arith.constant 0 : index
    %571 = vector.load %arg18[%c5, %c0_150, %c0_151] : memref<6x2x32xf32, #tpu.memory_space<vmem>>, vector<1x2x32xf32>
    %572 = vector.shape_cast %571 : vector<1x2x32xf32> to vector<2x32xf32>
    %573 = vector.shape_cast %570 : vector<2x32xf32> to vector<1x2x32xf32>
    tpu.vector_store %arg18[%c5, %c0_150, %c0_151], %573 {strides = array<i32>} : memref<6x2x32xf32, #tpu.memory_space<vmem>>, vector<1x2x32xf32>,
    return
  }
  func.func @transform_0(%arg0: i32) -> (i32, i32) {
    %c0_i32 = arith.constant 0 : i32
    %c0_i32_0 = arith.constant 0 : i32
    %c0_i32_1 = arith.constant 0 : i32
    return %c0_i32, %c0_i32_0 : i32, i32
  }
  func.func @transform_1(%arg0: i32) -> (i32, i32) {
    %c0_i32 = arith.constant 0 : i32
    %c0_i32_0 = arith.constant 0 : i32
    %c0_i32_1 = arith.constant 0 : i32
    return %c0_i32, %c0_i32_0 : i32, i32
  }
  func.func @transform_2(%arg0: i32) -> (i32, i32, i32) {
    %c0_i32 = arith.constant 0 : i32
    %c0_i32_0 = arith.constant 0 : i32
    %c0_i32_1 = arith.constant 0 : i32
    %c0_i32_2 = arith.constant 0 : i32
    return %c0_i32, %c0_i32_0, %c0_i32_1 : i32, i32, i32
  }
  func.func @transform_3(%arg0: i32) -> (i32, i32) {
    %c0_i32 = arith.constant 0 : i32
    %c0_i32_0 = arith.constant 0 : i32
    %c0_i32_1 = arith.constant 0 : i32
    return %c0_i32, %c0_i32_0 : i32, i32
  }
  func.func @transform_4(%arg0: i32) -> (i32, i32) {
    %c0_i32 = arith.constant 0 : i32
    %c0_i32_0 = arith.constant 0 : i32
    %c0_i32_1 = arith.constant 0 : i32
    return %c0_i32, %c0_i32_0 : i32, i32
  }
  func.func @transform_5(%arg0: i32) -> (i32, i32) {
    %c0_i32 = arith.constant 0 : i32
    %c0_i32_0 = arith.constant 0 : i32
    %c0_i32_1 = arith.constant 0 : i32
    return %c0_i32, %c0_i32_0 : i32, i32
  }
  func.func @transform_6(%arg0: i32) -> (i32, i32) {
    %c0_i32 = arith.constant 0 : i32
    %c0_i32_0 = arith.constant 0 : i32
    %c0_i32_1 = arith.constant 0 : i32
    return %c0_i32, %c0_i32_0 : i32, i32
  }
  func.func @transform_7(%arg0: i32) -> (i32, i32) {
    %c0_i32 = arith.constant 0 : i32
    %c0_i32_0 = arith.constant 0 : i32
    %c0_i32_1 = arith.constant 0 : i32
    return %c0_i32, %c0_i32_0 : i32, i32
  }
  func.func @transform_8(%arg0: i32) -> (i32, i32) {
    %c0_i32 = arith.constant 0 : i32
    %c0_i32_0 = arith.constant 0 : i32
    %c0_i32_1 = arith.constant 0 : i32
    return %c0_i32, %c0_i32_0 : i32, i32
  }
  func.func @transform_9(%arg0: i32) -> (i32, i32) {
    %c0_i32 = arith.constant 0 : i32
    %c0_i32_0 = arith.constant 0 : i32
    %c0_i32_1 = arith.constant 0 : i32
    return %c0_i32, %c0_i32_0 : i32, i32
  }
  func.func @transform_10(%arg0: i32) -> (i32, i32) {
    %c0_i32 = arith.constant 0 : i32
    %c0_i32_0 = arith.constant 0 : i32
    %c0_i32_1 = arith.constant 0 : i32
    return %c0_i32, %c0_i32_0 : i32, i32
  }
  func.func @transform_11(%arg0: i32) -> (i32, i32) {
    %c0_i32 = arith.constant 0 : i32
    %c0_i32_0 = arith.constant 0 : i32
    %c0_i32_1 = arith.constant 0 : i32
    return %c0_i32, %c0_i32_0 : i32, i32
  }
  func.func @transform_12(%arg0: i32) -> (i32, i32) {
    %c0_i32 = arith.constant 0 : i32
    %c0_i32_0 = arith.constant 0 : i32
    %c0_i32_1 = arith.constant 0 : i32
    return %c0_i32, %c0_i32_0 : i32, i32
  }
  func.func @transform_13(%arg0: i32) -> (i32, i32) {
    %c0_i32 = arith.constant 0 : i32
    %c0_i32_0 = arith.constant 0 : i32
    %c0_i32_1 = arith.constant 0 : i32
    return %c0_i32, %c0_i32_0 : i32, i32
  }
  func.func @transform_14(%arg0: i32) -> (i32, i32) {
    %c0_i32 = arith.constant 0 : i32
    %c0_i32_0 = arith.constant 0 : i32
    %c0_i32_1 = arith.constant 0 : i32
    return %c0_i32, %c0_i32_0 : i32, i32
  }
  func.func @transform_15(%arg0: i32) -> (i32, i32) {
    %c0_i32 = arith.constant 0 : i32
    %c0_i32_0 = arith.constant 0 : i32
    %c0_i32_1 = arith.constant 0 : i32
    return %c0_i32, %c0_i32_0 : i32, i32
  }
  func.func @transform_16(%arg0: i32) -> (i32, i32) {
    %c0_i32 = arith.constant 0 : i32
    %c0_i32_0 = arith.constant 0 : i32
    %c0_i32_1 = arith.constant 0 : i32
    return %c0_i32, %c0_i32_0 : i32, i32
  }
  func.func @transform_17(%arg0: i32) -> (i32, i32, i32) {
    %c0_i32 = arith.constant 0 : i32
    %c0_i32_0 = arith.constant 0 : i32
    %c0_i32_1 = arith.constant 0 : i32
    %c0_i32_2 = arith.constant 0 : i32
    return %c0_i32, %c0_i32_0, %c0_i32_1 : i32, i32, i32
  }
}

</mosaic_0001>

<bundles_post_ra>
// kernel: tpu_custom_call.1
= control target key start
LH: loop header
LB: loop body
LE: loop exit
PB: predicated region body
PF: predicated region fallthrough
CT: control target
= control target key end

     0   :  { %s5967_s0 = inlined_call_operand.vmem [shape: f32[12,16], index: 0, kind: input, shape index: {}]   ;;  %s5968_s1 = inlined_call_operand.vmem [shape: f32[2,32], index: 1, kind: input, shape index: {}]   ;;  %s5969_s2 = inlined_call_operand.vmem [shape: f32[2,36,32], index: 2, kind: input, shape index: {}]   ;;  %s5970_s3 = inlined_call_operand.vmem [shape: f32[32,128], index: 3, kind: input, shape index: {}]   ;;  %s5971_s4 = inlined_call_operand.vmem [shape: f32[1,128], index: 4, kind: input, shape index: {}]   ;;  %s5972_s5 = inlined_call_operand.vmem [shape: f32[32,128], index: 5, kind: input, shape index: {}]   ;;  %s5973_s6 = inlined_call_operand.hbm [shape: f32[32,128], index: 6, kind: input, shape index: {}]   ;;  %s5974_s7 = inlined_call_operand.hbm [shape: f32[16,128], index: 7, kind: input, shape index: {}]   ;;  %s5975_s8 = inlined_call_operand.vmem [shape: f32[1,128], index: 8, kind: input, shape index: {}]   ;;  %s5976_s9 = inlined_call_operand.hbm [shape: f32[32,32], index: 9, kind: input, shape index: {}]   ;;  %s5977_s10 = inlined_call_operand.vmem [shape: f32[1,32], index: 10, kind: input, shape index: {}]   ;;  %s5978_s11 = inlined_call_operand.hbm [shape: f32[32,32], index: 11, kind: input, shape index: {}]   ;;  %s5979_s12 = inlined_call_operand.vmem [shape: f32[1,32], index: 12, kind: input, shape index: {}]   ;;  %s5980_s13 = inlined_call_operand.vmem [shape: f32[1,32], index: 13, kind: input, shape index: {}]   ;;  %s5981_s14 = inlined_call_operand.<no memory space> [shape: f32[1,1], index: 14, kind: input, shape index: {}]   ;;  %s5982_s15 = inlined_call_operand.vmem [shape: f32[64,128], index: 15, kind: input, shape index: {}]   ;;  %s5983_s16 = inlined_call_operand.vmem [shape: f32[1,128], index: 16, kind: input, shape index: {}]   ;;  %s5984_s17 = inlined_call_operand.hbm [shape: f32[6,2,32], index: 17, kind: output, shape index: {}]  }
   0x1   :  { %6030 = sst [smem:[#allocation36_spill]] %s5967_s0  ;;  %v22_v0 = vstv %s5981_s14 }
   0x2   :  { %6031 = sst [smem:[#allocation37_spill]] %s5968_s1  ;;  %23 = vst [vmem:[#allocation3] sm:$0x1] %v22_v0 }
   0x3   :  { %24 = vsyncpa [#allocation5], 0 }
   0x4   :  { %25 = vsyncpa [#allocation8], 0 }
   0x5   :  { %26 = vsyncpa [#allocation11], 0 }
   0x6   :  { %27 = vsyncpa [#allocation6], 0  ;;  %s57_s28 = sshll.u32 %s5974_s7, 4  ;;  %s4392_s29 = smov [#allocation7]   ;;  %s58_s28 = int_to_ptr.hbm [resolvable:$true] %s57_s28 }
   0x7   :  { %s59_s0 = sshll.u32 %s4392_s29, 4  ;;  %s44_s19 = sshll.u32 %s5973_s6, 4  ;;  %s60_s0 = int_to_ptr.vmem [resolvable:$true] %s59_s0  ;;  %s45_s19 = int_to_ptr.hbm [resolvable:$true] %s44_s19 }
   0x8   :  { %s4393_s1 = smov 128   ;;  %s4394_s20 = smov 8  }
   0x9   :  { %65 = dma.hbm_to_vmem [thread:$0]  %s58_s28, 256, %s60_s0, [#allocation8], %s4393_s1, %s4393_s1, %s4394_s20  }
   0xa   :  { %s4395_s14 = smov [#allocation4]   ;;  %s72_s24 = sshll.u32 %s5976_s9, 4  ;;  %s73_s24 = int_to_ptr.hbm [resolvable:$true] %s72_s24 }
   0xb   :  { %s46_s21 = sshll.u32 %s4395_s14, 4  ;;  %s87_s26 = sshll.u32 %s5978_s11, 4  ;;  %s47_s21 = int_to_ptr.vmem [resolvable:$true] %s46_s21  ;;  %s88_s26 = int_to_ptr.hbm [resolvable:$true] %s87_s26 }
   0xc   :  { %52 = dma.hbm_to_vmem [thread:$0]  %s45_s19, 512, %s47_s21, [#allocation5], %s4393_s1, %s4393_s1, %s4394_s20  }
   0xd   :  { %s4396_s27 = smov [#allocation9]   ;;  %s4397_s6 = smov [#allocation10]  }
   0xe   :  { %s74_s29 = sshll.u32 %s4396_s27, 4  ;;  %s89_s28 = sshll.u32 %s4397_s6, 4  ;;  %s75_s29 = int_to_ptr.vmem [resolvable:$true] %s74_s29  ;;  %s90_s28 = int_to_ptr.vmem [resolvable:$true] %s89_s28 }
   0xf   :  { %80 = dma.hbm_to_vmem [thread:$0]  %s73_s24, 512, %s75_s29, [#allocation8], %s4393_s1, %s4393_s1, %s4394_s20  }
  0x10   :  { %95 = dma.hbm_to_vmem [thread:$0]  %s88_s26, 512, %s90_s28, [#allocation11], %s4393_s1, %s4393_s1, %s4394_s20  }
  0x11   :  { %4384 = dma.done.wait [#allocation5], 512  }
  0x12   :  { %4385 = vsyncadd [#allocation5], 4294966784 }
  0x13   :  { %4386 = dma.done.wait [#allocation8], 768  }
  0x14   :  { %4387 = vsyncadd [#allocation8], 4294966528 }
  0x15   :  { %4388 = dma.done.wait [#allocation11], 512  }
  0x16   :  { %4389 = vsyncadd [#allocation11], 4294966784  ;;  %v136_v1 = vld [vmem:[%s5970_s3 + $0x18] sm:$0xff]  ;;  %v135_v2 = vld [vmem:[%s5970_s3 + $0x10] sm:$0xff]  ;;  %s6032_s22 = sld [smem:[#allocation37_spill]]  ;;  %vm141_vm0 = vcmask 261120  }
  0x17   :  { %157 = vmatpush.msra.mxu0 %v136_v1  ;;  %v134_v3 = vld [vmem:[%s5970_s3 + $0x8] sm:$0xff]  ;;  %v133_v4 = vld [vmem:[%s5970_s3] sm:$0xff]  ;;  %s6033_s7 = sld [smem:[#allocation36_spill]]  ;;  %vm197_vm1 = vcmask 130048   ;;  %v168_v9 = vld [vmem:[#allocation4 + $0x18] sm:$0xff]  ;;  %s4398_s30 = smov 64  }
  0x18   :  { %v196_v6 = vld [vmem:[#allocation7 + $0x8] sm:$0xff]  ;;  %v195_v7 = vld [vmem:[#allocation7] sm:$0xff]  ;;  %v167_v11 = vld [vmem:[#allocation4 + $0x10] sm:$0xff]  ;;  %185 = vmatpush.msra.mxu1 %v168_v9  ;;  %vm634_vm6 = vcmask 257024   ;;  %vm684_vm7 = vcmask 130112   ;;  %vm688_vm8 = vcmask 195712  }
  0x19   :  { %158 = vmatpush.msra.mxu0 %v135_v2  ;;  %218 = vmatpush.msra.mxu2 %v196_v6  ;;  %v4530_v10 = vld [vmem:[%s5972_s5 + $0x18] sm:$0xff]  ;;  %v4536_v12 = vld [vmem:[%s5972_s5 + $0x10] sm:$0xff]  ;;  %v166_v13 = vld [vmem:[#allocation4 + $0x8] sm:$0xff]  ;;  %vm692_vm9 = vcmask 261312   ;;  %vm696_vm10 = vcmask 326912   ;;  %vm707_vm11 = vcmask 1041409  }
  0x1a   :  { %186 = vmatpush.msra.mxu1 %v167_v11  ;;  %v4542_v14 = vld [vmem:[%s5972_s5 + $0x8] sm:$0xff]  ;;  %v165_v15 = vld [vmem:[#allocation4] sm:$0xff]  ;;  %v248_v51 = vld [vmem:[#allocation9 + $0x8] sm:$0xff]  ;;  %vm710_vm12 = vcmask 287744   ;;  %s3912_s6 = sshll.u32 %s5984_s17, 4  ;;  %s4401_s28 = smov [#allocation12]   ;;  %s3913_s6 = int_to_ptr.hbm [resolvable:$true] %s3912_s6 }
  0x1b   :  { %159 = vmatpush.msra.mxu0 %v134_v3  ;;  %219 = vmatpush.msra.mxu2 %v195_v7  ;;  %v4548_v16 = vld [vmem:[%s5972_s5] sm:$0xff]  ;;  %v4581_v53 = vld [vmem:[%s5969_s2 + $0x8] sm:$0xff]  ;;  %v4589_v56 = vld [vmem:[%s5969_s2 + $0x10] sm:$0xff]  ;;  %s4402_s9 = smov 2  }
  0x1c   :  { %v122_v5 = vld [vmem:[%s6032_s22] sm:$0x3]  ;;  %187 = vmatpush.msra.mxu1 %v166_v13  ;;  %v240_v55 = vrot.slane %v4581_v53, 4  ;;  %v4594_v57 = vld [vmem:[%s5969_s2 + $0x18] sm:$0xff]  ;;  %259 = vst [vmem:[#allocation1 + $0x10] ss:$2 sm:$0xff] %v4581_v53 }
  0x1d   :  { %160 = vmatpush.msra.mxu0 %v133_v4  ;;  %v193_v8 = vld [vmem:[%s6033_s7] sm:$0xff]  ;;  %v241_v58 = vrot.slane %v4589_v56, 4  ;;  %v247_v59 = vld [vmem:[#allocation9] sm:$0xff]  ;;  %v242_v60 = vrot.slane %v4594_v57, 4  ;;  %263 = vst [vmem:[#allocation1 + $0x20] ss:$2 sm:$0xff] %v4589_v56 }
  0x1e   :  { %3927 = vmatmul.msk.f32.vlgmr.msra.gmra.mxu0 %vm141_vm0, %v122_v5  ;;  %3929 = vmatmul.msk.f32.vlgmr.msra.gmra.mxu2 %vm197_vm1, %v193_v8  ;;  %v3990_v17 = vld [vmem:[%s5971_s4] ss:$0 sm:$0xff]  ;;  %s4399_s4 = smov 32   ;;  %v250_v49 = vld [vmem:[#allocation9 + $0x18] sm:$0xff]  ;;  %261 = vst [vmem:[#allocation1 + $0x11] ss:$2 sm:$0xff] %v240_v55 }
  0x1f   :  { %415 = vmatpush.msrb.mxu0 %v4530_v10  ;;  %188 = vmatpush.msra.mxu1 %v165_v15  ;;  %v3991_v22 = vld [vmem:[%s5975_s8] ss:$0 sm:$0xff]  ;;  %265 = vst [vmem:[#allocation1 + $0x21] ss:$2 sm:$0xff] %v241_v58  ;;  %v4609_v62 = vld [vmem:[%s5969_s2 + $0x28] sm:$0xff]  ;;  %v4616_v0 = vld [vmem:[%s5969_s2 + $0x30] sm:$0xff] }
  0x20   :  { %3928 = vmatmul.msk.f32.vlgmr.msra.gmra.mxu1 %vm141_vm0, %v122_v5  ;;  %v249_v50 = vld [vmem:[#allocation9 + $0x10] sm:$0xff]  ;;  %319 = vmatpush.msra.mxu3 %v250_v49  ;;  %267 = vst [vmem:[#allocation1 + $0x30] ss:$2 sm:$0xff] %v4594_v57  ;;  %v243_v2 = vrot.slane %v4609_v62, 4  ;;  %v244_v5 = vrot.slane %v4616_v0, 4 }
  0x21   :  { %416 = vmatpush.msrb.mxu0 %v4536_v12  ;;  %v4576_v52 = vld [vmem:[%s5969_s2] sm:$0xff]  ;;  %269 = vst [vmem:[#allocation1 + $0x31] ss:$2 sm:$0xff] %v242_v60  ;;  %v4625_v4 = vld [vmem:[%s5969_s2 + $0x38] sm:$0xff] }
  0x22   :  { %v239_v54 = vrot.slane %v4576_v52, 4  ;;  %255 = vst [vmem:[#allocation1] ss:$2 sm:$0xff] %v4576_v52  ;;  %320 = vmatpush.msra.mxu3 %v249_v50  ;;  %v4604_v61 = vld [vmem:[%s5969_s2 + $0x20] sm:$0xf]  ;;  %v245_v8 = vrot.slane %v4625_v4, 4 }
  0x23   :  { %417 = vmatpush.msrb.mxu0 %v4542_v14  ;;  %v4633_v7 = vld [vmem:[%s5969_s2 + $0x40] sm:$0xff] }
  0x24   :  { %257 = vst [vmem:[#allocation1 + $0x1] ss:$2 sm:$0xff] %v239_v54  ;;  %321 = vmatpush.msra.mxu3 %v248_v51  ;;  %v246_v11 = vrot.slane %v4633_v7, 4  ;;  %v4731_v55 = vld [vmem:[%s5980_s13] ss:$0 sm:$0xff] }
  0x25   :  { %418 = vmatpush.msrb.mxu0 %v4548_v16  ;;  %v271_v1 = vld.sshfl [vmem:[#allocation1 + $0x10] sm:$0xff pattern:$0x75316420]  ;;  %6037 = vst [vmem:[#allocation20_spill] sm:$0xff] %v4731_v55 }
  0x26   :  { %322 = vmatpush.msra.mxu3 %v247_v59  ;;  %277 = vst [vmem:[#allocation1 + $0x11] ss:$2 sm:$0xff] %v4616_v0  ;;  %v272_v3 = vld.sshfl [vmem:[#allocation1 + $0x20] sm:$0xff pattern:$0x75316420] }
  0x27   :  { %276 = vst [vmem:[#allocation1 + $0x10] ss:$2 sm:$0xff] %v243_v2 }
  0x28   :  { %279 = vst [vmem:[#allocation1 + $0x21] ss:$2 sm:$0xff] %v4625_v4  ;;  %v273_v6 = vld.sshfl [vmem:[#allocation1 + $0x30] sm:$0xff pattern:$0x75316420] }
  0x29   :  { %278 = vst [vmem:[#allocation1 + $0x20] ss:$2 sm:$0xff] %v244_v5 }
  0x2a   :  { %281 = vst [vmem:[#allocation1 + $0x31] ss:$2 sm:$0xff] %v4633_v7 }
  0x2b   :  { %v270_v63 = vld.sshfl [vmem:[#allocation1] sm:$0xff pattern:$0x75316420]  ;;  %280 = vst [vmem:[#allocation1 + $0x30] ss:$2 sm:$0xff] %v245_v8 }
  0x2c   :  { %3931 = vmatmul.msk.f32.vlgmr.msra.gmra.mxu3 %vm141_vm0, %v270_v63  ;;  %274 = vst [vmem:[#allocation1] ss:$2 sm:$0xff] %v4604_v61 }
  0x2d   :  { %275 = vst [vmem:[#allocation1 + $0x1] ss:$2 sm:$0xff] %v4609_v62 }
  0x34   :  { %3932 = vmatmul.msk.f32.gmra.mxu3 %vm141_vm0, %v271_v1  ;;  %v282_v15 = vld.sshfl [vmem:[#allocation1] sm:$0xff pattern:$0x75316420] }
  0x35   :  { %286 = vst [vmem:[#allocation1] ss:$2 sm:$0xff] %v246_v11  ;;  %v4750_v11 = vrot.slane %v4731_v55, 4 }
  0x37   :  { %6042 = vst [vmem:[#allocation25_spill] sm:$0xff] %v4750_v11 }
  0x3c   :  { %3933 = vmatmul.msk.f32.gmra.mxu3 %vm141_vm0, %v272_v3 }
  0x44   :  { %3934 = vmatmul.msk.f32.gmra.mxu3 %vm141_vm0, %v273_v6 }
  0x4c   :  { %3935 = vmatmul.msk.f32.gmra.mxu3 %vm141_vm0, %v282_v15 }
  0x9b   :  { %v162_v18 = vpop.f32.mrf.mxu0 }
  0x9c   :  { %v163_v19 = vadd.f32 %v3990_v17, %v162_v18  ;;  %v194_v17 = vld [vmem:[%s6033_s7 + $0x8] sm:$0xf] }
  0x9d   :  { %v190_v23 = vpop.f32.mrf.mxu1  ;;  %v4643_v18 = vld [vmem:[#allocation10 + $0x18] sm:$0xff]  ;;  %3930 = vmatmul.msk.f32.gmra.mxu2 %vm197_vm1, %v194_v17 }
  0x9e   :  { %399 = vrot.lane.b32.xlu0 %v163_v19, %s4398_s30  ;;  %v4564_v24 = vadd.f32 %v3991_v22, %v190_v23  ;;  %482 = vmatpush.msrb.mxu1 %v4643_v18  ;;  %v4657_v22 = vld [vmem:[%s5982_s15 + $0x30] sm:$0xff]  ;;  %v4663_v23 = vld [vmem:[%s5969_s2 + $0x48] sm:$0xf] }
  0x9f   :  { %287 = vst [vmem:[#allocation1 + $0x1] ss:$2 sm:$0xff] %v4663_v23 }
  0xa1   :  { %v221_v20 = vpop.f32.mrf.mxu2 }
  0xa2   :  { %227 = vst [vmem:[#allocation2] sm:$0xff] %v221_v20  ;;  %v4652_v20 = vld [vmem:[#allocation10 + $0x10] sm:$0xff] }
  0xa3   :  { %483 = vmatpush.msrb.mxu1 %v4652_v20 }
  0xa9   :  { %v423_v26 = vld [vmem:[#allocation2] sm:$0x3] }
 0x110   :  { %v4557_v21 = vpop.permute.xlu0 %399 }
 0x111   :  { %3940 = vmatmul.msk.f32.vlgmr.msrb.gmra.mxu0 %vm141_vm0, %v4557_v21 }
 0x18e   :  { %v420_v25 = vpop.f32.mrf.mxu0 }
 0x18f   :  { %v421_v27 = vadd.f32 %v420_v25, %v4564_v24  ;;  %v4669_v25 = vld [vmem:[#allocation10 + $0x8] sm:$0xff] }
 0x190   :  { %484 = vmatpush.msrb.mxu1 %v4669_v25 }
 0x191   :  { %v424_v28 = vadd.f32 %v423_v26, %v421_v27  ;;  %v4674_v26 = vld [vmem:[%s5982_s15 + $0x28] sm:$0xff] }
 0x192   :  { %v4676_v27 = vld [vmem:[#allocation10] sm:$0xff] }
 0x193   :  { %3997 = vtanh.f32 %v424_v28  ;;  %v3941_v30 = vmul.f32 -1.442695, %v424_v28  ;;  %v4683_v28 = vld [vmem:[%s5982_s15 + $0x20] sm:$0xff]  ;;  %485 = vmatpush.msrb.mxu1 %v4676_v27 }
 0x195   :  { %3999 = vpow2.f32 %v3941_v30  ;;  %1025 = vmatpush.msra.mxu1 %v4530_v10  ;;  %v284_v30 = vld.sshfl [vmem:[#allocation1 + $0x20] sm:$0xff pattern:$0x75316420] }
 0x197   :  { %1026 = vmatpush.msra.mxu1 %v4536_v12 }
 0x199   :  { %v3998_v29 = vpop.eup %3997  ;;  %1027 = vmatpush.msra.mxu1 %v4542_v14 }
 0x19a   :  { %447 = vrot.lane.b32.xlu0 %v3998_v29, %s4398_s30  ;;  %v283_v29 = vld.sshfl [vmem:[#allocation1 + $0x10] sm:$0xff pattern:$0x75316420] }
 0x19b   :  { %v4000_v31 = vpop.eup %3999  ;;  %3936 = vmatmul.msk.f32.gmra.mxu3 %vm141_vm0, %v283_v29  ;;  %1028 = vmatpush.msra.mxu1 %v4548_v16 }
 0x19c   :  { %v428_v32 = vadd.f32 1.0, %v4000_v31  ;;  %v285_v31 = vld.sshfl [vmem:[#allocation1 + $0x30] sm:$0xff pattern:$0x75316420] }
 0x19e   :  { %4001 = vrcp.f32 %v428_v32  ;;  %v440_v38 = vand.u32 2147483648, %v428_v32  ;;  %vm434_vm3 = vweird.f32 %v428_v32  ;;  %v438_v39 = vand.u32 2147483647, %v428_v32 }
 0x1a0   :  { %v441_v41 = vor.u32 1.1754944e-38, %v440_v38  ;;  %vm439_vm5 = vcmp.eq.f32.partialorder %v438_v39, 8.507059e+37 }
 0x1a3   :  { %3937 = vmatmul.msk.f32.gmra.mxu3 %vm141_vm0, %v284_v30 }
 0x1a4   :  { %v4002_v33 = vpop.eup %4001 }
 0x1a5   :  { %v430_v34 = vmul.f32 %v4002_v33, %v428_v32  ;;  %vm435_vm2 = vweird.f32 %v4002_v33  ;;  %v288_v32 = vld.sshfl [vmem:[#allocation1] sm:$0xff pattern:$0x75316420] }
 0x1a6   :  { %vm436_vm4 = vmor %vm434_vm3, %vm435_vm2  ;;  %vm1009_vm2 = vcmask 254976  }
 0x1a7   :  { %v431_v35 = vsub.f32 1.0, %v430_v34  ;;  %v224_v34 = vpop.f32.mrf.mxu2 }
 0x1a8   :  { %228 = vst [vmem:[#allocation2 + $0x8] sm:$0xf] %v224_v34 }
 0x1a9   :  { %v432_v36 = vmul.f32 %v4002_v33, %v431_v35  ;;  %v324_v35 = vpop.f32.mrf.mxu3 }
 0x1ab   :  { %v433_v37 = vadd.f32 %v4002_v33, %v432_v36  ;;  %3938 = vmatmul.msk.f32.gmra.mxu3 %vm141_vm0, %v285_v31 }
 0x1ad   :  { %v437_v40 = vsel %vm436_vm4, %v4002_v33, %v433_v37 }
 0x1ae   :  { %v442_v43 = vsel %vm439_vm5, %v441_v41, %v437_v40 }
 0x1af   :  { %v445_v45 = vmul.f32 %v442_v43, %v163_v19  ;;  %v4648_v19 = vld [vmem:[%s5982_s15 + $0x38] sm:$0xff] }
 0x1b0   :  { %930 = vmatpush.msrb.mxu2 %v4648_v19 }
 0x1b1   :  { %v327_v36 = vpop.f32.mrf.mxu3 }
 0x1b2   :  { %931 = vmatpush.msrb.mxu2 %v4657_v22 }
 0x1b3   :  { %3939 = vmatmul.msk.f32.gmra.mxu3 %vm141_vm0, %v288_v32 }
 0x1b4   :  { %932 = vmatpush.msrb.mxu2 %v4674_v26 }
 0x1b6   :  { %933 = vmatpush.msrb.mxu2 %v4683_v28 }
 0x1b8   :  { %1089 = vmatpush.msra.mxu2 %v4643_v18 }
 0x1b9   :  { %v330_v37 = vpop.f32.mrf.mxu3 }
 0x1ba   :  { %1090 = vmatpush.msra.mxu2 %v4652_v20 }
 0x1bc   :  { %1091 = vmatpush.msra.mxu2 %v4669_v25 }
 0x1be   :  { %1092 = vmatpush.msra.mxu2 %v4676_v27 }
 0x1c1   :  { %v333_v38 = vpop.f32.mrf.mxu3 }
 0x1c9   :  { %v336_v39 = vpop.f32.mrf.mxu3 }
 0x20c   :  { %v448_v42 = vpop.permute.xlu0 %447 }
 0x20d   :  { %v450_v44 = vmul.f32 %v448_v42, %v442_v43  ;;  %v3992_v42 = vld [vmem:[%s5977_s10] ss:$0 sm:$0xff] }
 0x20e   :  { %v4743_v3 = vadd.f32 %v3992_v42, %v336_v39 }
 0x20f   :  { %452 = vrot.lane.b32.xlu1 %v450_v44, %s4399_s4  ;;  %v4718_v44 = vadd.f32 %v3992_v42, %v330_v37 }
 0x210   :  { %6040 = vst [vmem:[#allocation23_spill] sm:$0xff] %v4743_v3  ;;  %v4755_v32 = vrot.slane %v4743_v3, 4 }
 0x211   :  { %6034 = vst [vmem:[#allocation17_spill] sm:$0xff] %v4718_v44  ;;  %v4736_v60 = vrot.slane %v4718_v44, 4 }
 0x212   :  { %6043 = vst [vmem:[#allocation26_spill] sm:$0xff] %v4755_v32 }
 0x213   :  { %6038 = vst [vmem:[#allocation21_spill] sm:$0xff] %v4736_v60 }
 0x21e   :  { %v339_v40 = vpop.f32.mrf.mxu3 }
 0x21f   :  { %v4746_v6 = vadd.f32 %v3992_v42, %v339_v40 }
 0x221   :  { %6041 = vst [vmem:[#allocation24_spill] sm:$0xff] %v4746_v6  ;;  %v4758_v34 = vrot.slane %v4746_v6, 4 }
 0x223   :  { %6044 = vst [vmem:[#allocation27_spill] sm:$0xff] %v4758_v34 }
 0x226   :  { %v342_v41 = vpop.f32.mrf.mxu3 }
 0x22e   :  { %v345_v50 = vpop.f32.mrf.mxu3 }
 0x281   :  { %v453_v46 = vpop.permute.xlu1 %452 }
 0x282   :  { %v4569_v47 = vadd.f32 %v453_v46, %v445_v45  ;;  %v4720_v46 = vadd.f32 %v3992_v42, %v333_v38 }
 0x284   :  { %4003 = vtanh.f32 %v4569_v47  ;;  %6035 = vst [vmem:[#allocation18_spill] sm:$0xff] %v4720_v46  ;;  %v4741_v2 = vrot.slane %v4720_v46, 4 }
 0x286   :  { %6039 = vst [vmem:[#allocation22_spill] sm:$0xff] %v4741_v2 }
 0x28a   :  { %v4004_v48 = vpop.eup %4003 }
 0x28b   :  { %458 = vrot.lane.b32.xlu1 %v4004_v48, %s4398_s30 }
 0x2fd   :  { %v459_v9 = vpop.permute.xlu1 %458 }
 0x2fe   :  { %v461_v13 = vmul.f32 %v459_v9, %v442_v43 }
 0x300   :  { %466 = vrot.lane.b32.xlu2 %v461_v13, %s4399_s4 }
 0x35a   :  { %v467_v33 = vpop.permute.xlu2 %466 }
 0x35b   :  { %3942 = vmatmul.msk.f32.vlgmr.msrb.gmra.mxu1 %vm141_vm0, %v467_v33  ;;  %3943 = vmatmul.msk.f32.vlgmr.msrb.gmra.mxu2 %vm141_vm0, %v467_v33 }
 0x35c   :  { %1604 = vmatpush.msrb.mxu2 %v4530_v10  ;;  %v4711_v10 = vld [vmem:[%s5979_s12] ss:$0 sm:$0xff] }
 0x35e   :  { %1605 = vmatpush.msrb.mxu2 %v4536_v12 }
 0x360   :  { %1606 = vmatpush.msrb.mxu2 %v4542_v14  ;;  %v4713_v14 = vadd.f32 %v3992_v42, %v324_v35  ;;  %v4760_v35 = vadd.f32 %v3992_v42, %v342_v41 }
 0x362   :  { %1607 = vmatpush.msrb.mxu2 %v4548_v16  ;;  %v4715_v16 = vadd.f32 %v3992_v42, %v327_v36  ;;  %v4723_v48 = vrot.slane %v4713_v14, 4  ;;  %6045 = vst [vmem:[#allocation28_spill] sm:$0xff] %v4760_v35 }
 0x364   :  { %v4726_v49 = vrot.slane %v4715_v16, 4 }
 0x366   :  { %6036 = vst [vmem:[#allocation19_spill] sm:$0xff] %v4726_v49 }
 0x3d8   :  { %v487_v12 = vpop.f32.mrf.mxu1 }
 0x3d9   :  { %v488_v43 = vadd.f32 %v4711_v10, %v487_v12 }
 0x3db   :  { %v492_v45 = vperm.slane %v488_v43, 0  ;;  %v491_v51 = vrot.slane %v488_v43, 1  ;;  %v4765_v43 = vadd.f32 %v3992_v42, %v345_v50 }
 0x3dd   :  { %v496_v54 = vrot.slane %v492_v45, 4  ;;  %v500_v58 = vadd.f32 %v492_v45, %v4713_v14  ;;  %v502_v59 = vadd.f32 %v492_v45, %v4715_v16  ;;  %v504_v5 = vadd.f32 %v492_v45, %v4718_v44  ;;  %6046 = vst [vmem:[#allocation29_spill] sm:$0xff] %v4765_v43 }
 0x3de   :  { %v493_v8 = vperm.slane %v491_v51, 0  ;;  %v506_v13 = vadd.f32 %v492_v45, %v4720_v46  ;;  %v508_v51 = vadd.f32 %v492_v45, %v4743_v3 }
 0x3df   :  { %v501_v63 = vadd.f32 %v496_v54, %v4723_v48  ;;  %v503_v1 = vadd.f32 %v496_v54, %v4726_v49  ;;  %v505_v9 = vadd.f32 %v496_v54, %v4736_v60  ;;  %v518_v15 = vmax.f32 %v500_v58, 0.0 }
 0x3e0   :  { %v520_v29 = vmax.f32 %v502_v59, 0.0  ;;  %v507_v30 = vadd.f32 %v496_v54, %v4741_v2  ;;  %v522_v33 = vmax.f32 %v504_v5, 0.0  ;;  %v497_v36 = vrot.slane %v493_v8, 4  ;;  %v348_v59 = vpop.f32.mrf.mxu3 }
 0x3e1   :  { %v519_v17 = vmax.f32 %v501_v63, 0.0  ;;  %v521_v31 = vmax.f32 %v503_v1, 0.0  ;;  %v523_v37 = vmax.f32 %v505_v9, 0.0  ;;  %v524_v38 = vmax.f32 %v506_v13, 0.0 }
 0x3e2   :  { %v541_v39 = vmul.f32 %v4731_v55, %v518_v15  ;;  %v543_v12 = vmul.f32 %v4731_v55, %v520_v29  ;;  %v525_v54 = vmax.f32 %v507_v30, 0.0  ;;  %v545_v41 = vmul.f32 %v4731_v55, %v522_v33 }
 0x3e3   :  { %v542_v40 = vmul.f32 %v4750_v11, %v519_v17  ;;  %v544_v58 = vmul.f32 %v4750_v11, %v521_v31  ;;  %v4771_v63 = vrot.slane %v4760_v35, 4  ;;  %v509_v1 = vadd.f32 %v493_v8, %v4755_v32 }
 0x3e4   :  { %577 = vst [vmem:[#allocation1] ss:$2 sm:$0xff] %v541_v39  ;;  %v546_v5 = vmul.f32 %v4750_v11, %v523_v37  ;;  %v510_v50 = vadd.f32 %v497_v36, %v4746_v6  ;;  %v547_v9 = vmul.f32 %v4731_v55, %v524_v38  ;;  %v4777_v45 = vadd.f32 %v3992_v42, %v348_v59 }
 0x3e5   :  { %6047 = vst [vmem:[#allocation30_spill] sm:$0xff] %v4771_v63  ;;  %v4780_v13 = vrot.slane %v4765_v43, 4  ;;  %v511_v15 = vadd.f32 %v493_v8, %v4758_v34  ;;  %v526_v17 = vmax.f32 %v508_v51, 0.0  ;;  %v548_v29 = vmul.f32 %v4750_v11, %v525_v54 }
 0x3e6   :  { %579 = vst [vmem:[#allocation1 + $0x1] ss:$2 sm:$0xff] %v542_v40  ;;  %v512_v30 = vadd.f32 %v497_v36, %v4760_v35  ;;  %v513_v31 = vadd.f32 %v493_v8, %v4771_v63  ;;  %v527_v33 = vmax.f32 %v509_v1, 0.0  ;;  %v514_v37 = vadd.f32 %v497_v36, %v4765_v43 }
 0x3e7   :  { %581 = vst [vmem:[#allocation1 + $0x10] ss:$2 sm:$0xff] %v543_v12  ;;  %v528_v42 = vmax.f32 %v510_v50, 0.0  ;;  %v4788_v38 = vrot.slane %v4777_v45, 4  ;;  %v515_v39 = vadd.f32 %v493_v8, %v4780_v13  ;;  %v529_v40 = vmax.f32 %v511_v15, 0.0 }
 0x3e8   :  { %6048 = vst [vmem:[#allocation31_spill] sm:$0xff] %v4777_v45  ;;  %v549_v12 = vmul.f32 %v4731_v55, %v526_v17  ;;  %v530_v51 = vmax.f32 %v512_v30, 0.0  ;;  %v531_v59 = vmax.f32 %v513_v31, 0.0  ;;  %v4400_v15 = vmov 0  }
 0x3e9   :  { %6049 = vst [vmem:[#allocation32_spill] sm:$0xff] %v4780_v13  ;;  %v551_v50 = vmul.f32 %v4750_v11, %v528_v42  ;;  %v517_v13 = vadd.f32 %v493_v8, %v4788_v38  ;;  %3987 = vset.pattern.permute.xlu1 %v4400_v15  ;;  %v533_v17 = vmax.f32 %v515_v39, 0.0  ;;  %3989 = vset.pattern.permute.xlu2 %v4400_v15 }
 0x3ea   :  { %583 = vst [vmem:[#allocation1 + $0x11] ss:$2 sm:$0xff] %v544_v58  ;;  %v516_v58 = vadd.f32 %v497_v36, %v4777_v45  ;;  %3988 = vset.pattern.permute.xlu0 %v4400_v15  ;;  %v553_v30 = vmul.f32 %v4750_v11, %v530_v51 }
 0x3eb   :  { %585 = vst [vmem:[#allocation1 + $0x20] ss:$2 sm:$0xff] %v545_v41  ;;  %v550_v41 = vmul.f32 %v4731_v55, %v527_v33  ;;  %v535_v39 = vmax.f32 %v517_v13, 0.0 }
 0x3ec   :  { %587 = vst [vmem:[#allocation1 + $0x21] ss:$2 sm:$0xff] %v546_v5  ;;  %v532_v5 = vmax.f32 %v514_v37, 0.0  ;;  %v534_v33 = vmax.f32 %v516_v58, 0.0  ;;  %v554_v37 = vmul.f32 %v4731_v55, %v531_v59 }
 0x3ed   :  { %589 = vst [vmem:[#allocation1 + $0x30] ss:$2 sm:$0xff] %v547_v9  ;;  %v592_v54 = vld.sshfl [vmem:[#allocation1] sm:$0xff pattern:$0x75316420]  ;;  %v558_v58 = vmul.f32 %v4731_v55, %v535_v39 }
 0x3ee   :  { %6050 = vst [vmem:[#allocation33_spill] sm:$0xff] %v4788_v38  ;;  %v622_v1 = vsel %vm141_vm0, %v592_v54, 0.0  ;;  %v555_v8 = vmul.f32 %v4750_v11, %v532_v5  ;;  %v557_v54 = vmul.f32 %v4750_v11, %v534_v33 }
 0x3ef   :  { %591 = vst [vmem:[#allocation1 + $0x31] ss:$2 sm:$0xff] %v548_v29  ;;  %623 = vadd.xlane.f32.xlu2 %v622_v1  ;;  %v552_v29 = vmul.f32 %v4731_v55, %v529_v40  ;;  %v556_v40 = vmul.f32 %v4731_v55, %v533_v17 }
 0x3f0   :  { %596 = vst [vmem:[#allocation1] ss:$2 sm:$0xff] %v549_v12 }
 0x3f1   :  { %v593_v9 = vld.sshfl [vmem:[#allocation1 + $0x10] sm:$0xff pattern:$0x75316420] }
 0x3f2   :  { %598 = vst [vmem:[#allocation1 + $0x10] ss:$2 sm:$0xff] %v550_v41  ;;  %v625_v36 = vsel %vm141_vm0, %v593_v9, 0.0 }
 0x3f3   :  { %v594_v31 = vld.sshfl [vmem:[#allocation1 + $0x20] sm:$0xff pattern:$0x75316420]  ;;  %599 = vst [vmem:[#allocation1 + $0x11] ss:$2 sm:$0xff] %v551_v50  ;;  %626 = vadd.xlane.f32.xlu0 %v625_v36 }
 0x3f4   :  { %600 = vst [vmem:[#allocation1 + $0x20] ss:$2 sm:$0xff] %v552_v29  ;;  %v628_v51 = vsel %vm141_vm0, %v594_v31, 0.0  ;;  %v3995_v31 = vld [vmem:[#allocation3] ss:$0 sm:$0xff] }
 0x3f5   :  { %601 = vst [vmem:[#allocation1 + $0x21] ss:$2 sm:$0xff] %v553_v30 }
 0x3f6   :  { %v595_v42 = vld.sshfl [vmem:[#allocation1 + $0x30] sm:$0xff pattern:$0x75316420] }
 0x3f7   :  { %602 = vst [vmem:[#allocation1 + $0x30] ss:$2 sm:$0xff] %v554_v37  ;;  %v597_v12 = vld.sshfl [vmem:[#allocation1] sm:$0xff pattern:$0x75316420]  ;;  %629 = vadd.xlane.f32.xlu2 %v628_v51  ;;  %v631_v5 = vsel %vm141_vm0, %v595_v42, 0.0 }
 0x3f8   :  { %603 = vst [vmem:[#allocation1 + $0x31] ss:$2 sm:$0xff] %v555_v8  ;;  %v635_v30 = vsel %vm634_vm6, %v597_v12, 0.0 }
 0x3f9   :  { %607 = vst [vmem:[#allocation1] ss:$2 sm:$0xff] %v556_v40 }
 0x3fa   :  { %608 = vst [vmem:[#allocation1 + $0x1] ss:$2 sm:$0xff] %v557_v54  ;;  %v604_v59 = vld.sshfl [vmem:[#allocation1 + $0x10] sm:$0xff pattern:$0x75316420]  ;;  %v679_v54 = vlaneseq }
 0x3fb   :  { %609 = vst [vmem:[#allocation1 + $0x10] ss:$2 sm:$0xff] %v558_v58  ;;  %v638_v41 = vsel %vm141_vm0, %v604_v59, 0.0 }
 0x3fc   :  { %639 = vadd.xlane.f32.xlu1 %v638_v41  ;;  %v605_v9 = vld.sshfl [vmem:[#allocation1 + $0x20] sm:$0xff pattern:$0x75316420]  ;;  %v4813_v59 = vand.u32 127, %v679_v54 }
 0x3fd   :  { %v641_v17 = vsel %vm141_vm0, %v605_v9, 0.0 }
 0x3fe   :  { %6051 = vst [vmem:[#allocation34_spill] sm:$0xff] %v4813_v59 }
 0x3ff   :  { %v606_v13 = vld.sshfl [vmem:[#allocation1 + $0x30] sm:$0xff pattern:$0x75316420]  ;;  %632 = vadd.xlane.f32.xlu2 %v631_v5  ;;  %v4824_v5 = vadd.s32 4294967272, %v4813_v59 }
 0x400   :  { %v644_v1 = vsel %vm141_vm0, %v606_v13, 0.0  ;;  %v4816_v13 = vadd.s32 4294967288, %v4813_v59 }
 0x401   :  { %645 = vadd.xlane.f32.xlu0 %v644_v1  ;;  %v610_v50 = vld.sshfl [vmem:[#allocation1] sm:$0xff pattern:$0x75316420]  ;;  %v4821_v1 = vadd.s32 4294967280, %v4813_v59 }
 0x402   :  { %v647_v15 = vsel %vm141_vm0, %v610_v50, 0.0  ;;  %v611_v29 = vld.sshfl [vmem:[#allocation1 + $0x10] sm:$0xff pattern:$0x75316420]  ;;  %v4827_v50 = vadd.s32 4294967264, %v4813_v59 }
 0x403   :  { %v650_v36 = vsel %vm634_vm6, %v611_v29, 0.0 }
 0x407   :  { %642 = vadd.xlane.f32.xlu2 %v641_v17 }
 0x409   :  { %648 = vadd.xlane.f32.xlu0 %v647_v15 }
 0x40f   :  { %636 = vadd.xlane.f32.xlu2 %v635_v30 }
 0x411   :  { %651 = vadd.xlane.f32.xlu0 %v650_v36 }
 0x415   :  { %656 = vperm.xlu1 %3987, %v3995_v31  }
 0x462   :  { %v624_v33 = vpop.xlane.xlu2 %623 }
 0x466   :  { %v627_v37 = vpop.xlane.xlu0 %626 }
 0x46a   :  { %v630_v8 = vpop.xlane.xlu2 %629 }
 0x46f   :  { %v640_v51 = vpop.xlane.xlu1 %639 }
 0x472   :  { %v633_v42 = vpop.xlane.xlu2 %632 }
 0x474   :  { %v646_v39 = vpop.xlane.xlu0 %645 }
 0x47a   :  { %v643_v40 = vpop.xlane.xlu2 %642 }
 0x47c   :  { %v649_v58 = vpop.xlane.xlu0 %648 }
 0x482   :  { %v637_v41 = vpop.xlane.xlu2 %636 }
 0x484   :  { %v652_v38 = vpop.xlane.xlu0 %651 }
 0x487   :  { %v4818_v12 = vpop.permute.xlu1 %656 }
 0x488   :  { %6052 = vst [vmem:[#allocation35_spill] sm:$0xff] %v4818_v12  ;;  %v659_v9 = vadd.f32 %v4818_v12, %v624_v33  ;;  %v660_v15 = vadd.f32 %v4818_v12, %v627_v37  ;;  %v4832_v17 = vadd.f32 %v4818_v12, %v630_v8  ;;  %v662_v29 = vadd.f32 %v4818_v12, %v633_v42 }
 0x489   :  { %v663_v36 = vadd.f32 %v4818_v12, %v637_v41  ;;  %v664_v30 = vadd.f32 %v4818_v12, %v640_v51  ;;  %v665_v31 = vadd.f32 %v4818_v12, %v643_v40  ;;  %v4839_v54 = vadd.f32 %v4818_v12, %v646_v39 }
 0x48a   :  { %v4842_v45 = vadd.f32 %v4818_v12, %v649_v58  ;;  %v681_v33 = vperm.slane %v659_v9, %v4813_v59  ;;  %v683_v37 = vperm.slane %v660_v15, %v4816_v13  ;;  %v668_v8 = vadd.f32 %v4818_v12, %v652_v38 }
 0x48b   :  { %v687_v42 = vperm.slane %v4832_v17, %v4821_v1  ;;  %v698_v40 = vperm.slane %v664_v30, %v4813_v59  ;;  %v691_v51 = vperm.slane %v662_v29, %v4824_v5  ;;  %v699_v58 = vperm.slane %v665_v31, %v4816_v13 }
 0x48c   :  { %v685_v39 = vsel %vm684_vm7, %v683_v37, %v681_v33  ;;  %v701_v41 = vperm.slane %v4839_v54, %v4821_v1  ;;  %v695_v63 = vperm.slane %v663_v36, %v4827_v50  ;;  %v703_v35 = vperm.slane %v4842_v45, %v4824_v5 }
 0x48d   :  { %v689_v43 = vsel %vm688_vm8, %v687_v42, %v685_v39  ;;  %v700_v12 = vsel %vm684_vm7, %v699_v58, %v698_v40  ;;  %v705_v34 = vperm.slane %v668_v8, %v4827_v50 }
 0x48e   :  { %v693_v38 = vsel %vm692_vm9, %v691_v51, %v689_v43  ;;  %v702_v37 = vsel %vm688_vm8, %v701_v41, %v700_v12 }
 0x48f   :  { %v697_v33 = vsel %vm696_vm10, %v695_v63, %v693_v38  ;;  %v704_v6 = vsel %vm692_vm9, %v703_v35, %v702_v37 }
 0x490   :  { %v706_v42 = vsel %vm696_vm10, %v705_v34, %v704_v6 }
 0x491   :  { %v708_v39 = vsel %vm707_vm11, %v706_v42, %v697_v33 }
 0x492   :  { %v711_v43 = vsel %vm710_vm12, %v708_v39, -inf }
 0x493   :  { %712 = vmax.xlane.f32.xlu2 %v711_v43 }
 0x506   :  { %v713_v40 = vpop.xlane.xlu2 %712 }
 0x507   :  { %v715_v51 = vperm.slane %v713_v40, 0  ;;  %v716_v58 = vperm.slane %v713_v40, 1 }
 0x509   :  { %v719_v32 = vsub.f32 %v659_v9, %v715_v51  ;;  %v720_v63 = vsub.f32 %v660_v15, %v715_v51  ;;  %v724_v38 = vsub.f32 %v664_v30, %v716_v58  ;;  %v725_v11 = vsub.f32 %v665_v31, %v716_v58 }
 0x50a   :  { %v722_v35 = vsub.f32 %v662_v29, %v715_v51  ;;  %v728_v37 = vsub.f32 %v668_v8, %v716_v58  ;;  %v723_v15 = vsub.f32 %v663_v36, %v715_v51  ;;  %v726_v8 = vsub.f32 %v4839_v54, %v716_v58 }
 0x50b   :  { %v731_v12 = vmul.f32 1.442695, %v720_v63  ;;  %v729_v41 = vmul.f32 1.442695, %v719_v32  ;;  %v739_v3 = vmul.f32 1.442695, %v724_v38  ;;  %v721_v32 = vsub.f32 %v4832_v17, %v715_v51 }
 0x50c   :  { %v741_v6 = vmul.f32 1.442695, %v725_v11  ;;  %v735_v34 = vmul.f32 1.442695, %v722_v35  ;;  %v747_v42 = vmul.f32 1.442695, %v728_v37  ;;  %v727_v40 = vsub.f32 %v4842_v45, %v716_v58 }
 0x50d   :  { %4005 = vpow2.f32 %v731_v12  ;;  %v737_v11 = vmul.f32 1.442695, %v723_v15  ;;  %v743_v17 = vmul.f32 1.442695, %v726_v8 }
 0x50e   :  { %4007 = vpow2.f32 %v739_v3  ;;  %v733_v3 = vmul.f32 1.442695, %v721_v32  ;;  %v745_v51 = vmul.f32 1.442695, %v727_v40 }
 0x50f   :  { %4009 = vpow2.f32 %v729_v41 }
 0x510   :  { %4011 = vpow2.f32 %v741_v6 }
 0x511   :  { %4013 = vpow2.f32 %v735_v34 }
 0x512   :  { %4015 = vpow2.f32 %v747_v42 }
 0x513   :  { %v4868_v33 = vpop.eup %4005  ;;  %4017 = vpow2.f32 %v733_v3 }
 0x514   :  { %v4870_v39 = vpop.eup %4007  ;;  %763 = vperm.xlu1 %3987, %v4868_v33   ;;  %4019 = vpow2.f32 %v737_v11 }
 0x515   :  { %v4873_v9 = vpop.eup %4009  ;;  %775 = vperm.xlu2 %3989, %v4870_v39   ;;  %4021 = vpow2.f32 %v743_v17 }
 0x516   :  { %760 = vperm.xlu0 %3988, %v4873_v9   ;;  %v4012_v29 = vpop.eup %4011  ;;  %4023 = vpow2.f32 %v745_v51 }
 0x517   :  { %v4878_v30 = vpop.eup %4013 }
 0x518   :  { %v4880_v31 = vpop.eup %4015 }
 0x519   :  { %v4018_v36 = vpop.eup %4017 }
 0x51a   :  { %v4885_v43 = vpop.eup %4019 }
 0x51b   :  { %v4022_v63 = vpop.eup %4021 }
 0x51c   :  { %778 = vperm.xlu1 %3987, %v4012_v29   ;;  %v4024_v54 = vpop.eup %4023 }
 0x51d   :  { %769 = vperm.xlu2 %3989, %v4878_v30  }
 0x51e   :  { %787 = vperm.xlu0 %3988, %v4880_v31  }
 0x524   :  { %766 = vperm.xlu1 %3987, %v4018_v36  }
 0x525   :  { %772 = vperm.xlu2 %3989, %v4885_v43  }
 0x52c   :  { %781 = vperm.xlu1 %3987, %v4022_v63  }
 0x534   :  { %784 = vperm.xlu1 %3987, %v4024_v54  }
 0x56f   :  { %v776_v41 = vpop.permute.xlu2 %775 }
 0x570   :  { %v798_v8 = vperm.slane %v776_v41, %v4813_v59 }
 0x577   :  { %v770_v37 = vpop.permute.xlu2 %769 }
 0x578   :  { %v794_v17 = vperm.slane %v770_v37, %v4824_v5 }
 0x57f   :  { %v773_v40 = vpop.permute.xlu2 %772 }
 0x586   :  { %v764_v38 = vpop.permute.xlu1 %763 }
 0x587   :  { %v790_v42 = vperm.slane %v764_v38, %v4816_v13 }
 0x588   :  { %v761_v6 = vpop.permute.xlu0 %760 }
 0x589   :  { %v789_v45 = vperm.slane %v761_v6, %v4813_v59 }
 0x58b   :  { %v791_v32 = vsel %vm684_vm7, %v790_v42, %v789_v45  ;;  %v796_v42 = vperm.slane %v773_v40, %v4827_v50 }
 0x58e   :  { %v779_v12 = vpop.permute.xlu1 %778 }
 0x58f   :  { %v799_v15 = vperm.slane %v779_v12, %v4816_v13 }
 0x590   :  { %v788_v51 = vpop.permute.xlu0 %787 }
 0x591   :  { %v800_v38 = vsel %vm684_vm7, %v799_v15, %v798_v8  ;;  %v805_v12 = vperm.slane %v788_v51, %v4827_v50 }
 0x596   :  { %v767_v35 = vpop.permute.xlu1 %766 }
 0x597   :  { %v792_v58 = vperm.slane %v767_v35, %v4821_v1 }
 0x599   :  { %v793_v3 = vsel %vm688_vm8, %v792_v58, %v791_v32 }
 0x59a   :  { %v795_v35 = vsel %vm692_vm9, %v794_v17, %v793_v3 }
 0x59b   :  { %v797_v41 = vsel %vm696_vm10, %v796_v42, %v795_v35 }
 0x59e   :  { %v782_v34 = vpop.permute.xlu1 %781 }
 0x59f   :  { %v801_v11 = vperm.slane %v782_v34, %v4821_v1 }
 0x5a1   :  { %v802_v45 = vsel %vm688_vm8, %v801_v11, %v800_v38 }
 0x5a6   :  { %v785_v55 = vpop.permute.xlu1 %784 }
 0x5a7   :  { %v803_v6 = vperm.slane %v785_v55, %v4824_v5 }
 0x5a9   :  { %v804_v34 = vsel %vm692_vm9, %v803_v6, %v802_v45 }
 0x5aa   :  { %v806_v37 = vsel %vm696_vm10, %v805_v12, %v804_v34 }
 0x5ab   :  { %v807_v58 = vsel %vm707_vm11, %v806_v37, %v797_v41 }
 0x5ac   :  { %v809_v32 = vsel %vm710_vm12, %v807_v58, 0.0  ;;  %v4923_v58 = vld [vmem:[%s5982_s15 + $0x18] sm:$0xff] }
 0x5ad   :  { %810 = vadd.xlane.f32.xlu1 %v809_v32  ;;  %v4928_v32 = vld [vmem:[%s5982_s15 + $0x10] sm:$0xff]  ;;  %955 = vmatpush.msra.mxu0 %v4923_v58 }
 0x5ae   :  { %1538 = vmatpush.msrb.mxu1 %v4923_v58 }
 0x5af   :  { %956 = vmatpush.msra.mxu0 %v4928_v32 }
 0x5b0   :  { %1539 = vmatpush.msrb.mxu1 %v4928_v32 }
 0x620   :  { %v811_v55 = vpop.xlane.xlu1 %810 }
 0x621   :  { %4025 = vrcp.f32 %v811_v55 }
 0x627   :  { %v4026_v15 = vpop.eup %4025 }
 0x628   :  { %v814_v3 = vperm.slane %v4026_v15, 0  ;;  %v815_v11 = vperm.slane %v4026_v15, 1  ;;  %v4935_v15 = vld [vmem:[%s5982_s15 + $0x8] sm:$0xff] }
 0x629   :  { %957 = vmatpush.msra.mxu0 %v4935_v15  ;;  %1540 = vmatpush.msrb.mxu1 %v4935_v15 }
 0x62a   :  { %v819_v8 = vmul.f32 %v4868_v33, %v814_v3  ;;  %v818_v17 = vmul.f32 %v4873_v9, %v814_v3  ;;  %v824_v40 = vmul.f32 %v4012_v29, %v815_v11  ;;  %v823_v51 = vmul.f32 %v4870_v39, %v815_v11 }
 0x62b   :  { %v825_v38 = vmul.f32 %v4022_v63, %v815_v11  ;;  %v820_v6 = vmul.f32 %v4018_v36, %v814_v3  ;;  %v826_v35 = vmul.f32 %v4024_v54, %v815_v11  ;;  %v821_v42 = vmul.f32 %v4878_v30, %v814_v3 }
 0x62c   :  { %835 = vperm.xlu0 %3988, %v819_v8   ;;  %830 = vperm.xlu2 %3989, %v818_v17   ;;  %v827_v33 = vmul.f32 %v4880_v31, %v815_v11  ;;  %v822_v9 = vmul.f32 %v4885_v43, %v814_v3 }
 0x634   :  { %860 = vperm.xlu0 %3988, %v824_v40   ;;  %855 = vperm.xlu2 %3989, %v823_v51   ;;  %v4945_v40 = vld [vmem:[%s5982_s15] sm:$0xff] }
 0x635   :  { %958 = vmatpush.msra.mxu0 %v4945_v40  ;;  %1541 = vmatpush.msrb.mxu1 %v4945_v40 }
 0x637   :  { %1513 = vmatpush.msrb.mxu0 %v4648_v19 }
 0x639   :  { %1514 = vmatpush.msrb.mxu0 %v4657_v22 }
 0x63b   :  { %1515 = vmatpush.msrb.mxu0 %v4674_v26 }
 0x63c   :  { %865 = vperm.xlu0 %3988, %v825_v38   ;;  %840 = vperm.xlu2 %3989, %v820_v6  }
 0x63d   :  { %1516 = vmatpush.msrb.mxu0 %v4683_v28 }
 0x644   :  { %870 = vperm.xlu0 %3988, %v826_v35   ;;  %845 = vperm.xlu2 %3989, %v821_v42  }
 0x64c   :  { %875 = vperm.xlu0 %3988, %v827_v33   ;;  %850 = vperm.xlu2 %3989, %v822_v9  }
 0x686   :  { %v831_v29 = vpop.permute.xlu2 %830 }
 0x687   :  { %v878_v54 = vmul.f32 %v831_v29, %v4576_v52 }
 0x689   :  { %v888_v41 = vsel %vm141_vm0, %v878_v54, 0.0 }
 0x68e   :  { %v856_v12 = vpop.permute.xlu2 %855 }
 0x68f   :  { %v883_v9 = vmul.f32 %v856_v12, %v4609_v62 }
 0x696   :  { %v841_v39 = vpop.permute.xlu2 %840 }
 0x697   :  { %v880_v31 = vmul.f32 %v841_v39, %v4589_v56 }
 0x699   :  { %v891_v3 = vsel %vm141_vm0, %v880_v31, 0.0 }
 0x69e   :  { %v836_v45 = vpop.permute.xlu0 %835  ;;  %v846_v34 = vpop.permute.xlu2 %845 }
 0x69f   :  { %v879_v36 = vmul.f32 %v836_v45, %v4581_v53  ;;  %v881_v8 = vmul.f32 %v846_v34, %v4594_v57 }
 0x6a1   :  { %v889_v30 = vsel %vm141_vm0, %v879_v36, 0.0  ;;  %v893_v51 = vsel %vm141_vm0, %v881_v8, 0.0  ;;  %v903_v36 = vsel %vm141_vm0, %v883_v9, 0.0 }
 0x6a2   :  { %v890_v37 = vadd.f32 %v889_v30, %v888_v41 }
 0x6a4   :  { %v892_v11 = vadd.f32 %v891_v3, %v890_v37 }
 0x6a6   :  { %v861_v63 = vpop.permute.xlu0 %860  ;;  %v851_v43 = vpop.permute.xlu2 %850  ;;  %v894_v6 = vadd.f32 %v893_v51, %v892_v11 }
 0x6a7   :  { %v882_v17 = vmul.f32 %v851_v43, %v4604_v61  ;;  %v884_v35 = vmul.f32 %v861_v63, %v4616_v0 }
 0x6a9   :  { %v895_v38 = vsel %vm634_vm6, %v882_v17, 0.0  ;;  %v904_v39 = vsel %vm141_vm0, %v884_v35, 0.0 }
 0x6aa   :  { %v896_v42 = vadd.f32 %v895_v38, %v894_v6  ;;  %v905_v54 = vadd.f32 %v904_v39, %v903_v36  ;;  %v4976_v39 = vld [vmem:[%s5983_s16] ss:$0 sm:$0xff] }
 0x6ac   :  { %v897_v34 = vrot.slane %v896_v42, 4 }
 0x6ae   :  { %v866_v55 = vpop.permute.xlu0 %865  ;;  %v898_v41 = vadd.f32 %v897_v34, %v896_v42 }
 0x6af   :  { %v885_v29 = vmul.f32 %v866_v55, %v4625_v4 }
 0x6b0   :  { %v899_v3 = vrot.slane %v898_v41, 2 }
 0x6b1   :  { %v906_v63 = vsel %vm141_vm0, %v885_v29, 0.0 }
 0x6b2   :  { %v907_v12 = vadd.f32 %v906_v63, %v905_v54  ;;  %v900_v11 = vadd.f32 %v899_v3, %v898_v41 }
 0x6b4   :  { %v901_v6 = vrot.slane %v900_v11, 1 }
 0x6b6   :  { %v871_v33 = vpop.permute.xlu0 %870  ;;  %v902_v9 = vadd.f32 %v901_v6, %v900_v11 }
 0x6b7   :  { %v886_v45 = vmul.f32 %v871_v33, %v4633_v7 }
 0x6b9   :  { %v908_v30 = vsel %vm141_vm0, %v886_v45, 0.0  ;;  %v935_v45 = vpop.f32.mrf.mxu2 }
 0x6ba   :  { %v909_v43 = vadd.f32 %v908_v30, %v907_v12 }
 0x6be   :  { %v876_v31 = vpop.permute.xlu0 %875 }
 0x6bf   :  { %v887_v37 = vmul.f32 %v876_v31, %v4663_v23 }
 0x6c1   :  { %v910_v55 = vsel %vm634_vm6, %v887_v37, 0.0 }
 0x6c2   :  { %v911_v8 = vadd.f32 %v910_v55, %v909_v43 }
 0x6c4   :  { %v912_v17 = vrot.slane %v911_v8, 4 }
 0x6c6   :  { %v913_v51 = vadd.f32 %v912_v17, %v911_v8 }
 0x6c8   :  { %v914_v38 = vrot.slane %v913_v51, 2 }
 0x6ca   :  { %v915_v35 = vadd.f32 %v914_v38, %v913_v51 }
 0x6cc   :  { %v916_v33 = vrot.slane %v915_v35, 1 }
 0x6ce   :  { %v917_v29 = vadd.f32 %v916_v33, %v915_v35 }
 0x6d0   :  { %v940_v42 = vsel %vm707_vm11, %v917_v29, %v902_v9 }
 0x6d1   :  { %3944 = vmatmul.msk.f32.vlgmr.msra.gmra.mxu0 %vm141_vm0, %v940_v42 }
 0x6d2   :  { %1668 = vmatpush.msra.mxu0 %v4643_v18 }
 0x6d4   :  { %1669 = vmatpush.msra.mxu0 %v4652_v20 }
 0x6d6   :  { %1670 = vmatpush.msra.mxu0 %v4669_v25 }
 0x6d8   :  { %1671 = vmatpush.msra.mxu0 %v4676_v27 }
 0x74e   :  { %v960_v34 = vpop.f32.mrf.mxu0 }
 0x74f   :  { %v961_v36 = vadd.f32 %v960_v34, %v935_v45  ;;  %v1033_v45 = vld [vmem:[#allocation2 + $0x2] sm:$0x3] }
 0x751   :  { %v966_v63 = vadd.f32 %v4976_v39, %v961_v36 }
 0x753   :  { %4027 = vtanh.f32 %v966_v63  ;;  %v3945_v18 = vmul.f32 -1.442695, %v966_v63 }
 0x755   :  { %4029 = vpow2.f32 %v3945_v18 }
 0x759   :  { %v4028_v54 = vpop.eup %4027 }
 0x75a   :  { %990 = vrot.lane.b32.xlu1 %v4028_v54, %s4398_s30 }
 0x75b   :  { %v4030_v20 = vpop.eup %4029 }
 0x75c   :  { %v970_v25 = vadd.f32 1.0, %v4030_v20 }
 0x75e   :  { %4031 = vrcp.f32 %v970_v25  ;;  %v982_v37 = vand.u32 2147483648, %v970_v25  ;;  %vm976_vm14 = vweird.f32 %v970_v25  ;;  %v980_v43 = vand.u32 2147483647, %v970_v25 }
 0x760   :  { %v983_v3 = vor.u32 1.1754944e-38, %v982_v37  ;;  %vm981_vm1 = vcmp.eq.f32.partialorder %v980_v43, 8.507059e+37 }
 0x764   :  { %v4032_v27 = vpop.eup %4031 }
 0x765   :  { %v972_v30 = vmul.f32 %v4032_v27, %v970_v25  ;;  %vm977_vm13 = vweird.f32 %v4032_v27 }
 0x766   :  { %vm978_vm15 = vmor %vm976_vm14, %vm977_vm13 }
 0x767   :  { %v973_v41 = vsub.f32 1.0, %v972_v30 }
 0x769   :  { %v974_v12 = vmul.f32 %v4032_v27, %v973_v41 }
 0x76b   :  { %v975_v31 = vadd.f32 %v4032_v27, %v974_v12 }
 0x76d   :  { %v979_v55 = vsel %vm978_vm15, %v4032_v27, %v975_v31 }
 0x76e   :  { %v984_v17 = vsel %vm981_vm1, %v983_v3, %v979_v55 }
 0x76f   :  { %v988_v51 = vmul.f32 %v984_v17, %v4557_v21 }
 0x7cc   :  { %v991_v8 = vpop.permute.xlu1 %990 }
 0x7cd   :  { %v993_v11 = vmul.f32 %v991_v8, %v984_v17 }
 0x7cf   :  { %995 = vrot.lane.b32.xlu2 %v993_v11, %s4399_s4 }
 0x829   :  { %v996_v38 = vpop.permute.xlu2 %995 }
 0x82a   :  { %v4982_v6 = vadd.f32 %v996_v38, %v988_v51  ;;  %v5015_v38 = vld [vmem:[%s5972_s5 + $0x10] sm:$0xff] }
 0x82c   :  { %4033 = vtanh.f32 %v4982_v6 }
 0x832   :  { %v4034_v35 = vpop.eup %4033 }
 0x833   :  { %1001 = vrot.lane.b32.xlu0 %v4034_v35, %s4398_s30 }
 0x8a5   :  { %v1002_v33 = vpop.permute.xlu0 %1001 }
 0x8a6   :  { %v1004_v9 = vmul.f32 %v1002_v33, %v984_v17 }
 0x8a8   :  { %1006 = vrot.lane.b32.xlu2 %v1004_v9, %s4399_s4 }
 0x902   :  { %v1007_v29 = vpop.permute.xlu2 %1006 }
 0x903   :  { %1010 = vst.msk [vmem:[#allocation12] sm:$0x3] %vm1009_vm2, %v1007_v29  ;;  %3946 = vmatmul.msk.f32.vlgmr.msra.gmra.mxu1 %vm141_vm0, %v1007_v29 }
 0x904   :  { %2092 = vmatpush.msra.mxu1 %v4648_v19 }
 0x906   :  { %2093 = vmatpush.msra.mxu1 %v4657_v22 }
 0x908   :  { %2094 = vmatpush.msra.mxu1 %v4674_v26 }
 0x90a   :  { %2095 = vmatpush.msra.mxu1 %v4683_v28 }
 0x980   :  { %v1030_v21 = vpop.f32.mrf.mxu1 }
 0x981   :  { %v1031_v42 = vadd.f32 %v1030_v21, %v4564_v24 }
 0x983   :  { %v1034_v34 = vadd.f32 %v1033_v45, %v1031_v42 }
 0x985   :  { %4035 = vtanh.f32 %v1034_v34  ;;  %v3947_v63 = vmul.f32 -1.442695, %v1034_v34 }
 0x987   :  { %4037 = vpow2.f32 %v3947_v63 }
 0x98b   :  { %v4036_v36 = vpop.eup %4035 }
 0x98c   :  { %1057 = vrot.lane.b32.xlu0 %v4036_v36, %s4398_s30 }
 0x98d   :  { %v4038_v54 = vpop.eup %4037 }
 0x98e   :  { %v1038_v18 = vadd.f32 1.0, %v4038_v54 }
 0x990   :  { %4039 = vrcp.f32 %v1038_v18  ;;  %v1050_v28 = vand.u32 2147483648, %v1038_v18  ;;  %vm1044_vm4 = vweird.f32 %v1038_v18  ;;  %v1048_v27 = vand.u32 2147483647, %v1038_v18 }
 0x992   :  { %v1051_v41 = vor.u32 1.1754944e-38, %v1050_v28  ;;  %vm1049_vm13 = vcmp.eq.f32.partialorder %v1048_v27, 8.507059e+37 }
 0x996   :  { %v4040_v19 = vpop.eup %4039 }
 0x997   :  { %v1040_v22 = vmul.f32 %v4040_v19, %v1038_v18  ;;  %vm1045_vm3 = vweird.f32 %v4040_v19 }
 0x998   :  { %vm1046_vm5 = vmor %vm1044_vm4, %vm1045_vm3 }
 0x999   :  { %v1041_v20 = vsub.f32 1.0, %v1040_v22 }
 0x99b   :  { %v1042_v26 = vmul.f32 %v4040_v19, %v1041_v20 }
 0x99d   :  { %v1043_v25 = vadd.f32 %v4040_v19, %v1042_v26 }
 0x99f   :  { %v1047_v30 = vsel %vm1046_vm5, %v4040_v19, %v1043_v25 }
 0x9a0   :  { %v1052_v31 = vsel %vm1049_vm13, %v1051_v41, %v1047_v30  ;;  %v6053_v30 = vld [vmem:[#allocation20_spill] sm:$0xff] }
 0x9a1   :  { %v1055_v43 = vmul.f32 %v1052_v31, %v4569_v47  ;;  %v5008_v47 = vld [vmem:[%s5972_s5 + $0x18] sm:$0xff] }
 0x9fe   :  { %v1058_v12 = vpop.permute.xlu0 %1057 }
 0x9ff   :  { %v1060_v37 = vmul.f32 %v1058_v12, %v1052_v31  ;;  %v6054_v12 = vld [vmem:[#allocation25_spill] sm:$0xff] }
 0xa01   :  { %1062 = vrot.lane.b32.xlu2 %v1060_v37, %s4399_s4 }
 0xa5b   :  { %v1063_v55 = vpop.permute.xlu2 %1062 }
 0xa5c   :  { %v4997_v3 = vadd.f32 %v1063_v55, %v1055_v43  ;;  %v6055_v43 = vld [vmem:[#allocation23_spill] sm:$0xff] }
 0xa5e   :  { %4041 = vtanh.f32 %v4997_v3 }
 0xa64   :  { %v4042_v8 = vpop.eup %4041 }
 0xa65   :  { %1068 = vrot.lane.b32.xlu0 %v4042_v8, %s4398_s30 }
 0xad7   :  { %v1069_v17 = vpop.permute.xlu0 %1068 }
 0xad8   :  { %v1071_v11 = vmul.f32 %v1069_v17, %v1052_v31 }
 0xada   :  { %1073 = vrot.lane.b32.xlu1 %v1071_v11, %s4399_s4 }
 0xb4c   :  { %v1074_v51 = vpop.permute.xlu1 %1073 }
 0xb4d   :  { %3948 = vmatmul.msk.f32.vlgmr.msra.gmra.mxu2 %vm141_vm0, %v1074_v51  ;;  %3949 = vmatmul.msk.f32.vlgmr.msrb.gmra.mxu0 %vm141_vm0, %v1074_v51  ;;  %v6056_v51 = vld [vmem:[#allocation26_spill] sm:$0xff] }
 0xb4e   :  { %2117 = vmatpush.msra.mxu2 %v4923_v58  ;;  %2183 = vmatpush.msrb.mxu0 %v5008_v47  ;;  %v5022_v58 = vld [vmem:[%s5972_s5 + $0x8] sm:$0xff] }
 0xb50   :  { %2118 = vmatpush.msra.mxu2 %v4928_v32  ;;  %2184 = vmatpush.msrb.mxu0 %v5015_v38  ;;  %v5029_v32 = vld [vmem:[%s5972_s5] sm:$0xff] }
 0xb52   :  { %2119 = vmatpush.msra.mxu2 %v4935_v15  ;;  %2185 = vmatpush.msrb.mxu0 %v5022_v58 }
 0xb54   :  { %2120 = vmatpush.msra.mxu2 %v4945_v40  ;;  %2186 = vmatpush.msrb.mxu0 %v5029_v32 }
 0xbd0   :  { %v1094_v35 = vpop.f32.mrf.mxu2 }
 0xbd1   :  { %v1095_v33 = vadd.f32 %v4711_v10, %v1094_v35 }
 0xbd3   :  { %v1099_v15 = vperm.slane %v1095_v33, 0  ;;  %v1098_v29 = vrot.slane %v1095_v33, 1 }
 0xbd5   :  { %v1103_v9 = vrot.slane %v1099_v15, 4  ;;  %v1107_v21 = vadd.f32 %v1099_v15, %v4713_v14  ;;  %v1109_v45 = vadd.f32 %v1099_v15, %v4715_v16  ;;  %v1111_v34 = vadd.f32 %v1099_v15, %v4718_v44 }
 0xbd6   :  { %v1100_v36 = vperm.slane %v1098_v29, 0  ;;  %v1113_v54 = vadd.f32 %v1099_v15, %v4720_v46  ;;  %v1115_v55 = vadd.f32 %v1099_v15, %v6055_v43 }
 0xbd7   :  { %v1108_v42 = vadd.f32 %v1103_v9, %v4723_v48  ;;  %v1110_v40 = vadd.f32 %v1103_v9, %v4726_v49  ;;  %v1112_v63 = vadd.f32 %v1103_v9, %v4736_v60  ;;  %v1125_v18 = vmax.f32 %v1107_v21, 0.0 }
 0xbd8   :  { %v1127_v19 = vmax.f32 %v1109_v45, 0.0  ;;  %v1114_v22 = vadd.f32 %v1103_v9, %v4741_v2  ;;  %v1129_v26 = vmax.f32 %v1111_v34, 0.0  ;;  %v1104_v25 = vrot.slane %v1100_v36, 4  ;;  %v6057_v9 = vld [vmem:[#allocation24_spill] sm:$0xff] }
 0xbd9   :  { %v1126_v10 = vmax.f32 %v1108_v42, 0.0  ;;  %v1128_v20 = vmax.f32 %v1110_v40, 0.0  ;;  %v1130_v28 = vmax.f32 %v1112_v63, 0.0  ;;  %v1131_v27 = vmax.f32 %v1113_v54, 0.0  ;;  %v6058_v42 = vld [vmem:[#allocation27_spill] sm:$0xff]  ;;  %v6059_v34 = vld [vmem:[#allocation28_spill] sm:$0xff] }
 0xbda   :  { %v1143_v41 = vmul.f32 %v6053_v30, %v1125_v18  ;;  %v1145_v37 = vmul.f32 %v6053_v30, %v1127_v19  ;;  %v1132_v8 = vmax.f32 %v1114_v22, 0.0  ;;  %v1147_v11 = vmul.f32 %v6053_v30, %v1129_v26  ;;  %v6060_v54 = vld [vmem:[#allocation30_spill] sm:$0xff]  ;;  %v6061_v19 = vld [vmem:[#allocation29_spill] sm:$0xff]  ;;  %v6062_v26 = vld [vmem:[#allocation32_spill] sm:$0xff] }
 0xbdb   :  { %v1144_v31 = vmul.f32 %v1126_v10, %v6054_v12  ;;  %v1146_v17 = vmul.f32 %v1128_v20, %v6054_v12  ;;  %v1116_v35 = vadd.f32 %v1100_v36, %v6056_v51  ;;  %v1148_v33 = vmul.f32 %v1130_v28, %v6054_v12 }
 0xbdc   :  { %1179 = vst [vmem:[#allocation1] ss:$2 sm:$0xff] %v1143_v41  ;;  %v1117_v29 = vadd.f32 %v1104_v25, %v6057_v9  ;;  %v1149_v21 = vmul.f32 %v6053_v30, %v1131_v27  ;;  %v1118_v45 = vadd.f32 %v1100_v36, %v6058_v42  ;;  %v1133_v40 = vmax.f32 %v1115_v55, 0.0 }
 0xbdd   :  { %1181 = vst [vmem:[#allocation1 + $0x1] ss:$2 sm:$0xff] %v1144_v31  ;;  %v1150_v15 = vmul.f32 %v1132_v8, %v6054_v12  ;;  %v1119_v63 = vadd.f32 %v1104_v25, %v6059_v34  ;;  %v1120_v18 = vadd.f32 %v1100_v36, %v6060_v54  ;;  %v1134_v10 = vmax.f32 %v1116_v35, 0.0  ;;  %v6063_v31 = vld [vmem:[#allocation31_spill] sm:$0xff] }
 0xbde   :  { %1183 = vst [vmem:[#allocation1 + $0x10] ss:$2 sm:$0xff] %v1145_v37  ;;  %v1121_v22 = vadd.f32 %v1104_v25, %v6061_v19  ;;  %v1135_v20 = vmax.f32 %v1117_v29, 0.0  ;;  %v1122_v28 = vadd.f32 %v1100_v36, %v6062_v26  ;;  %v1136_v27 = vmax.f32 %v1118_v45, 0.0  ;;  %v6064_v29 = vld [vmem:[#allocation33_spill] sm:$0xff] }
 0xbdf   :  { %1185 = vst [vmem:[#allocation1 + $0x11] ss:$2 sm:$0xff] %v1146_v17  ;;  %v1151_v41 = vmul.f32 %v6053_v30, %v1133_v40  ;;  %v1123_v37 = vadd.f32 %v1104_v25, %v6063_v31  ;;  %v1137_v55 = vmax.f32 %v1119_v63, 0.0  ;;  %v1138_v17 = vmax.f32 %v1120_v18, 0.0 }
 0xbe0   :  { %1187 = vst [vmem:[#allocation1 + $0x20] ss:$2 sm:$0xff] %v1147_v11  ;;  %v5062_v11 = vld [vmem:[%s5980_s13] ss:$0 sm:$0xff]  ;;  %v1139_v45 = vmax.f32 %v1121_v22, 0.0  ;;  %v1153_v30 = vmul.f32 %v1135_v20, %v6054_v12  ;;  %v1140_v25 = vmax.f32 %v1122_v28, 0.0 }
 0xbe1   :  { %1189 = vst [vmem:[#allocation1 + $0x21] ss:$2 sm:$0xff] %v1148_v33  ;;  %v1152_v35 = vmul.f32 %v5062_v11, %v1134_v10  ;;  %v1141_v18 = vmax.f32 %v1123_v37, 0.0  ;;  %v1155_v31 = vmul.f32 %v1137_v55, %v6054_v12 }
 0xbe2   :  { %1191 = vst [vmem:[#allocation1 + $0x30] ss:$2 sm:$0xff] %v1149_v21  ;;  %v1124_v21 = vadd.f32 %v1100_v36, %v6064_v29  ;;  %v1157_v22 = vmul.f32 %v1139_v45, %v6054_v12  ;;  %v1158_v28 = vmul.f32 %v5062_v11, %v1140_v25 }
 0xbe3   :  { %1193 = vst [vmem:[#allocation1 + $0x31] ss:$2 sm:$0xff] %v1150_v15  ;;  %v1154_v15 = vmul.f32 %v5062_v11, %v1136_v27  ;;  %v1159_v27 = vmul.f32 %v1141_v18, %v6054_v12 }
 0xbe4   :  { %v1194_v8 = vld.sshfl [vmem:[#allocation1] sm:$0xff pattern:$0x75316420]  ;;  %v1142_v36 = vmax.f32 %v1124_v21, 0.0 }
 0xbe5   :  { %1198 = vst [vmem:[#allocation1] ss:$2 sm:$0xff] %v1151_v41  ;;  %v1224_v33 = vsel %vm141_vm0, %v1194_v8, 0.0  ;;  %v1156_v41 = vmul.f32 %v5062_v11, %v1138_v17 }
 0xbe6   :  { %v1195_v40 = vld.sshfl [vmem:[#allocation1 + $0x10] sm:$0xff pattern:$0x75316420]  ;;  %1225 = vadd.xlane.f32.xlu2 %v1224_v33  ;;  %v1160_v55 = vmul.f32 %v5062_v11, %v1142_v36 }
 0xbe7   :  { %1200 = vst [vmem:[#allocation1 + $0x10] ss:$2 sm:$0xff] %v1152_v35  ;;  %v1227_v63 = vsel %vm141_vm0, %v1195_v40, 0.0 }
 0xbe8   :  { %v1196_v10 = vld.sshfl [vmem:[#allocation1 + $0x20] sm:$0xff pattern:$0x75316420]  ;;  %1201 = vst [vmem:[#allocation1 + $0x11] ss:$2 sm:$0xff] %v1153_v30  ;;  %1228 = vadd.xlane.f32.xlu0 %v1227_v63 }
 0xbe9   :  { %1202 = vst [vmem:[#allocation1 + $0x20] ss:$2 sm:$0xff] %v1154_v15  ;;  %v1230_v35 = vsel %vm141_vm0, %v1196_v10, 0.0 }
 0xbea   :  { %v1197_v20 = vld.sshfl [vmem:[#allocation1 + $0x30] sm:$0xff pattern:$0x75316420]  ;;  %1203 = vst [vmem:[#allocation1 + $0x21] ss:$2 sm:$0xff] %v1155_v31 }
 0xbeb   :  { %1204 = vst [vmem:[#allocation1 + $0x30] ss:$2 sm:$0xff] %v1156_v41  ;;  %v1233_v37 = vsel %vm141_vm0, %v1197_v20, 0.0 }
 0xbec   :  { %v1199_v8 = vld.sshfl [vmem:[#allocation1] sm:$0xff pattern:$0x75316420]  ;;  %1205 = vst [vmem:[#allocation1 + $0x31] ss:$2 sm:$0xff] %v1157_v22 }
 0xbed   :  { %1209 = vst [vmem:[#allocation1] ss:$2 sm:$0xff] %v1158_v28  ;;  %v1236_v18 = vsel %vm634_vm6, %v1199_v8, 0.0 }
 0xbee   :  { %1210 = vst [vmem:[#allocation1 + $0x1] ss:$2 sm:$0xff] %v1159_v27  ;;  %1234 = vadd.xlane.f32.xlu2 %v1233_v37  ;;  %v6065_v27 = vld [vmem:[#allocation35_spill] sm:$0xff] }
 0xbef   :  { %v1206_v17 = vld.sshfl [vmem:[#allocation1 + $0x10] sm:$0xff pattern:$0x75316420] }
 0xbf0   :  { %1211 = vst [vmem:[#allocation1 + $0x10] ss:$2 sm:$0xff] %v1160_v55  ;;  %1231 = vadd.xlane.f32.xlu0 %v1230_v35  ;;  %v1239_v31 = vsel %vm141_vm0, %v1206_v17, 0.0 }
 0xbf1   :  { %1240 = vadd.xlane.f32.xlu1 %v1239_v31  ;;  %v1207_v33 = vld.sshfl [vmem:[#allocation1 + $0x20] sm:$0xff pattern:$0x75316420] }
 0xbf2   :  { %v1242_v21 = vsel %vm141_vm0, %v1207_v33, 0.0 }
 0xbf3   :  { %v1208_v30 = vld.sshfl [vmem:[#allocation1 + $0x30] sm:$0xff pattern:$0x75316420] }
 0xbf4   :  { %v1245_v25 = vsel %vm141_vm0, %v1208_v30, 0.0 }
 0xbf5   :  { %v1212_v45 = vld.sshfl [vmem:[#allocation1] sm:$0xff pattern:$0x75316420] }
 0xbf6   :  { %v1248_v40 = vsel %vm141_vm0, %v1212_v45, 0.0  ;;  %1243 = vadd.xlane.f32.xlu2 %v1242_v21 }
 0xbf7   :  { %v1213_v15 = vld.sshfl [vmem:[#allocation1 + $0x10] sm:$0xff pattern:$0x75316420] }
 0xbf8   :  { %1249 = vadd.xlane.f32.xlu0 %v1248_v40  ;;  %v1251_v63 = vsel %vm634_vm6, %v1213_v15, 0.0 }
 0xbf9   :  { %1246 = vadd.xlane.f32.xlu1 %v1245_v25 }
 0xbfe   :  { %1252 = vadd.xlane.f32.xlu2 %v1251_v63 }
 0xc01   :  { %1237 = vadd.xlane.f32.xlu1 %v1236_v18 }
 0xc59   :  { %v1226_v10 = vpop.xlane.xlu2 %1225 }
 0xc5a   :  { %v1254_v17 = vadd.f32 %v1226_v10, %v6065_v27 }
 0xc5b   :  { %v1229_v41 = vpop.xlane.xlu0 %1228 }
 0xc5c   :  { %v1255_v35 = vadd.f32 %v1229_v41, %v6065_v27  ;;  %v1274_v40 = vperm.slane %v1254_v17, %v4813_v59 }
 0xc5e   :  { %v1275_v15 = vperm.slane %v1255_v35, %v4816_v13 }
 0xc61   :  { %v1235_v36 = vpop.xlane.xlu2 %1234 }
 0xc62   :  { %v1257_v63 = vadd.f32 %v1235_v36, %v6065_v27 }
 0xc63   :  { %v1232_v22 = vpop.xlane.xlu0 %1231 }
 0xc64   :  { %v1241_v20 = vpop.xlane.xlu1 %1240  ;;  %v1256_v8 = vadd.f32 %v1232_v22, %v6065_v27  ;;  %v1279_v29 = vperm.slane %v1257_v63, %v4824_v5 }
 0xc65   :  { %v1259_v37 = vadd.f32 %v1241_v20, %v6065_v27 }
 0xc66   :  { %v1277_v41 = vperm.slane %v1256_v8, %v4821_v1 }
 0xc67   :  { %v1283_v30 = vperm.slane %v1259_v37, %v4813_v59 }
 0xc69   :  { %v1244_v28 = vpop.xlane.xlu2 %1243 }
 0xc6a   :  { %v1260_v55 = vadd.f32 %v1244_v28, %v6065_v27 }
 0xc6b   :  { %v1250_v21 = vpop.xlane.xlu0 %1249 }
 0xc6c   :  { %v1284_v31 = vperm.slane %v1260_v55, %v4816_v13  ;;  %v1247_v33 = vpop.xlane.xlu1 %1246  ;;  %v1262_v18 = vadd.f32 %v1250_v21, %v6065_v27 }
 0xc6d   :  { %v1261_v45 = vadd.f32 %v1247_v33, %v6065_v27  ;;  %v1276_v33 = vsel %vm684_vm7, %v1275_v15, %v1274_v40 }
 0xc6e   :  { %v1285_v10 = vsel %vm684_vm7, %v1284_v31, %v1283_v30  ;;  %v1288_v26 = vperm.slane %v1262_v18, %v4824_v5  ;;  %v1278_v31 = vsel %vm688_vm8, %v1277_v41, %v1276_v33 }
 0xc6f   :  { %v1286_v25 = vperm.slane %v1261_v45, %v4821_v1 }
 0xc71   :  { %v1253_v22 = vpop.xlane.xlu2 %1252  ;;  %v1287_v28 = vsel %vm688_vm8, %v1286_v25, %v1285_v10  ;;  %v1280_v25 = vsel %vm692_vm9, %v1279_v29, %v1278_v31 }
 0xc72   :  { %v1263_v20 = vadd.f32 %v1253_v22, %v6065_v27  ;;  %v1289_v30 = vsel %vm692_vm9, %v1288_v26, %v1287_v28 }
 0xc74   :  { %v1238_v19 = vpop.xlane.xlu1 %1237  ;;  %v1290_v36 = vperm.slane %v1263_v20, %v4827_v50 }
 0xc75   :  { %v1258_v21 = vadd.f32 %v1238_v19, %v6065_v27 }
 0xc76   :  { %v1291_v22 = vsel %vm696_vm10, %v1290_v36, %v1289_v30 }
 0xc77   :  { %v1281_v54 = vperm.slane %v1258_v21, %v4827_v50 }
 0xc79   :  { %v1282_v40 = vsel %vm696_vm10, %v1281_v54, %v1280_v25 }
 0xc7a   :  { %v1292_v15 = vsel %vm707_vm11, %v1291_v22, %v1282_v40 }
 0xc7b   :  { %v1294_v10 = vsel %vm710_vm12, %v1292_v15, -inf }
 0xc7c   :  { %1295 = vmax.xlane.f32.xlu0 %v1294_v10 }
 0xcef   :  { %v1296_v34 = vpop.xlane.xlu0 %1295 }
 0xcf0   :  { %v1298_v42 = vperm.slane %v1296_v34, 0  ;;  %v1299_v19 = vperm.slane %v1296_v34, 1 }
 0xcf2   :  { %v1302_v27 = vsub.f32 %v1254_v17, %v1298_v42  ;;  %v1303_v41 = vsub.f32 %v1255_v35, %v1298_v42  ;;  %v1307_v33 = vsub.f32 %v1259_v37, %v1299_v19  ;;  %v1309_v51 = vsub.f32 %v1261_v45, %v1299_v19 }
 0xcf3   :  { %v1308_v36 = vsub.f32 %v1260_v55, %v1299_v19  ;;  %v1304_v29 = vsub.f32 %v1256_v8, %v1298_v42  ;;  %v1306_v37 = vsub.f32 %v1258_v21, %v1298_v42  ;;  %v1311_v21 = vsub.f32 %v1263_v20, %v1299_v19 }
 0xcf4   :  { %v1314_v26 = vmul.f32 1.442695, %v1303_v41  ;;  %v1312_v28 = vmul.f32 1.442695, %v1302_v27  ;;  %v1322_v9 = vmul.f32 1.442695, %v1307_v33  ;;  %v1305_v27 = vsub.f32 %v1257_v63, %v1298_v42 }
 0xcf5   :  { %v1326_v54 = vmul.f32 1.442695, %v1309_v51  ;;  %v1324_v31 = vmul.f32 1.442695, %v1308_v36  ;;  %v1316_v22 = vmul.f32 1.442695, %v1304_v29 }
 0xcf6   :  { %4043 = vpow2.f32 %v1314_v26  ;;  %v1320_v51 = vmul.f32 1.442695, %v1306_v37  ;;  %v1318_v55 = vmul.f32 1.442695, %v1305_v27  ;;  %v1330_v42 = vmul.f32 1.442695, %v1311_v21 }
 0xcf7   :  { %4045 = vpow2.f32 %v1322_v9  ;;  %v1310_v9 = vsub.f32 %v1262_v18, %v1299_v19 }
 0xcf8   :  { %4047 = vpow2.f32 %v1312_v28 }
 0xcf9   :  { %4049 = vpow2.f32 %v1326_v54  ;;  %v1328_v35 = vmul.f32 1.442695, %v1310_v9 }
 0xcfa   :  { %4051 = vpow2.f32 %v1324_v31 }
 0xcfb   :  { %4053 = vpow2.f32 %v1316_v22 }
 0xcfc   :  { %v5114_v30 = vpop.eup %4043  ;;  %4055 = vpow2.f32 %v1320_v51 }
 0xcfd   :  { %v5116_v25 = vpop.eup %4045  ;;  %1346 = vperm.xlu2 %3989, %v5114_v30   ;;  %4057 = vpow2.f32 %v1318_v55 }
 0xcfe   :  { %v5119_v34 = vpop.eup %4047  ;;  %1358 = vperm.xlu0 %3988, %v5116_v25   ;;  %4059 = vpow2.f32 %v1328_v35 }
 0xcff   :  { %1343 = vperm.xlu1 %3987, %v5119_v34   ;;  %v5123_v17 = vpop.eup %4049  ;;  %4061 = vpow2.f32 %v1330_v42 }
 0xd00   :  { %v4052_v8 = vpop.eup %4051 }
 0xd01   :  { %v4054_v45 = vpop.eup %4053 }
 0xd02   :  { %v4056_v63 = vpop.eup %4055 }
 0xd03   :  { %v4058_v40 = vpop.eup %4057 }
 0xd04   :  { %v4060_v18 = vpop.eup %4059 }
 0xd05   :  { %1364 = vperm.xlu2 %3989, %v5123_v17   ;;  %v4062_v15 = vpop.eup %4061 }
 0xd06   :  { %1361 = vperm.xlu0 %3988, %v4052_v8  }
 0xd07   :  { %1349 = vperm.xlu1 %3987, %v4054_v45  }
 0xd0d   :  { %1355 = vperm.xlu2 %3989, %v4056_v63  }
 0xd0e   :  { %1352 = vperm.xlu0 %3988, %v4058_v40  }
 0xd0f   :  { %1367 = vperm.xlu1 %3987, %v4060_v18  }
 0xd16   :  { %1370 = vperm.xlu0 %3988, %v4062_v15  }
 0xd57   :  { %v1347_v33 = vpop.permute.xlu2 %1346 }
 0xd58   :  { %v1373_v22 = vperm.slane %v1347_v33, %v4816_v13 }
 0xd5f   :  { %v1365_v36 = vpop.permute.xlu2 %1364 }
 0xd60   :  { %v1384_v21 = vperm.slane %v1365_v36, %v4821_v1 }
 0xd67   :  { %v1356_v9 = vpop.permute.xlu2 %1355 }
 0xd68   :  { %v1379_v33 = vperm.slane %v1356_v9, %v4827_v50 }
 0xd70   :  { %v1359_v10 = vpop.permute.xlu0 %1358 }
 0xd71   :  { %v1344_v41 = vpop.permute.xlu1 %1343  ;;  %v1381_v37 = vperm.slane %v1359_v10, %v4813_v59 }
 0xd72   :  { %v1372_v19 = vperm.slane %v1344_v41, %v4813_v59 }
 0xd74   :  { %v1374_v51 = vsel %vm684_vm7, %v1373_v22, %v1372_v19 }
 0xd78   :  { %v1362_v26 = vpop.permute.xlu0 %1361 }
 0xd79   :  { %v1350_v28 = vpop.permute.xlu1 %1349  ;;  %v1382_v29 = vperm.slane %v1362_v26, %v4816_v13 }
 0xd7a   :  { %v1375_v54 = vperm.slane %v1350_v28, %v4821_v1 }
 0xd7b   :  { %v1383_v55 = vsel %vm684_vm7, %v1382_v29, %v1381_v37 }
 0xd7c   :  { %v1376_v42 = vsel %vm688_vm8, %v1375_v54, %v1374_v51  ;;  %v1385_v28 = vsel %vm688_vm8, %v1384_v21, %v1383_v55 }
 0xd80   :  { %v1353_v20 = vpop.permute.xlu0 %1352 }
 0xd81   :  { %v1368_v31 = vpop.permute.xlu1 %1367  ;;  %v1377_v27 = vperm.slane %v1353_v20, %v4824_v5 }
 0xd82   :  { %v1386_v35 = vperm.slane %v1368_v31, %v4824_v5 }
 0xd83   :  { %v1378_v26 = vsel %vm692_vm9, %v1377_v27, %v1376_v42 }
 0xd84   :  { %v1387_v20 = vsel %vm692_vm9, %v1386_v35, %v1385_v28  ;;  %v1380_v19 = vsel %vm696_vm10, %v1379_v33, %v1378_v26 }
 0xd88   :  { %v1371_v41 = vpop.permute.xlu0 %1370 }
 0xd89   :  { %v1388_v10 = vperm.slane %v1371_v41, %v4827_v50 }
 0xd8b   :  { %v1389_v29 = vsel %vm696_vm10, %v1388_v10, %v1387_v20 }
 0xd8c   :  { %v1390_v31 = vsel %vm707_vm11, %v1389_v29, %v1380_v19 }
 0xd8d   :  { %v1392_v36 = vsel %vm710_vm12, %v1390_v31, 0.0 }
 0xd8e   :  { %1393 = vadd.xlane.f32.xlu1 %v1392_v36 }
 0xe01   :  { %v1394_v54 = vpop.xlane.xlu1 %1393 }
 0xe02   :  { %4063 = vrcp.f32 %v1394_v54 }
 0xe08   :  { %v4064_v22 = vpop.eup %4063 }
 0xe09   :  { %v1397_v37 = vperm.slane %v4064_v22, 0  ;;  %v1398_v51 = vperm.slane %v4064_v22, 1 }
 0xe0b   :  { %v1402_v27 = vmul.f32 %v5114_v30, %v1397_v37  ;;  %v1401_v9 = vmul.f32 %v5119_v34, %v1397_v37  ;;  %v1407_v55 = vmul.f32 %v4052_v8, %v1398_v51  ;;  %v1406_v35 = vmul.f32 %v5116_v25, %v1398_v51 }
 0xe0c   :  { %v1408_v21 = vmul.f32 %v5123_v17, %v1398_v51  ;;  %v1403_v42 = vmul.f32 %v4054_v45, %v1397_v37  ;;  %v1409_v41 = vmul.f32 %v4060_v18, %v1398_v51  ;;  %v1404_v26 = vmul.f32 %v4058_v40, %v1397_v37 }
 0xe0d   :  { %1418 = vperm.xlu0 %3988, %v1402_v27   ;;  %1413 = vperm.xlu2 %3989, %v1401_v9   ;;  %v1410_v30 = vmul.f32 %v4062_v15, %v1398_v51  ;;  %v1405_v33 = vmul.f32 %v4056_v63, %v1397_v37 }
 0xe15   :  { %1443 = vperm.xlu0 %3988, %v1407_v55   ;;  %1438 = vperm.xlu2 %3989, %v1406_v35  }
 0xe1d   :  { %1448 = vperm.xlu0 %3988, %v1408_v21   ;;  %1423 = vperm.xlu2 %3989, %v1403_v42  }
 0xe25   :  { %1453 = vperm.xlu0 %3988, %v1409_v41   ;;  %1428 = vperm.xlu2 %3989, %v1404_v26  }
 0xe2d   :  { %1458 = vperm.xlu0 %3988, %v1410_v30   ;;  %1433 = vperm.xlu2 %3989, %v1405_v33  }
 0xe67   :  { %v1414_v34 = vpop.permute.xlu2 %1413 }
 0xe68   :  { %v1461_v17 = vmul.f32 %v1414_v34, %v4576_v52 }
 0xe6a   :  { %v1471_v40 = vsel %vm141_vm0, %v1461_v17, 0.0 }
 0xe6f   :  { %v1439_v10 = vpop.permute.xlu2 %1438 }
 0xe70   :  { %v1466_v21 = vmul.f32 %v1439_v10, %v4609_v62 }
 0xe72   :  { %v1486_v33 = vsel %vm141_vm0, %v1466_v21, 0.0  ;;  %v5181_v21 = vld [vmem:[#allocation10] sm:$0xff] }
 0xe77   :  { %v1424_v8 = vpop.permute.xlu2 %1423 }
 0xe78   :  { %v1463_v18 = vmul.f32 %v1424_v8, %v4589_v56 }
 0xe7a   :  { %v1474_v31 = vsel %vm141_vm0, %v1463_v18, 0.0 }
 0xe7f   :  { %v1419_v28 = vpop.permute.xlu0 %1418  ;;  %v1429_v25 = vpop.permute.xlu2 %1428 }
 0xe80   :  { %v1462_v20 = vmul.f32 %v1419_v28, %v4581_v53  ;;  %v1464_v36 = vmul.f32 %v1429_v25, %v4594_v57 }
 0xe82   :  { %v1472_v45 = vsel %vm141_vm0, %v1462_v20, 0.0  ;;  %v1476_v37 = vsel %vm141_vm0, %v1464_v36, 0.0 }
 0xe83   :  { %v1473_v15 = vadd.f32 %v1472_v45, %v1471_v40 }
 0xe85   :  { %v1475_v22 = vadd.f32 %v1474_v31, %v1473_v15 }
 0xe87   :  { %v1444_v19 = vpop.permute.xlu0 %1443  ;;  %v1434_v63 = vpop.permute.xlu2 %1433  ;;  %v1477_v9 = vadd.f32 %v1476_v37, %v1475_v22 }
 0xe88   :  { %v1465_v54 = vmul.f32 %v1434_v63, %v4604_v61  ;;  %v1467_v51 = vmul.f32 %v1444_v19, %v4616_v0 }
 0xe8a   :  { %v1478_v27 = vsel %vm634_vm6, %v1465_v54, 0.0  ;;  %v1487_v41 = vsel %vm141_vm0, %v1467_v51, 0.0  ;;  %v5172_v51 = vld [vmem:[#allocation10 + $0x18] sm:$0xff] }
 0xe8b   :  { %v1479_v55 = vadd.f32 %v1478_v27, %v1477_v9  ;;  %v1488_v8 = vadd.f32 %v1487_v41, %v1486_v33 }
 0xe8d   :  { %v1480_v30 = vrot.slane %v1479_v55, 4 }
 0xe8f   :  { %v1449_v29 = vpop.permute.xlu0 %1448  ;;  %v1481_v25 = vadd.f32 %v1480_v30, %v1479_v55  ;;  %v5175_v55 = vld [vmem:[#allocation10 + $0x10] sm:$0xff] }
 0xe90   :  { %v1468_v42 = vmul.f32 %v1449_v29, %v4625_v4 }
 0xe91   :  { %v1482_v40 = vrot.slane %v1481_v25, 2 }
 0xe92   :  { %v1489_v34 = vsel %vm141_vm0, %v1468_v42, 0.0  ;;  %v1518_v42 = vpop.f32.mrf.mxu0 }
 0xe93   :  { %v1490_v20 = vadd.f32 %v1489_v34, %v1488_v8  ;;  %v1483_v63 = vadd.f32 %v1482_v40, %v1481_v25 }
 0xe95   :  { %v1484_v36 = vrot.slane %v1483_v63, 1 }
 0xe97   :  { %v1454_v35 = vpop.permute.xlu0 %1453  ;;  %v1485_v37 = vadd.f32 %v1484_v36, %v1483_v63 }
 0xe98   :  { %v1469_v26 = vmul.f32 %v1454_v35, %v4633_v7  ;;  %v5178_v35 = vld [vmem:[#allocation10 + $0x8] sm:$0xff] }
 0xe9a   :  { %v1491_v28 = vsel %vm141_vm0, %v1469_v26, 0.0 }
 0xe9b   :  { %v1492_v10 = vadd.f32 %v1491_v28, %v1490_v20 }
 0xe9f   :  { %v1459_v19 = vpop.permute.xlu0 %1458 }
 0xea0   :  { %v1470_v17 = vmul.f32 %v1459_v19, %v4663_v23 }
 0xea2   :  { %v1493_v45 = vsel %vm634_vm6, %v1470_v17, 0.0 }
 0xea3   :  { %v1494_v18 = vadd.f32 %v1493_v45, %v1492_v10 }
 0xea5   :  { %v1495_v15 = vrot.slane %v1494_v18, 4 }
 0xea7   :  { %v1496_v29 = vadd.f32 %v1495_v15, %v1494_v18 }
 0xea9   :  { %v1497_v31 = vrot.slane %v1496_v29, 2 }
 0xeab   :  { %v1498_v54 = vadd.f32 %v1497_v31, %v1496_v29 }
 0xead   :  { %v1499_v22 = vrot.slane %v1498_v54, 1 }
 0xeaf   :  { %v1500_v27 = vadd.f32 %v1499_v22, %v1498_v54 }
 0xeb1   :  { %v1523_v9 = vsel %vm707_vm11, %v1500_v27, %v1485_v37 }
 0xeb2   :  { %3950 = vmatmul.msk.f32.vlgmr.msrb.gmra.mxu1 %vm141_vm0, %v1523_v9 }
 0xeb3   :  { %2247 = vmatpush.msrb.mxu1 %v5172_v51 }
 0xeb5   :  { %2248 = vmatpush.msrb.mxu1 %v5175_v55 }
 0xeb7   :  { %2249 = vmatpush.msrb.mxu1 %v5178_v35 }
 0xeb9   :  { %2250 = vmatpush.msrb.mxu1 %v5181_v21 }
 0xf2f   :  { %v1543_v41 = vpop.f32.mrf.mxu1 }
 0xf30   :  { %v1544_v26 = vadd.f32 %v1543_v41, %v1518_v42  ;;  %v5204_v42 = vld [vmem:[%s5982_s15 + $0x30] sm:$0xff]  ;;  %v5210_v41 = vld [vmem:[%s5982_s15 + $0x28] sm:$0xff] }
 0xf32   :  { %v1546_v30 = vadd.f32 %v4976_v39, %v1544_v26  ;;  %v5216_v26 = vld [vmem:[%s5982_s15 + $0x20] sm:$0xff] }
 0xf34   :  { %4065 = vtanh.f32 %v1546_v30  ;;  %v3951_v34 = vmul.f32 -1.442695, %v1546_v30 }
 0xf36   :  { %4067 = vpow2.f32 %v3951_v34  ;;  %v1612_v34 = vld [vmem:[#allocation2 + $0x4] sm:$0x3] }
 0xf3a   :  { %v4066_v33 = vpop.eup %4065 }
 0xf3b   :  { %1569 = vrot.lane.b32.xlu2 %v4066_v33, %s4398_s30 }
 0xf3c   :  { %v4068_v8 = vpop.eup %4067 }
 0xf3d   :  { %v1550_v28 = vadd.f32 1.0, %v4068_v8 }
 0xf3f   :  { %4069 = vrcp.f32 %v1550_v28  ;;  %v1562_v45 = vand.u32 2147483648, %v1550_v28  ;;  %vm1556_vm15 = vweird.f32 %v1550_v28  ;;  %v1560_v40 = vand.u32 2147483647, %v1550_v28 }
 0xf41   :  { %v1563_v18 = vor.u32 1.1754944e-38, %v1562_v45  ;;  %vm1561_vm3 = vcmp.eq.f32.partialorder %v1560_v40, 8.507059e+37 }
 0xf45   :  { %v4070_v25 = vpop.eup %4069 }
 0xf46   :  { %v1552_v20 = vmul.f32 %v4070_v25, %v1550_v28  ;;  %vm1557_vm14 = vweird.f32 %v4070_v25 }
 0xf47   :  { %vm1558_vm1 = vmor %vm1556_vm15, %vm1557_vm14 }
 0xf48   :  { %v1553_v19 = vsub.f32 1.0, %v1552_v20 }
 0xf4a   :  { %v1554_v17 = vmul.f32 %v4070_v25, %v1553_v19 }
 0xf4c   :  { %v1555_v10 = vadd.f32 %v4070_v25, %v1554_v17 }
 0xf4e   :  { %v1559_v39 = vsel %vm1558_vm1, %v4070_v25, %v1555_v10 }
 0xf4f   :  { %v1564_v63 = vsel %vm1561_vm3, %v1563_v18, %v1559_v39 }
 0xf50   :  { %v1567_v31 = vmul.f32 %v1564_v63, %v4982_v6  ;;  %v5198_v6 = vld [vmem:[%s5982_s15 + $0x38] sm:$0xff] }
 0xf95   :  { %v1570_v15 = vpop.permute.xlu2 %1569 }
 0xf96   :  { %v1572_v29 = vmul.f32 %v1570_v15, %v1564_v63 }
 0xf98   :  { %1574 = vrot.lane.b32.xlu1 %v1572_v29, %s4399_s4 }
0x100a   :  { %v1575_v36 = vpop.permute.xlu1 %1574 }
0x100b   :  { %v5188_v54 = vadd.f32 %v1575_v36, %v1567_v31 }
0x100d   :  { %4071 = vtanh.f32 %v5188_v54 }
0x1013   :  { %v4072_v22 = vpop.eup %4071 }
0x1014   :  { %1580 = vrot.lane.b32.xlu0 %v4072_v22, %s4398_s30 }
0x1086   :  { %v1581_v37 = vpop.permute.xlu0 %1580 }
0x1087   :  { %v1583_v27 = vmul.f32 %v1581_v37, %v1564_v63 }
0x1089   :  { %1585 = vrot.lane.b32.xlu2 %v1583_v27, %s4399_s4 }
0x10e3   :  { %v1586_v9 = vpop.permute.xlu2 %1585 }
0x10e4   :  { %1589 = vst.msk [vmem:[#allocation12 + $0x2] sm:$0x3] %vm1009_vm2, %v1586_v9  ;;  %3952 = vmatmul.msk.f32.vlgmr.msrb.gmra.mxu2 %vm141_vm0, %v1586_v9 }
0x10e5   :  { %2671 = vmatpush.msrb.mxu2 %v5198_v6 }
0x10e7   :  { %2672 = vmatpush.msrb.mxu2 %v5204_v42 }
0x10e9   :  { %2673 = vmatpush.msrb.mxu2 %v5210_v41 }
0x10eb   :  { %2674 = vmatpush.msrb.mxu2 %v5216_v26 }
0x1167   :  { %v1609_v30 = vpop.f32.mrf.mxu2 }
0x1168   :  { %v1610_v33 = vadd.f32 %v1609_v30, %v4564_v24 }
0x116a   :  { %v1613_v8 = vadd.f32 %v1612_v34, %v1610_v33 }
0x116c   :  { %4073 = vtanh.f32 %v1613_v8  ;;  %v3953_v25 = vmul.f32 -1.442695, %v1613_v8 }
0x116e   :  { %4075 = vpow2.f32 %v3953_v25  ;;  %v5247_v25 = vld [vmem:[%s5982_s15 + $0x8] sm:$0xff] }
0x1172   :  { %v4074_v28 = vpop.eup %4073 }
0x1173   :  { %1636 = vrot.lane.b32.xlu0 %v4074_v28, %s4398_s30  ;;  %v5240_v28 = vld [vmem:[%s5982_s15 + $0x10] sm:$0xff] }
0x1174   :  { %v4076_v20 = vpop.eup %4075 }
0x1175   :  { %v1617_v19 = vadd.f32 1.0, %v4076_v20 }
0x1177   :  { %4077 = vrcp.f32 %v1617_v19  ;;  %v1629_v18 = vand.u32 2147483648, %v1617_v19  ;;  %vm1623_vm5 = vweird.f32 %v1617_v19  ;;  %v1627_v15 = vand.u32 2147483647, %v1617_v19 }
0x1179   :  { %v1630_v29 = vor.u32 1.1754944e-38, %v1629_v18  ;;  %vm1628_vm14 = vcmp.eq.f32.partialorder %v1627_v15, 8.507059e+37 }
0x117d   :  { %v4078_v17 = vpop.eup %4077 }
0x117e   :  { %v1619_v10 = vmul.f32 %v4078_v17, %v1617_v19  ;;  %vm1624_vm4 = vweird.f32 %v4078_v17 }
0x117f   :  { %vm1625_vm13 = vmor %vm1623_vm5, %vm1624_vm4 }
0x1180   :  { %v1620_v45 = vsub.f32 1.0, %v1619_v10 }
0x1182   :  { %v1621_v40 = vmul.f32 %v4078_v17, %v1620_v45 }
0x1184   :  { %v1622_v39 = vadd.f32 %v4078_v17, %v1621_v40 }
0x1186   :  { %v1626_v63 = vsel %vm1625_vm13, %v4078_v17, %v1622_v39 }
0x1187   :  { %v1631_v36 = vsel %vm1628_vm14, %v1630_v29, %v1626_v63 }
0x1188   :  { %v1634_v37 = vmul.f32 %v1631_v36, %v4997_v3  ;;  %v5233_v3 = vld [vmem:[%s5982_s15 + $0x18] sm:$0xff] }
0x11e5   :  { %v1637_v31 = vpop.permute.xlu0 %1636 }
0x11e6   :  { %v1639_v22 = vmul.f32 %v1637_v31, %v1631_v36 }
0x11e8   :  { %1641 = vrot.lane.b32.xlu2 %v1639_v22, %s4399_s4 }
0x1242   :  { %v1642_v27 = vpop.permute.xlu2 %1641 }
0x1243   :  { %v5223_v9 = vadd.f32 %v1642_v27, %v1634_v37 }
0x1245   :  { %4079 = vtanh.f32 %v5223_v9 }
0x124b   :  { %v4080_v30 = vpop.eup %4079 }
0x124c   :  { %1647 = vrot.lane.b32.xlu0 %v4080_v30, %s4398_s30 }
0x12be   :  { %v1648_v33 = vpop.permute.xlu0 %1647 }
0x12bf   :  { %v1650_v34 = vmul.f32 %v1648_v33, %v1631_v36 }
0x12c1   :  { %1652 = vrot.lane.b32.xlu2 %v1650_v34, %s4399_s4 }
0x131b   :  { %v1653_v8 = vpop.permute.xlu2 %1652 }
0x131c   :  { %3954 = vmatmul.msk.f32.vlgmr.msra.gmra.mxu0 %vm141_vm0, %v1653_v8  ;;  %3955 = vmatmul.msk.f32.vlgmr.msra.gmra.mxu1 %vm141_vm0, %v1653_v8 }
0x131d   :  { %2696 = vmatpush.msra.mxu0 %v5233_v3  ;;  %2762 = vmatpush.msra.mxu1 %v5008_v47  ;;  %v5254_v47 = vld [vmem:[%s5982_s15] sm:$0xff] }
0x131f   :  { %2697 = vmatpush.msra.mxu0 %v5240_v28  ;;  %2763 = vmatpush.msra.mxu1 %v5015_v38  ;;  %v5261_v38 = vld [vmem:[%s5979_s12] ss:$0 sm:$0xff] }
0x1321   :  { %2698 = vmatpush.msra.mxu0 %v5247_v25  ;;  %2764 = vmatpush.msra.mxu1 %v5022_v58 }
0x1323   :  { %2699 = vmatpush.msra.mxu0 %v5254_v47  ;;  %2765 = vmatpush.msra.mxu1 %v5029_v32 }
0x1399   :  { %v1673_v20 = vpop.f32.mrf.mxu0 }
0x139a   :  { %v1674_v19 = vadd.f32 %v5261_v38, %v1673_v20 }
0x139c   :  { %v1678_v17 = vperm.slane %v1674_v19, 0  ;;  %v1677_v58 = vrot.slane %v1674_v19, 1 }
0x139e   :  { %v1682_v10 = vrot.slane %v1678_v17, 4  ;;  %v1686_v45 = vadd.f32 %v1678_v17, %v4713_v14  ;;  %v1688_v39 = vadd.f32 %v1678_v17, %v4715_v16  ;;  %v1690_v32 = vadd.f32 %v1678_v17, %v4718_v44 }
0x139f   :  { %v1679_v15 = vperm.slane %v1677_v58, 0  ;;  %v1692_v29 = vadd.f32 %v1678_v17, %v4720_v46 }
0x13a0   :  { %v1687_v40 = vadd.f32 %v1682_v10, %v4723_v48  ;;  %v1689_v18 = vadd.f32 %v1682_v10, %v4726_v49  ;;  %v1691_v63 = vadd.f32 %v1682_v10, %v4736_v60  ;;  %v1704_v31 = vmax.f32 %v1686_v45, 0.0 }
0x13a1   :  { %v1706_v22 = vmax.f32 %v1688_v39, 0.0  ;;  %v1693_v37 = vadd.f32 %v1682_v10, %v4741_v2  ;;  %v1708_v30 = vmax.f32 %v1690_v32, 0.0  ;;  %v1683_v33 = vrot.slane %v1679_v15, 4  ;;  %v6066_v10 = vld [vmem:[#allocation26_spill] sm:$0xff]  ;;  %v6067_v32 = vld [vmem:[#allocation24_spill] sm:$0xff] }
0x13a2   :  { %v1705_v36 = vmax.f32 %v1687_v40, 0.0  ;;  %v1707_v27 = vmax.f32 %v1689_v18, 0.0  ;;  %v1709_v34 = vmax.f32 %v1691_v63, 0.0  ;;  %v1710_v8 = vmax.f32 %v1692_v29, 0.0 }
0x13a3   :  { %v1722_v20 = vmul.f32 %v5062_v11, %v1704_v31  ;;  %v1724_v58 = vmul.f32 %v5062_v11, %v1706_v22  ;;  %v1694_v60 = vadd.f32 %v1678_v17, %v6055_v43  ;;  %v1711_v44 = vmax.f32 %v1693_v37, 0.0  ;;  %v6068_v31 = vld [vmem:[#allocation27_spill] sm:$0xff]  ;;  %v6069_v37 = vld [vmem:[#allocation28_spill] sm:$0xff] }
0x13a4   :  { %v1723_v19 = vmul.f32 %v1705_v36, %v6054_v12  ;;  %v1725_v45 = vmul.f32 %v1707_v27, %v6054_v12  ;;  %v1726_v40 = vmul.f32 %v5062_v11, %v1708_v30  ;;  %v1695_v39 = vadd.f32 %v1679_v15, %v6066_v10  ;;  %v6070_v30 = vld [vmem:[#allocation30_spill] sm:$0xff] }
0x13a5   :  { %1758 = vst [vmem:[#allocation1] ss:$2 sm:$0xff] %v1722_v20  ;;  %v1727_v18 = vmul.f32 %v1709_v34, %v6054_v12  ;;  %v1696_v63 = vadd.f32 %v1683_v33, %v6067_v32  ;;  %v1728_v29 = vmul.f32 %v5062_v11, %v1710_v8  ;;  %v1697_v36 = vadd.f32 %v1679_v15, %v6068_v31  ;;  %v6071_v34 = vld [vmem:[#allocation29_spill] sm:$0xff]  ;;  %v6072_v32 = vld [vmem:[#allocation32_spill] sm:$0xff] }
0x13a6   :  { %1760 = vst [vmem:[#allocation1 + $0x1] ss:$2 sm:$0xff] %v1723_v19  ;;  %v1712_v22 = vmax.f32 %v1694_v60, 0.0  ;;  %v1729_v17 = vmul.f32 %v1711_v44, %v6054_v12  ;;  %v1698_v27 = vadd.f32 %v1683_v33, %v6069_v37  ;;  %v1699_v20 = vadd.f32 %v1679_v15, %v6070_v30  ;;  %v6073_v60 = vld [vmem:[#allocation31_spill] sm:$0xff] }
0x13a7   :  { %1762 = vst [vmem:[#allocation1 + $0x10] ss:$2 sm:$0xff] %v1724_v58  ;;  %v1713_v10 = vmax.f32 %v1695_v39, 0.0  ;;  %v1700_v19 = vadd.f32 %v1683_v33, %v6071_v34  ;;  %v1714_v43 = vmax.f32 %v1696_v63, 0.0  ;;  %v1701_v8 = vadd.f32 %v1679_v15, %v6072_v32 }
0x13a8   :  { %1764 = vst [vmem:[#allocation1 + $0x11] ss:$2 sm:$0xff] %v1725_v45  ;;  %v1715_v58 = vmax.f32 %v1697_v36, 0.0  ;;  %v1730_v31 = vmul.f32 %v5062_v11, %v1712_v22  ;;  %v1702_v44 = vadd.f32 %v1683_v33, %v6073_v60  ;;  %v1716_v45 = vmax.f32 %v1698_v27, 0.0 }
0x13a9   :  { %1766 = vst [vmem:[#allocation1 + $0x20] ss:$2 sm:$0xff] %v1726_v40  ;;  %v1717_v37 = vmax.f32 %v1699_v20, 0.0  ;;  %v1731_v40 = vmul.f32 %v5062_v11, %v1713_v10  ;;  %v1718_v63 = vmax.f32 %v1700_v19, 0.0  ;;  %v1719_v36 = vmax.f32 %v1701_v8, 0.0 }
0x13aa   :  { %1768 = vst [vmem:[#allocation1 + $0x21] ss:$2 sm:$0xff] %v1727_v18  ;;  %v6074_v18 = vld [vmem:[#allocation33_spill] sm:$0xff]  ;;  %v1733_v22 = vmul.f32 %v5062_v11, %v1715_v58  ;;  %v1734_v27 = vmul.f32 %v1716_v45, %v6054_v12 }
0x13ab   :  { %1770 = vst [vmem:[#allocation1 + $0x30] ss:$2 sm:$0xff] %v1728_v29  ;;  %v1703_v34 = vadd.f32 %v1679_v15, %v6074_v18  ;;  %v1732_v29 = vmul.f32 %v1714_v43, %v6054_v12  ;;  %v1735_v10 = vmul.f32 %v5062_v11, %v1717_v37  ;;  %v1736_v43 = vmul.f32 %v1718_v63, %v6054_v12 }
0x13ac   :  { %1772 = vst [vmem:[#allocation1 + $0x31] ss:$2 sm:$0xff] %v1729_v17  ;;  %v1720_v17 = vmax.f32 %v1702_v44, 0.0  ;;  %v1737_v20 = vmul.f32 %v5062_v11, %v1719_v36 }
0x13ad   :  { %v1773_v2 = vld.sshfl [vmem:[#allocation1] sm:$0xff pattern:$0x75316420]  ;;  %v1721_v15 = vmax.f32 %v1703_v34, 0.0 }
0x13ae   :  { %v1803_v39 = vsel %vm141_vm0, %v1773_v2, 0.0  ;;  %1777 = vst [vmem:[#allocation1] ss:$2 sm:$0xff] %v1730_v31 }
0x13af   :  { %v1774_v32 = vld.sshfl [vmem:[#allocation1 + $0x10] sm:$0xff pattern:$0x75316420]  ;;  %1804 = vadd.xlane.f32.xlu1 %v1803_v39  ;;  %v1739_v58 = vmul.f32 %v5062_v11, %v1721_v15 }
0x13b0   :  { %v1806_v33 = vsel %vm141_vm0, %v1774_v32, 0.0  ;;  %1779 = vst [vmem:[#allocation1 + $0x10] ss:$2 sm:$0xff] %v1731_v40  ;;  %v1738_v32 = vmul.f32 %v1720_v17, %v6054_v12 }
0x13b1   :  { %1807 = vadd.xlane.f32.xlu0 %v1806_v33  ;;  %1780 = vst [vmem:[#allocation1 + $0x11] ss:$2 sm:$0xff] %v1732_v29  ;;  %v1775_v2 = vld.sshfl [vmem:[#allocation1 + $0x20] sm:$0xff pattern:$0x75316420] }
0x13b2   :  { %1781 = vst [vmem:[#allocation1 + $0x20] ss:$2 sm:$0xff] %v1733_v22  ;;  %v1809_v37 = vsel %vm141_vm0, %v1775_v2, 0.0 }
0x13b3   :  { %1782 = vst [vmem:[#allocation1 + $0x21] ss:$2 sm:$0xff] %v1734_v27  ;;  %v1776_v31 = vld.sshfl [vmem:[#allocation1 + $0x30] sm:$0xff pattern:$0x75316420] }
0x13b4   :  { %1783 = vst [vmem:[#allocation1 + $0x30] ss:$2 sm:$0xff] %v1735_v10  ;;  %v1812_v8 = vsel %vm141_vm0, %v1776_v31, 0.0  ;;  %v6075_v31 = vld [vmem:[#allocation35_spill] sm:$0xff] }
0x13b5   :  { %1784 = vst [vmem:[#allocation1 + $0x31] ss:$2 sm:$0xff] %v1736_v43  ;;  %v1778_v19 = vld.sshfl [vmem:[#allocation1] sm:$0xff pattern:$0x75316420] }
0x13b6   :  { %1788 = vst [vmem:[#allocation1] ss:$2 sm:$0xff] %v1737_v20  ;;  %v1815_v33 = vsel %vm634_vm6, %v1778_v19, 0.0 }
0x13b7   :  { %1813 = vadd.xlane.f32.xlu1 %v1812_v8  ;;  %1789 = vst [vmem:[#allocation1 + $0x1] ss:$2 sm:$0xff] %v1738_v32 }
0x13b8   :  { %v1785_v34 = vld.sshfl [vmem:[#allocation1 + $0x10] sm:$0xff pattern:$0x75316420] }
0x13b9   :  { %1810 = vadd.xlane.f32.xlu0 %v1809_v37  ;;  %v1818_v44 = vsel %vm141_vm0, %v1785_v34, 0.0  ;;  %1790 = vst [vmem:[#allocation1 + $0x10] ss:$2 sm:$0xff] %v1739_v58 }
0x13ba   :  { %1819 = vadd.xlane.f32.xlu2 %v1818_v44  ;;  %v1786_v45 = vld.sshfl [vmem:[#allocation1 + $0x20] sm:$0xff pattern:$0x75316420] }
0x13bb   :  { %v1821_v40 = vsel %vm141_vm0, %v1786_v45, 0.0 }
0x13bc   :  { %v1787_v63 = vld.sshfl [vmem:[#allocation1 + $0x30] sm:$0xff pattern:$0x75316420] }
0x13bd   :  { %v1824_v11 = vsel %vm141_vm0, %v1787_v63, 0.0 }
0x13be   :  { %v1791_v39 = vld.sshfl [vmem:[#allocation1] sm:$0xff pattern:$0x75316420] }
0x13bf   :  { %v1827_v29 = vsel %vm141_vm0, %v1791_v39, 0.0  ;;  %1822 = vadd.xlane.f32.xlu1 %v1821_v40 }
0x13c0   :  { %v1792_v36 = vld.sshfl [vmem:[#allocation1 + $0x10] sm:$0xff pattern:$0x75316420] }
0x13c1   :  { %1828 = vadd.xlane.f32.xlu0 %v1827_v29  ;;  %v1830_v22 = vsel %vm634_vm6, %v1792_v36, 0.0 }
0x13c2   :  { %1825 = vadd.xlane.f32.xlu2 %v1824_v11 }
0x13c7   :  { %1831 = vadd.xlane.f32.xlu1 %v1830_v22 }
0x13ca   :  { %1816 = vadd.xlane.f32.xlu2 %v1815_v33 }
0x1422   :  { %v1805_v17 = vpop.xlane.xlu1 %1804 }
0x1423   :  { %v1833_v8 = vadd.f32 %v1805_v17, %v6075_v31 }
0x1424   :  { %v1808_v27 = vpop.xlane.xlu0 %1807 }
0x1425   :  { %v1834_v58 = vadd.f32 %v1808_v27, %v6075_v31  ;;  %v1853_v39 = vperm.slane %v1833_v8, %v4813_v59 }
0x1427   :  { %v1854_v29 = vperm.slane %v1834_v58, %v4816_v13 }
0x142a   :  { %v1814_v2 = vpop.xlane.xlu1 %1813 }
0x142b   :  { %v1836_v11 = vadd.f32 %v1814_v2, %v6075_v31 }
0x142c   :  { %v1811_v10 = vpop.xlane.xlu0 %1810 }
0x142d   :  { %v1820_v15 = vpop.xlane.xlu2 %1819  ;;  %v1835_v19 = vadd.f32 %v1811_v10, %v6075_v31 }
0x142e   :  { %v1838_v20 = vadd.f32 %v1820_v15, %v6075_v31  ;;  %v1855_v15 = vsel %vm684_vm7, %v1854_v29, %v1853_v39 }
0x142f   :  { %v1856_v33 = vperm.slane %v1835_v19, %v4821_v1 }
0x1430   :  { %v1862_v40 = vperm.slane %v1838_v20, %v4813_v59 }
0x1432   :  { %v1823_v43 = vpop.xlane.xlu1 %1822 }
0x1433   :  { %v1839_v32 = vadd.f32 %v1823_v43, %v6075_v31  ;;  %v1858_v43 = vperm.slane %v1836_v11, %v4824_v5 }
0x1434   :  { %v1829_v44 = vpop.xlane.xlu0 %1828 }
0x1435   :  { %v1863_v37 = vperm.slane %v1839_v32, %v4816_v13  ;;  %v1826_v34 = vpop.xlane.xlu2 %1825  ;;  %v1841_v36 = vadd.f32 %v1829_v44, %v6075_v31  ;;  %v1857_v44 = vsel %vm688_vm8, %v1856_v33, %v1855_v15 }
0x1436   :  { %v1840_v45 = vadd.f32 %v1826_v34, %v6075_v31 }
0x1437   :  { %v1864_v22 = vsel %vm684_vm7, %v1863_v37, %v1862_v40  ;;  %v1867_v34 = vperm.slane %v1841_v36, %v4824_v5 }
0x1438   :  { %v1865_v63 = vperm.slane %v1840_v45, %v4821_v1 }
0x143a   :  { %v1832_v17 = vpop.xlane.xlu1 %1831  ;;  %v1866_v10 = vsel %vm688_vm8, %v1865_v63, %v1864_v22  ;;  %v1859_v63 = vsel %vm692_vm9, %v1858_v43, %v1857_v44 }
0x143b   :  { %v1842_v27 = vadd.f32 %v1832_v17, %v6075_v31  ;;  %v1868_v40 = vsel %vm692_vm9, %v1867_v34, %v1866_v10 }
0x143d   :  { %v1817_v18 = vpop.xlane.xlu2 %1816  ;;  %v1869_v2 = vperm.slane %v1842_v27, %v4827_v50 }
0x143e   :  { %v1837_v37 = vadd.f32 %v1817_v18, %v6075_v31 }
0x143f   :  { %v1870_v17 = vsel %vm696_vm10, %v1869_v2, %v1868_v40 }
0x1440   :  { %v1860_v60 = vperm.slane %v1837_v37, %v4827_v50 }
0x1442   :  { %v1861_v39 = vsel %vm696_vm10, %v1860_v60, %v1859_v63 }
0x1443   :  { %v1871_v29 = vsel %vm707_vm11, %v1870_v17, %v1861_v39 }
0x1444   :  { %v1873_v22 = vsel %vm710_vm12, %v1871_v29, -inf }
0x1445   :  { %1874 = vmax.xlane.f32.xlu0 %v1873_v22 }
0x14b8   :  { %v1875_v30 = vpop.xlane.xlu0 %1874 }
0x14b9   :  { %v1877_v12 = vperm.slane %v1875_v30, 0  ;;  %v1878_v33 = vperm.slane %v1875_v30, 1 }
0x14bb   :  { %v1881_v15 = vsub.f32 %v1833_v8, %v1877_v12  ;;  %v1882_v18 = vsub.f32 %v1834_v58, %v1877_v12  ;;  %v1886_v31 = vsub.f32 %v1838_v20, %v1878_v33  ;;  %v1888_v46 = vsub.f32 %v1840_v45, %v1878_v33 }
0x14bc   :  { %v1887_v2 = vsub.f32 %v1839_v32, %v1878_v33  ;;  %v1883_v43 = vsub.f32 %v1835_v19, %v1877_v12  ;;  %v1885_v20 = vsub.f32 %v1837_v37, %v1877_v12  ;;  %v1890_v37 = vsub.f32 %v1842_v27, %v1878_v33 }
0x14bd   :  { %v1891_v10 = vmul.f32 1.442695, %v1881_v15  ;;  %v1893_v34 = vmul.f32 1.442695, %v1882_v18  ;;  %v1901_v49 = vmul.f32 1.442695, %v1886_v31  ;;  %v1884_v31 = vsub.f32 %v1836_v11, %v1877_v12 }
0x14be   :  { %v1905_v60 = vmul.f32 1.442695, %v1888_v46  ;;  %v1903_v44 = vmul.f32 1.442695, %v1887_v2  ;;  %v1895_v17 = vmul.f32 1.442695, %v1883_v43 }
0x14bf   :  { %4081 = vpow2.f32 %v1893_v34  ;;  %v1899_v46 = vmul.f32 1.442695, %v1885_v20  ;;  %v1897_v32 = vmul.f32 1.442695, %v1884_v31  ;;  %v1909_v12 = vmul.f32 1.442695, %v1890_v37 }
0x14c0   :  { %4083 = vpow2.f32 %v1891_v10 }
0x14c1   :  { %4085 = vpow2.f32 %v1901_v49  ;;  %v1889_v49 = vsub.f32 %v1841_v36, %v1878_v33 }
0x14c2   :  { %4087 = vpow2.f32 %v1905_v60 }
0x14c3   :  { %4089 = vpow2.f32 %v1903_v44  ;;  %v1907_v58 = vmul.f32 1.442695, %v1889_v49 }
0x14c4   :  { %4091 = vpow2.f32 %v1895_v17 }
0x14c5   :  { %v5340_v40 = vpop.eup %4081  ;;  %4093 = vpow2.f32 %v1899_v46 }
0x14c6   :  { %v5342_v63 = vpop.eup %4083  ;;  %1925 = vperm.xlu1 %3987, %v5340_v40   ;;  %4095 = vpow2.f32 %v1897_v32 }
0x14c7   :  { %v5345_v30 = vpop.eup %4085  ;;  %1922 = vperm.xlu2 %3989, %v5342_v63   ;;  %4097 = vpow2.f32 %v1907_v58 }
0x14c8   :  { %1937 = vperm.xlu0 %3988, %v5345_v30   ;;  %v5349_v8 = vpop.eup %4087  ;;  %4099 = vpow2.f32 %v1909_v12 }
0x14c9   :  { %v4090_v19 = vpop.eup %4089 }
0x14ca   :  { %v4092_v45 = vpop.eup %4091 }
0x14cb   :  { %v4094_v11 = vpop.eup %4093 }
0x14cc   :  { %v4096_v39 = vpop.eup %4095 }
0x14cd   :  { %v4098_v36 = vpop.eup %4097 }
0x14ce   :  { %1943 = vperm.xlu1 %3987, %v5349_v8   ;;  %v4100_v29 = vpop.eup %4099 }
0x14cf   :  { %1940 = vperm.xlu2 %3989, %v4090_v19  }
0x14d0   :  { %1928 = vperm.xlu0 %3988, %v4092_v45  }
0x14d6   :  { %1934 = vperm.xlu1 %3987, %v4094_v11  }
0x14d7   :  { %1931 = vperm.xlu2 %3989, %v4096_v39  }
0x14d8   :  { %1946 = vperm.xlu0 %3988, %v4098_v36  }
0x14df   :  { %1949 = vperm.xlu2 %3989, %v4100_v29  }
0x1521   :  { %v1923_v22 = vpop.permute.xlu2 %1922 }
0x1522   :  { %v1951_v60 = vperm.slane %v1923_v22, %v4813_v59 }
0x1529   :  { %v1941_v15 = vpop.permute.xlu2 %1940 }
0x152a   :  { %v1961_v46 = vperm.slane %v1941_v15, %v4816_v13 }
0x1531   :  { %v1932_v34 = vpop.permute.xlu2 %1931 }
0x1532   :  { %v1956_v32 = vperm.slane %v1932_v34, %v4824_v5 }
0x1538   :  { %v1926_v18 = vpop.permute.xlu1 %1925 }
0x1539   :  { %v1952_v33 = vperm.slane %v1926_v18, %v4816_v13  ;;  %v1950_v58 = vpop.permute.xlu2 %1949 }
0x153a   :  { %v1938_v10 = vpop.permute.xlu0 %1937 }
0x153b   :  { %v1960_v44 = vperm.slane %v1938_v10, %v4813_v59  ;;  %v1953_v17 = vsel %vm684_vm7, %v1952_v33, %v1951_v60 }
0x153d   :  { %v1962_v18 = vsel %vm684_vm7, %v1961_v46, %v1960_v44 }
0x1540   :  { %v1944_v2 = vpop.permute.xlu1 %1943 }
0x1541   :  { %v1963_v31 = vperm.slane %v1944_v2, %v4821_v1 }
0x1542   :  { %v1929_v27 = vpop.permute.xlu0 %1928 }
0x1543   :  { %v1954_v43 = vperm.slane %v1929_v27, %v4821_v1  ;;  %v1967_v27 = vperm.slane %v1950_v58, %v4827_v50  ;;  %v1964_v33 = vsel %vm688_vm8, %v1963_v31, %v1962_v18 }
0x1545   :  { %v1955_v20 = vsel %vm688_vm8, %v1954_v43, %v1953_v17 }
0x1546   :  { %v1957_v10 = vsel %vm692_vm9, %v1956_v32, %v1955_v20 }
0x1548   :  { %v1935_v49 = vpop.permute.xlu1 %1934 }
0x1549   :  { %v1958_v37 = vperm.slane %v1935_v49, %v4827_v50 }
0x154a   :  { %v1947_v12 = vpop.permute.xlu0 %1946 }
0x154b   :  { %v1965_v22 = vperm.slane %v1947_v12, %v4824_v5  ;;  %v1959_v2 = vsel %vm696_vm10, %v1958_v37, %v1957_v10 }
0x154d   :  { %v1966_v15 = vsel %vm692_vm9, %v1965_v22, %v1964_v33 }
0x154e   :  { %v1968_v34 = vsel %vm696_vm10, %v1967_v27, %v1966_v15 }
0x154f   :  { %v1969_v43 = vsel %vm707_vm11, %v1968_v34, %v1959_v2 }
0x1550   :  { %v1971_v60 = vsel %vm710_vm12, %v1969_v43, 0.0 }
0x1551   :  { %1972 = vadd.xlane.f32.xlu0 %v1971_v60 }
0x15c4   :  { %v1973_v44 = vpop.xlane.xlu0 %1972 }
0x15c5   :  { %4101 = vrcp.f32 %v1973_v44 }
0x15cb   :  { %v4102_v17 = vpop.eup %4101 }
0x15cc   :  { %v1976_v49 = vperm.slane %v4102_v17, 0  ;;  %v1977_v31 = vperm.slane %v4102_v17, 1 }
0x15ce   :  { %v1981_v20 = vmul.f32 %v5340_v40, %v1976_v49  ;;  %v1980_v46 = vmul.f32 %v5342_v63, %v1976_v49  ;;  %v1986_v32 = vmul.f32 %v4090_v19, %v1977_v31  ;;  %v1985_v58 = vmul.f32 %v5345_v30, %v1977_v31 }
0x15cf   :  { %v1987_v37 = vmul.f32 %v5349_v8, %v1977_v31  ;;  %v1982_v12 = vmul.f32 %v4092_v45, %v1976_v49  ;;  %v1988_v18 = vmul.f32 %v4098_v36, %v1977_v31  ;;  %v1983_v22 = vmul.f32 %v4096_v39, %v1976_v49 }
0x15d0   :  { %1997 = vperm.xlu2 %3989, %v1981_v20   ;;  %1992 = vperm.xlu1 %3987, %v1980_v46   ;;  %v1989_v40 = vmul.f32 %v4100_v29, %v1977_v31  ;;  %v1984_v10 = vmul.f32 %v4094_v11, %v1976_v49 }
0x15d8   :  { %2022 = vperm.xlu2 %3989, %v1986_v32   ;;  %2017 = vperm.xlu1 %3987, %v1985_v58  }
0x15e0   :  { %2027 = vperm.xlu2 %3989, %v1987_v37   ;;  %2002 = vperm.xlu1 %3987, %v1982_v12  }
0x15e8   :  { %2032 = vperm.xlu2 %3989, %v1988_v18   ;;  %2007 = vperm.xlu1 %3987, %v1983_v22  }
0x15f0   :  { %2037 = vperm.xlu2 %3989, %v1989_v40   ;;  %2012 = vperm.xlu1 %3987, %v1984_v10  }
0x162a   :  { %v1998_v63 = vpop.permute.xlu2 %1997 }
0x162b   :  { %v2041_v37 = vmul.f32 %v1998_v63, %v4581_v53 }
0x162d   :  { %v2051_v10 = vsel %vm141_vm0, %v2041_v37, 0.0  ;;  %v5405_v37 = vld [vmem:[%s5983_s16] ss:$0 sm:$0xff] }
0x1632   :  { %v2023_v27 = vpop.permute.xlu2 %2022 }
0x1633   :  { %v2046_v2 = vmul.f32 %v2023_v27, %v4616_v0 }
0x1635   :  { %v2066_v45 = vsel %vm141_vm0, %v2046_v2, 0.0 }
0x163a   :  { %v2028_v19 = vpop.permute.xlu2 %2027 }
0x163b   :  { %v2047_v39 = vmul.f32 %v2028_v19, %v4625_v4 }
0x163d   :  { %v2068_v11 = vsel %vm141_vm0, %v2047_v39, 0.0 }
0x1642   :  { %v1993_v33 = vpop.permute.xlu1 %1992  ;;  %v2033_v30 = vpop.permute.xlu2 %2032 }
0x1643   :  { %v2048_v34 = vmul.f32 %v2033_v30, %v4633_v7  ;;  %v2040_v46 = vmul.f32 %v1993_v33, %v4576_v52 }
0x1645   :  { %v2070_v17 = vsel %vm141_vm0, %v2048_v34, 0.0  ;;  %v2050_v18 = vsel %vm141_vm0, %v2040_v46, 0.0 }
0x1646   :  { %v2052_v19 = vadd.f32 %v2051_v10, %v2050_v18 }
0x164a   :  { %v2018_v15 = vpop.permute.xlu1 %2017  ;;  %v2038_v43 = vpop.permute.xlu2 %2037 }
0x164b   :  { %v2045_v8 = vmul.f32 %v2018_v15, %v4609_v62  ;;  %v2049_v49 = vmul.f32 %v2038_v43, %v4663_v23 }
0x164d   :  { %v2065_v36 = vsel %vm141_vm0, %v2045_v8, 0.0  ;;  %v2072_v31 = vsel %vm634_vm6, %v2049_v49, 0.0 }
0x164e   :  { %v2067_v29 = vadd.f32 %v2066_v45, %v2065_v36 }
0x1650   :  { %v2069_v60 = vadd.f32 %v2068_v11, %v2067_v29 }
0x1652   :  { %v2003_v44 = vpop.permute.xlu1 %2002  ;;  %v2071_v20 = vadd.f32 %v2070_v17, %v2069_v60 }
0x1653   :  { %v2042_v12 = vmul.f32 %v2003_v44, %v4589_v56 }
0x1654   :  { %v2073_v32 = vadd.f32 %v2072_v31, %v2071_v20  ;;  %v2097_v31 = vpop.f32.mrf.mxu1 }
0x1655   :  { %v2053_v27 = vsel %vm141_vm0, %v2042_v12, 0.0 }
0x1656   :  { %v2074_v40 = vrot.slane %v2073_v32, 4  ;;  %v2054_v2 = vadd.f32 %v2053_v27, %v2052_v19 }
0x1658   :  { %v2075_v30 = vadd.f32 %v2074_v40, %v2073_v32 }
0x165a   :  { %v2008_v58 = vpop.permute.xlu1 %2007  ;;  %v2076_v39 = vrot.slane %v2075_v30, 2 }
0x165b   :  { %v2043_v22 = vmul.f32 %v2008_v58, %v4594_v57 }
0x165c   :  { %v2077_v34 = vadd.f32 %v2076_v39, %v2075_v30 }
0x165d   :  { %v2055_v33 = vsel %vm141_vm0, %v2043_v22, 0.0 }
0x165e   :  { %v2056_v63 = vadd.f32 %v2055_v33, %v2054_v2  ;;  %v2078_v44 = vrot.slane %v2077_v34, 1 }
0x1660   :  { %v2079_v20 = vadd.f32 %v2078_v44, %v2077_v34  ;;  %v2191_v44 = vld [vmem:[#allocation2 + $0x6] sm:$0x3] }
0x1662   :  { %v2013_v15 = vpop.permute.xlu1 %2012 }
0x1663   :  { %v2044_v8 = vmul.f32 %v2013_v15, %v4604_v61 }
0x1665   :  { %v2057_v45 = vsel %vm634_vm6, %v2044_v8, 0.0 }
0x1666   :  { %v2058_v36 = vadd.f32 %v2057_v45, %v2056_v63 }
0x1668   :  { %v2059_v29 = vrot.slane %v2058_v36, 4 }
0x166a   :  { %v2060_v11 = vadd.f32 %v2059_v29, %v2058_v36 }
0x166c   :  { %v2061_v43 = vrot.slane %v2060_v11, 2 }
0x166e   :  { %v2062_v60 = vadd.f32 %v2061_v43, %v2060_v11 }
0x1670   :  { %v2063_v17 = vrot.slane %v2062_v60, 1 }
0x1672   :  { %v2064_v49 = vadd.f32 %v2063_v17, %v2062_v60 }
0x1674   :  { %v2102_v46 = vsel %vm707_vm11, %v2079_v20, %v2064_v49 }
0x1675   :  { %3956 = vmatmul.msk.f32.vlgmr.msra.gmra.mxu2 %vm141_vm0, %v2102_v46 }
0x1676   :  { %2826 = vmatpush.msra.mxu2 %v5172_v51 }
0x1678   :  { %2827 = vmatpush.msra.mxu2 %v5175_v55 }
0x167a   :  { %2828 = vmatpush.msra.mxu2 %v5178_v35 }
0x167c   :  { %2829 = vmatpush.msra.mxu2 %v5181_v21 }
0x16f8   :  { %v2122_v32 = vpop.f32.mrf.mxu2 }
0x16f9   :  { %v2123_v58 = vadd.f32 %v2122_v32, %v2097_v31 }
0x16fb   :  { %v2125_v12 = vadd.f32 %v5405_v37, %v2123_v58 }
0x16fd   :  { %4103 = vtanh.f32 %v2125_v12  ;;  %v3957_v51 = vmul.f32 -1.442695, %v2125_v12 }
0x16ff   :  { %4105 = vpow2.f32 %v3957_v51 }
0x1703   :  { %v4104_v18 = vpop.eup %4103 }
0x1704   :  { %2148 = vrot.lane.b32.xlu1 %v4104_v18, %s4398_s30 }
0x1705   :  { %v4106_v55 = vpop.eup %4105 }
0x1706   :  { %v2129_v35 = vadd.f32 1.0, %v4106_v55 }
0x1708   :  { %4107 = vrcp.f32 %v2129_v35  ;;  %v2141_v19 = vand.u32 2147483648, %v2129_v35  ;;  %vm2135_vm1 = vweird.f32 %v2129_v35  ;;  %v2139_v33 = vand.u32 2147483647, %v2129_v35 }
0x170a   :  { %v2142_v2 = vor.u32 1.1754944e-38, %v2141_v19  ;;  %vm2140_vm4 = vcmp.eq.f32.partialorder %v2139_v33, 8.507059e+37 }
0x170e   :  { %v4108_v21 = vpop.eup %4107 }
0x170f   :  { %v2131_v22 = vmul.f32 %v4108_v21, %v2129_v35  ;;  %vm2136_vm15 = vweird.f32 %v4108_v21 }
0x1710   :  { %vm2137_vm3 = vmor %vm2135_vm1, %vm2136_vm15 }
0x1711   :  { %v2132_v40 = vsub.f32 1.0, %v2131_v22 }
0x1713   :  { %v2133_v10 = vmul.f32 %v4108_v21, %v2132_v40 }
0x1715   :  { %v2134_v27 = vadd.f32 %v4108_v21, %v2133_v10 }
0x1717   :  { %v2138_v30 = vsel %vm2137_vm3, %v4108_v21, %v2134_v27 }
0x1718   :  { %v2143_v8 = vsel %vm2140_vm4, %v2142_v2, %v2138_v30  ;;  %v4245_v2 = vld [vmem:[%s5972_s5 + $0x10] sm:$0xff] }
0x1719   :  { %v2146_v45 = vmul.f32 %v2143_v8, %v5188_v54 }
0x1776   :  { %v2149_v15 = vpop.permute.xlu1 %2148 }
0x1777   :  { %v2151_v63 = vmul.f32 %v2149_v15, %v2143_v8  ;;  %v4246_v15 = vld [vmem:[%s5972_s5 + $0x8] sm:$0xff] }
0x1779   :  { %2153 = vrot.lane.b32.xlu0 %v2151_v63, %s4399_s4 }
0x17eb   :  { %v2154_v39 = vpop.permute.xlu0 %2153 }
0x17ec   :  { %v5411_v36 = vadd.f32 %v2154_v39, %v2146_v45 }
0x17ee   :  { %4109 = vtanh.f32 %v5411_v36 }
0x17f4   :  { %v4110_v29 = vpop.eup %4109 }
0x17f5   :  { %2159 = vrot.lane.b32.xlu2 %v4110_v29, %s4398_s30 }
0x184f   :  { %v2160_v11 = vpop.permute.xlu2 %2159 }
0x1850   :  { %v2162_v34 = vmul.f32 %v2160_v11, %v2143_v8 }
0x1852   :  { %2164 = vrot.lane.b32.xlu1 %v2162_v34, %s4399_s4  ;;  %v6076_v34 = vld [vmem:[#allocation19_spill] sm:$0xff] }
0x18c4   :  { %v2165_v43 = vpop.permute.xlu1 %2164 }
0x18c5   :  { %2168 = vst.msk [vmem:[#allocation12 + $0x4] sm:$0x3] %vm1009_vm2, %v2165_v43  ;;  %3958 = vmatmul.msk.f32.vlgmr.msrb.gmra.mxu0 %vm141_vm0, %v2165_v43 }
0x18c6   :  { %3250 = vmatpush.msrb.mxu0 %v5198_v6 }
0x18c8   :  { %3251 = vmatpush.msrb.mxu0 %v5204_v42 }
0x18ca   :  { %3252 = vmatpush.msrb.mxu0 %v5210_v41 }
0x18cc   :  { %3253 = vmatpush.msrb.mxu0 %v5216_v26 }
0x1942   :  { %v2188_v54 = vpop.f32.mrf.mxu0 }
0x1943   :  { %v2189_v60 = vadd.f32 %v2188_v54, %v4564_v24 }
0x1945   :  { %v2192_v17 = vadd.f32 %v2191_v44, %v2189_v60  ;;  %v6078_v44 = vld [vmem:[#allocation21_spill] sm:$0xff] }
0x1947   :  { %4111 = vtanh.f32 %v2192_v17  ;;  %v3959_v20 = vmul.f32 -1.442695, %v2192_v17 }
0x1949   :  { %4113 = vpow2.f32 %v3959_v20 }
0x194d   :  { %v4112_v49 = vpop.eup %4111 }
0x194e   :  { %2215 = vrot.lane.b32.xlu2 %v4112_v49, %s4398_s30  ;;  %v6079_v49 = vld [vmem:[#allocation18_spill] sm:$0xff] }
0x194f   :  { %v4114_v46 = vpop.eup %4113 }
0x1950   :  { %v2196_v31 = vadd.f32 1.0, %v4114_v46 }
0x1952   :  { %4115 = vrcp.f32 %v2196_v31  ;;  %v2208_v26 = vand.u32 2147483648, %v2196_v31  ;;  %vm2202_vm13 = vweird.f32 %v2196_v31  ;;  %v2206_v12 = vand.u32 2147483647, %v2196_v31 }
0x1954   :  { %v2209_v51 = vor.u32 1.1754944e-38, %v2208_v26  ;;  %vm2207_vm15 = vcmp.eq.f32.partialorder %v2206_v12, 8.507059e+37 }
0x1958   :  { %v4116_v6 = vpop.eup %4115 }
0x1959   :  { %v2198_v42 = vmul.f32 %v4116_v6, %v2196_v31  ;;  %vm2203_vm5 = vweird.f32 %v4116_v6 }
0x195a   :  { %vm2204_vm14 = vmor %vm2202_vm13, %vm2203_vm5 }
0x195b   :  { %v2199_v32 = vsub.f32 1.0, %v2198_v42 }
0x195d   :  { %v2200_v41 = vmul.f32 %v4116_v6, %v2199_v32 }
0x195f   :  { %v2201_v58 = vadd.f32 %v4116_v6, %v2200_v41 }
0x1961   :  { %v2205_v18 = vsel %vm2204_vm14, %v4116_v6, %v2201_v58  ;;  %v6080_v6 = vld [vmem:[#allocation22_spill] sm:$0xff] }
0x1962   :  { %v2210_v35 = vsel %vm2207_vm15, %v2209_v51, %v2205_v18  ;;  %v5461_v18 = vld [vmem:[%s5980_s13] ss:$0 sm:$0xff] }
0x1963   :  { %v2213_v22 = vmul.f32 %v2210_v35, %v5223_v9  ;;  %v4244_v9 = vld [vmem:[%s5972_s5 + $0x18] sm:$0xff] }
0x19a8   :  { %v2216_v55 = vpop.permute.xlu2 %2215 }
0x19a9   :  { %v2218_v21 = vmul.f32 %v2216_v55, %v2210_v35  ;;  %v6081_v55 = vld [vmem:[#allocation25_spill] sm:$0xff] }
0x19ab   :  { %2220 = vrot.lane.b32.xlu1 %v2218_v21, %s4399_s4 }
0x1a1d   :  { %v2221_v40 = vpop.permute.xlu1 %2220 }
0x1a1e   :  { %v5426_v10 = vadd.f32 %v2221_v40, %v2213_v22  ;;  %v6082_v22 = vld [vmem:[#allocation23_spill] sm:$0xff] }
0x1a20   :  { %4117 = vtanh.f32 %v5426_v10 }
0x1a26   :  { %v4118_v27 = vpop.eup %4117 }
0x1a27   :  { %2226 = vrot.lane.b32.xlu2 %v4118_v27, %s4398_s30 }
0x1a81   :  { %v2227_v19 = vpop.permute.xlu2 %2226 }
0x1a82   :  { %v2229_v33 = vmul.f32 %v2227_v19, %v2210_v35 }
0x1a84   :  { %2231 = vrot.lane.b32.xlu0 %v2229_v33, %s4399_s4 }
0x1af6   :  { %v2232_v30 = vpop.permute.xlu0 %2231 }
0x1af7   :  { %3960 = vmatmul.msk.f32.vlgmr.msrb.gmra.mxu1 %vm141_vm0, %v2232_v30  ;;  %3961 = vmatmul.msk.f32.vlgmr.msrb.gmra.mxu2 %vm141_vm0, %v2232_v30  ;;  %v6083_v30 = vld [vmem:[#allocation26_spill] sm:$0xff] }
0x1af8   :  { %3275 = vmatpush.msrb.mxu1 %v5233_v3  ;;  %3341 = vmatpush.msrb.mxu2 %v4244_v9  ;;  %v4247_v3 = vld [vmem:[%s5972_s5] sm:$0xff]  ;;  %s3910_s5 = sshll.u32 %s4401_s28, 4  ;;  %s3911_s5 = int_to_ptr.vmem [resolvable:$true] %s3910_s5 }
0x1afa   :  { %3276 = vmatpush.msrb.mxu1 %v5240_v28  ;;  %3342 = vmatpush.msrb.mxu2 %v4245_v2 }
0x1afc   :  { %3277 = vmatpush.msrb.mxu1 %v5247_v25  ;;  %3343 = vmatpush.msrb.mxu2 %v4246_v15  ;;  %v6084_v15 = vld [vmem:[#allocation24_spill] sm:$0xff] }
0x1afe   :  { %3278 = vmatpush.msrb.mxu1 %v5254_v47  ;;  %3344 = vmatpush.msrb.mxu2 %v4247_v3  ;;  %v6077_v47 = vld [vmem:[#allocation17_spill] sm:$0xff] }
0x1b74   :  { %v2252_v28 = vpop.f32.mrf.mxu1 }
0x1b75   :  { %v2253_v8 = vadd.f32 %v5261_v38, %v2252_v28 }
0x1b77   :  { %v2257_v63 = vperm.slane %v2253_v8, 0  ;;  %v2256_v39 = vrot.slane %v2253_v8, 1  ;;  %v6085_v8 = vld [vmem:[#allocation27_spill] sm:$0xff] }
0x1b79   :  { %v2261_v45 = vrot.slane %v2257_v63, 4  ;;  %v2265_v25 = vadd.f32 %v2257_v63, %v4713_v14  ;;  %v2267_v11 = vadd.f32 %v2257_v63, %v4715_v16  ;;  %v2269_v54 = vadd.f32 %v2257_v63, %v6077_v47 }
0x1b7a   :  { %v2258_v60 = vperm.slane %v2256_v39, 0  ;;  %v2271_v20 = vadd.f32 %v2257_v63, %v6079_v49  ;;  %v2273_v40 = vadd.f32 %v2257_v63, %v6082_v22 }
0x1b7b   :  { %v2266_v29 = vadd.f32 %v2261_v45, %v4723_v48  ;;  %v2268_v43 = vadd.f32 %v2261_v45, %v6076_v34  ;;  %v2270_v17 = vadd.f32 %v2261_v45, %v6078_v44  ;;  %v2283_v46 = vmax.f32 %v2265_v25, 0.0  ;;  %v6086_v25 = vld [vmem:[#allocation28_spill] sm:$0xff] }
0x1b7c   :  { %v2285_v31 = vmax.f32 %v2267_v11, 0.0  ;;  %v2272_v42 = vadd.f32 %v2261_v45, %v6080_v6  ;;  %v2287_v41 = vmax.f32 %v2269_v54, 0.0  ;;  %v2262_v58 = vrot.slane %v2258_v60, 4  ;;  %v6087_v11 = vld [vmem:[#allocation30_spill] sm:$0xff] }
0x1b7d   :  { %v2284_v38 = vmax.f32 %v2266_v29, 0.0  ;;  %v2286_v32 = vmax.f32 %v2268_v43, 0.0  ;;  %v2288_v26 = vmax.f32 %v2270_v17, 0.0  ;;  %v2289_v12 = vmax.f32 %v2271_v20, 0.0  ;;  %v6088_v17 = vld [vmem:[#allocation29_spill] sm:$0xff] }
0x1b7e   :  { %v2301_v51 = vmul.f32 %v5461_v18, %v2283_v46  ;;  %v2303_v21 = vmul.f32 %v5461_v18, %v2285_v31  ;;  %v2290_v27 = vmax.f32 %v2272_v42, 0.0  ;;  %v2305_v33 = vmul.f32 %v5461_v18, %v2287_v41  ;;  %v6090_v41 = vld [vmem:[#allocation31_spill] sm:$0xff] }
0x1b7f   :  { %v2302_v35 = vmul.f32 %v2284_v38, %v6081_v55  ;;  %v2304_v19 = vmul.f32 %v2286_v32, %v6081_v55  ;;  %v2274_v9 = vadd.f32 %v2258_v60, %v6083_v30  ;;  %v2306_v2 = vmul.f32 %v2288_v26, %v6081_v55  ;;  %v6089_v38 = vld [vmem:[#allocation32_spill] sm:$0xff] }
0x1b80   :  { %2337 = vst [vmem:[#allocation1] ss:$2 sm:$0xff] %v2301_v51  ;;  %v2275_v3 = vadd.f32 %v2262_v58, %v6084_v15  ;;  %v2307_v28 = vmul.f32 %v5461_v18, %v2289_v12  ;;  %v2276_v45 = vadd.f32 %v2258_v60, %v6085_v8  ;;  %v2291_v39 = vmax.f32 %v2273_v40, 0.0 }
0x1b81   :  { %2339 = vst [vmem:[#allocation1 + $0x1] ss:$2 sm:$0xff] %v2302_v35  ;;  %v2308_v63 = vmul.f32 %v2290_v27, %v6081_v55  ;;  %v2277_v29 = vadd.f32 %v2262_v58, %v6086_v25  ;;  %v2278_v43 = vadd.f32 %v2258_v60, %v6087_v11  ;;  %v2292_v54 = vmax.f32 %v2274_v9, 0.0  ;;  %v6091_v27 = vld [vmem:[#allocation33_spill] sm:$0xff] }
0x1b82   :  { %2341 = vst [vmem:[#allocation1 + $0x10] ss:$2 sm:$0xff] %v2303_v21  ;;  %v2279_v20 = vadd.f32 %v2262_v58, %v6088_v17  ;;  %v2293_v46 = vmax.f32 %v2275_v3, 0.0  ;;  %v2280_v31 = vadd.f32 %v2258_v60, %v6089_v38  ;;  %v2294_v42 = vmax.f32 %v2276_v45, 0.0 }
0x1b83   :  { %2343 = vst [vmem:[#allocation1 + $0x11] ss:$2 sm:$0xff] %v2304_v19  ;;  %v2309_v32 = vmul.f32 %v5461_v18, %v2291_v39  ;;  %v2281_v26 = vadd.f32 %v2262_v58, %v6090_v41  ;;  %v2295_v12 = vmax.f32 %v2277_v29, 0.0  ;;  %v2296_v35 = vmax.f32 %v2278_v43, 0.0 }
0x1b84   :  { %2345 = vst [vmem:[#allocation1 + $0x20] ss:$2 sm:$0xff] %v2305_v33  ;;  %v2310_v21 = vmul.f32 %v5461_v18, %v2292_v54  ;;  %v2282_v19 = vadd.f32 %v2258_v60, %v6091_v27  ;;  %v2297_v33 = vmax.f32 %v2279_v20, 0.0  ;;  %v2311_v9 = vmul.f32 %v2293_v46, %v6081_v55 }
0x1b85   :  { %2347 = vst [vmem:[#allocation1 + $0x21] ss:$2 sm:$0xff] %v2306_v2  ;;  %v2298_v3 = vmax.f32 %v2280_v31, 0.0  ;;  %v2299_v45 = vmax.f32 %v2281_v26, 0.0  ;;  %v2313_v39 = vmul.f32 %v2295_v12, %v6081_v55  ;;  %v2314_v29 = vmul.f32 %v5461_v18, %v2296_v35 }
0x1b86   :  { %2349 = vst [vmem:[#allocation1 + $0x30] ss:$2 sm:$0xff] %v2307_v28  ;;  %v2312_v28 = vmul.f32 %v5461_v18, %v2294_v42  ;;  %v2300_v60 = vmax.f32 %v2282_v19, 0.0  ;;  %v2315_v43 = vmul.f32 %v2297_v33, %v6081_v55 }
0x1b87   :  { %2351 = vst [vmem:[#allocation1 + $0x31] ss:$2 sm:$0xff] %v2308_v63  ;;  %v2316_v20 = vmul.f32 %v5461_v18, %v2298_v3  ;;  %v2317_v46 = vmul.f32 %v2299_v45, %v6081_v55 }
0x1b88   :  { %v2352_v51 = vld.sshfl [vmem:[#allocation1] sm:$0xff pattern:$0x75316420] }
0x1b89   :  { %v2382_v40 = vsel %vm141_vm0, %v2352_v51, 0.0  ;;  %2356 = vst [vmem:[#allocation1] ss:$2 sm:$0xff] %v2309_v32  ;;  %v2318_v32 = vmul.f32 %v5461_v18, %v2300_v60 }
0x1b8a   :  { %v2353_v2 = vld.sshfl [vmem:[#allocation1 + $0x10] sm:$0xff pattern:$0x75316420]  ;;  %2383 = vadd.xlane.f32.xlu1 %v2382_v40 }
0x1b8b   :  { %v2385_v58 = vsel %vm141_vm0, %v2353_v2, 0.0  ;;  %2358 = vst [vmem:[#allocation1 + $0x10] ss:$2 sm:$0xff] %v2310_v21 }
0x1b8c   :  { %2386 = vadd.xlane.f32.xlu2 %v2385_v58  ;;  %2359 = vst [vmem:[#allocation1 + $0x11] ss:$2 sm:$0xff] %v2311_v9  ;;  %v2354_v63 = vld.sshfl [vmem:[#allocation1 + $0x20] sm:$0xff pattern:$0x75316420] }
0x1b8d   :  { %2360 = vst [vmem:[#allocation1 + $0x20] ss:$2 sm:$0xff] %v2312_v28  ;;  %v2388_v26 = vsel %vm141_vm0, %v2354_v63, 0.0 }
0x1b8e   :  { %2361 = vst [vmem:[#allocation1 + $0x21] ss:$2 sm:$0xff] %v2313_v39  ;;  %v2355_v54 = vld.sshfl [vmem:[#allocation1 + $0x30] sm:$0xff pattern:$0x75316420] }
0x1b8f   :  { %2362 = vst [vmem:[#allocation1 + $0x30] ss:$2 sm:$0xff] %v2314_v29  ;;  %v2391_v42 = vsel %vm141_vm0, %v2355_v54, 0.0 }
0x1b90   :  { %v2357_v31 = vld.sshfl [vmem:[#allocation1] sm:$0xff pattern:$0x75316420]  ;;  %2363 = vst [vmem:[#allocation1 + $0x31] ss:$2 sm:$0xff] %v2315_v43 }
0x1b91   :  { %2367 = vst [vmem:[#allocation1] ss:$2 sm:$0xff] %v2316_v20  ;;  %v2394_v28 = vsel %vm634_vm6, %v2357_v31, 0.0  ;;  %v6092_v43 = vld [vmem:[#allocation35_spill] sm:$0xff] }
0x1b92   :  { %2368 = vst [vmem:[#allocation1 + $0x1] ss:$2 sm:$0xff] %v2317_v46  ;;  %2392 = vadd.xlane.f32.xlu1 %v2391_v42 }
0x1b93   :  { %v2364_v12 = vld.sshfl [vmem:[#allocation1 + $0x10] sm:$0xff pattern:$0x75316420] }
0x1b94   :  { %2389 = vadd.xlane.f32.xlu2 %v2388_v26  ;;  %v2397_v51 = vsel %vm141_vm0, %v2364_v12, 0.0  ;;  %2369 = vst [vmem:[#allocation1 + $0x10] ss:$2 sm:$0xff] %v2318_v32 }
0x1b95   :  { %2398 = vadd.xlane.f32.xlu0 %v2397_v51  ;;  %v2365_v35 = vld.sshfl [vmem:[#allocation1 + $0x20] sm:$0xff pattern:$0x75316420] }
0x1b96   :  { %v2400_v21 = vsel %vm141_vm0, %v2365_v35, 0.0 }
0x1b97   :  { %v2366_v19 = vld.sshfl [vmem:[#allocation1 + $0x30] sm:$0xff pattern:$0x75316420] }
0x1b98   :  { %v2403_v9 = vsel %vm141_vm0, %v2366_v19, 0.0 }
0x1b99   :  { %v2370_v40 = vld.sshfl [vmem:[#allocation1] sm:$0xff pattern:$0x75316420] }
0x1b9a   :  { %v2406_v33 = vsel %vm141_vm0, %v2370_v40, 0.0  ;;  %2401 = vadd.xlane.f32.xlu1 %v2400_v21 }
0x1b9b   :  { %v2371_v2 = vld.sshfl [vmem:[#allocation1 + $0x10] sm:$0xff pattern:$0x75316420] }
0x1b9c   :  { %2407 = vadd.xlane.f32.xlu2 %v2406_v33  ;;  %v2409_v3 = vsel %vm634_vm6, %v2371_v2, 0.0 }
0x1b9d   :  { %2404 = vadd.xlane.f32.xlu0 %v2403_v9 }
0x1ba2   :  { %2410 = vadd.xlane.f32.xlu1 %v2409_v3 }
0x1ba5   :  { %2395 = vadd.xlane.f32.xlu0 %v2394_v28 }
0x1bfd   :  { %v2384_v58 = vpop.xlane.xlu1 %2383 }
0x1bfe   :  { %v2412_v46 = vadd.f32 %v2384_v58, %v6092_v43 }
0x1bff   :  { %v2387_v45 = vpop.xlane.xlu2 %2386 }
0x1c00   :  { %v2413_v42 = vadd.f32 %v2387_v45, %v6092_v43  ;;  %v2432_v21 = vperm.slane %v2412_v46, %v4813_v59 }
0x1c02   :  { %v2433_v19 = vperm.slane %v2413_v42, %v4816_v13 }
0x1c05   :  { %v2393_v39 = vpop.xlane.xlu1 %2392 }
0x1c06   :  { %v2415_v33 = vadd.f32 %v2393_v39, %v6092_v43 }
0x1c07   :  { %v2390_v63 = vpop.xlane.xlu2 %2389 }
0x1c08   :  { %v2399_v29 = vpop.xlane.xlu0 %2398  ;;  %v5507_v31 = vadd.f32 %v2390_v63, %v6092_v43  ;;  %v2434_v63 = vsel %vm684_vm7, %v2433_v19, %v2432_v21 }
0x1c09   :  { %v2417_v54 = vadd.f32 %v2399_v29, %v6092_v43  ;;  %v2437_v29 = vperm.slane %v2415_v33, %v4824_v5 }
0x1c0a   :  { %v2435_v3 = vperm.slane %v5507_v31, %v4821_v1 }
0x1c0b   :  { %v2441_v35 = vperm.slane %v2417_v54, %v4813_v59 }
0x1c0d   :  { %v2402_v60 = vpop.xlane.xlu1 %2401 }
0x1c0e   :  { %v2418_v20 = vadd.f32 %v2402_v60, %v6092_v43 }
0x1c0f   :  { %v2408_v12 = vpop.xlane.xlu2 %2407 }
0x1c10   :  { %v2442_v32 = vperm.slane %v2418_v20, %v4816_v13  ;;  %v2405_v26 = vpop.xlane.xlu0 %2404  ;;  %v5516_v9 = vadd.f32 %v2408_v12, %v6092_v43 }
0x1c11   :  { %v2419_v51 = vadd.f32 %v2405_v26, %v6092_v43 }
0x1c12   :  { %v2443_v2 = vsel %vm684_vm7, %v2442_v32, %v2441_v35  ;;  %v2446_v39 = vperm.slane %v5516_v9, %v4824_v5  ;;  %v2436_v32 = vsel %vm688_vm8, %v2435_v3, %v2434_v63 }
0x1c13   :  { %v2444_v40 = vperm.slane %v2419_v51, %v4821_v1  ;;  %v2438_v21 = vsel %vm692_vm9, %v2437_v29, %v2436_v32 }
0x1c15   :  { %v2411_v28 = vpop.xlane.xlu1 %2410  ;;  %v2445_v45 = vsel %vm688_vm8, %v2444_v40, %v2443_v2 }
0x1c16   :  { %v2421_v58 = vadd.f32 %v2411_v28, %v6092_v43  ;;  %v2447_v35 = vsel %vm692_vm9, %v2446_v39, %v2445_v45 }
0x1c18   :  { %v2396_v60 = vpop.xlane.xlu0 %2395  ;;  %v2448_v26 = vperm.slane %v2421_v58, %v4827_v50 }
0x1c19   :  { %v2416_v12 = vadd.f32 %v2396_v60, %v6092_v43 }
0x1c1a   :  { %v2449_v40 = vsel %vm696_vm10, %v2448_v26, %v2447_v35 }
0x1c1b   :  { %v2439_v28 = vperm.slane %v2416_v12, %v4827_v50 }
0x1c1d   :  { %v2440_v19 = vsel %vm696_vm10, %v2439_v28, %v2438_v21 }
0x1c1e   :  { %v2450_v2 = vsel %vm707_vm11, %v2449_v40, %v2440_v19 }
0x1c1f   :  { %v2452_v27 = vsel %vm710_vm12, %v2450_v2, -inf }
0x1c20   :  { %2453 = vmax.xlane.f32.xlu2 %v2452_v27 }
0x1c93   :  { %v2454_v41 = vpop.xlane.xlu2 %2453 }
0x1c94   :  { %v2456_v38 = vperm.slane %v2454_v41, 0  ;;  %v2457_v3 = vperm.slane %v2454_v41, 1 }
0x1c96   :  { %v2460_v63 = vsub.f32 %v2412_v46, %v2456_v38  ;;  %v2461_v60 = vsub.f32 %v2413_v42, %v2456_v38  ;;  %v2465_v43 = vsub.f32 %v2417_v54, %v2457_v3  ;;  %v2467_v39 = vsub.f32 %v2419_v51, %v2457_v3 }
0x1c97   :  { %v2463_v26 = vsub.f32 %v2415_v33, %v2456_v38  ;;  %v2466_v29 = vsub.f32 %v2418_v20, %v2457_v3  ;;  %v2464_v41 = vsub.f32 %v2416_v12, %v2456_v38 }
0x1c98   :  { %v2472_v45 = vmul.f32 1.442695, %v2461_v60  ;;  %v2470_v17 = vmul.f32 1.442695, %v2460_v63  ;;  %v2480_v11 = vmul.f32 1.442695, %v2465_v43  ;;  %v2469_v43 = vsub.f32 %v2421_v58, %v2457_v3 }
0x1c99   :  { %v2484_v32 = vmul.f32 1.442695, %v2467_v39  ;;  %v2476_v28 = vmul.f32 1.442695, %v2463_v26  ;;  %v2482_v46 = vmul.f32 1.442695, %v2466_v29  ;;  %v2468_v58 = vsub.f32 %v5516_v9, %v2457_v3 }
0x1c9a   :  { %4119 = vpow2.f32 %v2472_v45  ;;  %v2488_v42 = vmul.f32 1.442695, %v2469_v43 }
0x1c9b   :  { %4121 = vpow2.f32 %v2480_v11  ;;  %v2462_v11 = vsub.f32 %v5507_v31, %v2456_v38  ;;  %v2486_v40 = vmul.f32 1.442695, %v2468_v58 }
0x1c9c   :  { %4123 = vpow2.f32 %v2470_v17  ;;  %v2478_v17 = vmul.f32 1.442695, %v2464_v41 }
0x1c9d   :  { %4125 = vpow2.f32 %v2484_v32  ;;  %v2474_v33 = vmul.f32 1.442695, %v2462_v11 }
0x1c9e   :  { %4127 = vpow2.f32 %v2476_v28 }
0x1c9f   :  { %4129 = vpow2.f32 %v2482_v46 }
0x1ca0   :  { %v5537_v35 = vpop.eup %4119  ;;  %4131 = vpow2.f32 %v2478_v17 }
0x1ca1   :  { %2504 = vperm.xlu1 %3987, %v5537_v35   ;;  %v5540_v27 = vpop.eup %4121  ;;  %4133 = vpow2.f32 %v2488_v42 }
0x1ca2   :  { %2516 = vperm.xlu2 %3989, %v5540_v27   ;;  %v5543_v54 = vpop.eup %4123  ;;  %4135 = vpow2.f32 %v2474_v33 }
0x1ca3   :  { %2501 = vperm.xlu0 %3988, %v5543_v54   ;;  %v5547_v20 = vpop.eup %4125  ;;  %4137 = vpow2.f32 %v2486_v40 }
0x1ca4   :  { %v5550_v51 = vpop.eup %4127 }
0x1ca5   :  { %v4130_v12 = vpop.eup %4129 }
0x1ca6   :  { %v5554_v38 = vpop.eup %4131 }
0x1ca7   :  { %v4134_v31 = vpop.eup %4133 }
0x1ca8   :  { %v4136_v21 = vpop.eup %4135 }
0x1ca9   :  { %2522 = vperm.xlu1 %3987, %v5547_v20   ;;  %v4138_v19 = vpop.eup %4137 }
0x1caa   :  { %2510 = vperm.xlu2 %3989, %v5550_v51  }
0x1cab   :  { %2519 = vperm.xlu0 %3988, %v4130_v12  }
0x1cb1   :  { %2513 = vperm.xlu1 %3987, %v5554_v38  }
0x1cb2   :  { %2528 = vperm.xlu2 %3989, %v4134_v31  }
0x1cb3   :  { %2507 = vperm.xlu0 %3988, %v4136_v21  }
0x1cbb   :  { %2525 = vperm.xlu0 %3988, %v4138_v19  }
0x1cfc   :  { %v2517_v63 = vpop.permute.xlu2 %2516 }
0x1cfd   :  { %v2539_v41 = vperm.slane %v2517_v63, %v4813_v59 }
0x1d04   :  { %v2511_v39 = vpop.permute.xlu2 %2510 }
0x1d05   :  { %v2535_v17 = vperm.slane %v2511_v39, %v4824_v5 }
0x1d0c   :  { %v2529_v42 = vpop.permute.xlu2 %2528 }
0x1d13   :  { %v2505_v60 = vpop.permute.xlu1 %2504 }
0x1d14   :  { %v2531_v3 = vperm.slane %v2505_v60, %v4816_v13 }
0x1d15   :  { %v2502_v2 = vpop.permute.xlu0 %2501 }
0x1d16   :  { %v2530_v29 = vperm.slane %v2502_v2, %v4813_v59 }
0x1d18   :  { %v2532_v46 = vsel %vm684_vm7, %v2531_v3, %v2530_v29 }
0x1d1b   :  { %v2523_v26 = vpop.permute.xlu1 %2522 }
0x1d1c   :  { %v2542_v43 = vperm.slane %v2523_v26, %v4821_v1 }
0x1d1d   :  { %v2520_v45 = vpop.permute.xlu0 %2519 }
0x1d1e   :  { %v2540_v28 = vperm.slane %v2520_v45, %v4816_v13  ;;  %v2546_v45 = vperm.slane %v2529_v42, %v4827_v50 }
0x1d20   :  { %v2541_v33 = vsel %vm684_vm7, %v2540_v28, %v2539_v41 }
0x1d23   :  { %v2514_v58 = vpop.permute.xlu1 %2513 }
0x1d24   :  { %v2537_v63 = vperm.slane %v2514_v58, %v4827_v50 }
0x1d25   :  { %v2508_v9 = vpop.permute.xlu0 %2507 }
0x1d26   :  { %v2533_v32 = vperm.slane %v2508_v9, %v4821_v1  ;;  %v2543_v9 = vsel %vm688_vm8, %v2542_v43, %v2541_v33 }
0x1d28   :  { %v2534_v11 = vsel %vm688_vm8, %v2533_v32, %v2532_v46 }
0x1d29   :  { %v2536_v60 = vsel %vm692_vm9, %v2535_v17, %v2534_v11 }
0x1d2a   :  { %v2538_v3 = vsel %vm696_vm10, %v2537_v63, %v2536_v60 }
0x1d2d   :  { %v2526_v40 = vpop.permute.xlu0 %2525 }
0x1d2e   :  { %v2544_v2 = vperm.slane %v2526_v40, %v4824_v5 }
0x1d30   :  { %v2545_v26 = vsel %vm692_vm9, %v2544_v2, %v2543_v9 }
0x1d31   :  { %v2547_v39 = vsel %vm696_vm10, %v2546_v45, %v2545_v26 }
0x1d32   :  { %v2548_v29 = vsel %vm707_vm11, %v2547_v39, %v2538_v3 }
0x1d33   :  { %v2550_v32 = vsel %vm710_vm12, %v2548_v29, 0.0 }
0x1d34   :  { %2551 = vadd.xlane.f32.xlu0 %v2550_v32 }
0x1da7   :  { %v2552_v28 = vpop.xlane.xlu0 %2551 }
0x1da8   :  { %4139 = vrcp.f32 %v2552_v28 }
0x1dae   :  { %v4140_v41 = vpop.eup %4139 }
0x1daf   :  { %v2555_v46 = vperm.slane %v4140_v41, 0  ;;  %v2556_v43 = vperm.slane %v4140_v41, 1 }
0x1db1   :  { %v2560_v11 = vmul.f32 %v5537_v35, %v2555_v46  ;;  %v2559_v17 = vmul.f32 %v5543_v54, %v2555_v46  ;;  %v2565_v42 = vmul.f32 %v4130_v12, %v2556_v43  ;;  %v2564_v33 = vmul.f32 %v5540_v27, %v2556_v43 }
0x1db2   :  { %v2566_v58 = vmul.f32 %v5547_v20, %v2556_v43  ;;  %v2561_v40 = vmul.f32 %v4136_v21, %v2555_v46  ;;  %v2567_v2 = vmul.f32 %v4138_v19, %v2556_v43  ;;  %v2562_v60 = vmul.f32 %v5550_v51, %v2555_v46 }
0x1db3   :  { %2576 = vperm.xlu2 %3989, %v2560_v11   ;;  %2571 = vperm.xlu1 %3987, %v2559_v17   ;;  %v2568_v35 = vmul.f32 %v4134_v31, %v2556_v43  ;;  %v2563_v54 = vmul.f32 %v5554_v38, %v2555_v46 }
0x1dbb   :  { %2601 = vperm.xlu2 %3989, %v2565_v42   ;;  %2596 = vperm.xlu1 %3987, %v2564_v33  }
0x1dc3   :  { %2606 = vperm.xlu2 %3989, %v2566_v58   ;;  %2581 = vperm.xlu1 %3987, %v2561_v40  }
0x1dcb   :  { %2611 = vperm.xlu2 %3989, %v2567_v2   ;;  %2586 = vperm.xlu1 %3987, %v2562_v60  }
0x1dd3   :  { %2616 = vperm.xlu2 %3989, %v2568_v35   ;;  %2591 = vperm.xlu1 %3987, %v2563_v54  }
0x1e0d   :  { %v2577_v12 = vpop.permute.xlu2 %2576 }
0x1e0e   :  { %v2620_v58 = vmul.f32 %v2577_v12, %v4581_v53 }
0x1e10   :  { %v2630_v54 = vsel %vm141_vm0, %v2620_v58, 0.0  ;;  %v4252_v58 = vld [vmem:[#allocation10] sm:$0xff] }
0x1e15   :  { %v2602_v45 = vpop.permute.xlu2 %2601 }
0x1e16   :  { %v2625_v20 = vmul.f32 %v2602_v45, %v4616_v0 }
0x1e18   :  { %v2645_v19 = vsel %vm141_vm0, %v2625_v20, 0.0 }
0x1e1d   :  { %v2607_v27 = vpop.permute.xlu2 %2606 }
0x1e1e   :  { %v2626_v51 = vmul.f32 %v2607_v27, %v4625_v4 }
0x1e20   :  { %v2647_v38 = vsel %vm141_vm0, %v2626_v51, 0.0 }
0x1e25   :  { %v2572_v63 = vpop.permute.xlu1 %2571  ;;  %v2612_v9 = vpop.permute.xlu2 %2611 }
0x1e26   :  { %v2627_v39 = vmul.f32 %v2612_v9, %v4633_v7  ;;  %v2619_v17 = vmul.f32 %v2572_v63, %v4576_v52 }
0x1e28   :  { %v2649_v41 = vsel %vm141_vm0, %v2627_v39, 0.0  ;;  %v2629_v2 = vsel %vm141_vm0, %v2619_v17, 0.0 }
0x1e29   :  { %v2631_v27 = vadd.f32 %v2630_v54, %v2629_v2 }
0x1e2d   :  { %v2597_v21 = vpop.permute.xlu1 %2596  ;;  %v2617_v29 = vpop.permute.xlu2 %2616 }
0x1e2e   :  { %v2624_v26 = vmul.f32 %v2597_v21, %v4609_v62  ;;  %v2628_v46 = vmul.f32 %v2617_v29, %v4663_v23 }
0x1e30   :  { %v2644_v31 = vsel %vm141_vm0, %v2624_v26, 0.0  ;;  %v2651_v43 = vsel %vm634_vm6, %v2628_v46, 0.0 }
0x1e31   :  { %v2646_v3 = vadd.f32 %v2645_v19, %v2644_v31 }
0x1e33   :  { %v2648_v32 = vadd.f32 %v2647_v38, %v2646_v3 }
0x1e35   :  { %v2582_v28 = vpop.permute.xlu1 %2581  ;;  %v2650_v11 = vadd.f32 %v2649_v41, %v2648_v32 }
0x1e36   :  { %v2621_v40 = vmul.f32 %v2582_v28, %v4589_v56 }
0x1e37   :  { %v2652_v42 = vadd.f32 %v2651_v43, %v2650_v11  ;;  %v4249_v43 = vld [vmem:[#allocation10 + $0x18] sm:$0xff] }
0x1e38   :  { %v2632_v45 = vsel %vm141_vm0, %v2621_v40, 0.0  ;;  %v2676_v40 = vpop.f32.mrf.mxu2 }
0x1e39   :  { %v2653_v35 = vrot.slane %v2652_v42, 4  ;;  %v2633_v20 = vadd.f32 %v2632_v45, %v2631_v27 }
0x1e3b   :  { %v2654_v9 = vadd.f32 %v2653_v35, %v2652_v42  ;;  %v4250_v42 = vld [vmem:[#allocation10 + $0x10] sm:$0xff] }
0x1e3d   :  { %v2587_v33 = vpop.permute.xlu1 %2586  ;;  %v2655_v51 = vrot.slane %v2654_v9, 2 }
0x1e3e   :  { %v2622_v60 = vmul.f32 %v2587_v33, %v4594_v57  ;;  %v4251_v33 = vld [vmem:[#allocation10 + $0x8] sm:$0xff] }
0x1e3f   :  { %v2656_v39 = vadd.f32 %v2655_v51, %v2654_v9 }
0x1e40   :  { %v2634_v63 = vsel %vm141_vm0, %v2622_v60, 0.0 }
0x1e41   :  { %v2635_v12 = vadd.f32 %v2634_v63, %v2633_v20  ;;  %v2657_v28 = vrot.slane %v2656_v39, 1 }
0x1e43   :  { %v2658_v11 = vadd.f32 %v2657_v28, %v2656_v39 }
0x1e45   :  { %v2592_v21 = vpop.permute.xlu1 %2591 }
0x1e46   :  { %v2623_v26 = vmul.f32 %v2592_v21, %v4604_v61 }
0x1e48   :  { %v2636_v19 = vsel %vm634_vm6, %v2623_v26, 0.0 }
0x1e49   :  { %v2637_v31 = vadd.f32 %v2636_v19, %v2635_v12 }
0x1e4b   :  { %v2638_v3 = vrot.slane %v2637_v31, 4 }
0x1e4d   :  { %v2639_v38 = vadd.f32 %v2638_v3, %v2637_v31 }
0x1e4f   :  { %v2640_v29 = vrot.slane %v2639_v38, 2 }
0x1e51   :  { %v2641_v32 = vadd.f32 %v2640_v29, %v2639_v38 }
0x1e53   :  { %v2642_v41 = vrot.slane %v2641_v32, 1 }
0x1e55   :  { %v2643_v46 = vadd.f32 %v2642_v41, %v2641_v32 }
0x1e57   :  { %v2681_v17 = vsel %vm707_vm11, %v2658_v11, %v2643_v46 }
0x1e58   :  { %3962 = vmatmul.msk.f32.vlgmr.msra.gmra.mxu0 %vm141_vm0, %v2681_v17 }
0x1e59   :  { %3405 = vmatpush.msra.mxu0 %v4249_v43  ;;  %v4254_v43 = vld [vmem:[%s5982_s15 + $0x30] sm:$0xff] }
0x1e5b   :  { %3406 = vmatpush.msra.mxu0 %v4250_v42  ;;  %v4255_v42 = vld [vmem:[%s5982_s15 + $0x28] sm:$0xff] }
0x1e5d   :  { %3407 = vmatpush.msra.mxu0 %v4251_v33  ;;  %v4256_v33 = vld [vmem:[%s5982_s15 + $0x20] sm:$0xff] }
0x1e5f   :  { %3408 = vmatpush.msra.mxu0 %v4252_v58 }
0x1ed5   :  { %v2701_v2 = vpop.f32.mrf.mxu0 }
0x1ed6   :  { %v2702_v60 = vadd.f32 %v2701_v2, %v2676_v40  ;;  %v2770_v2 = vld [vmem:[#allocation2 + $0x8] sm:$0x3] }
0x1ed8   :  { %v2704_v35 = vadd.f32 %v5405_v37, %v2702_v60 }
0x1eda   :  { %4141 = vtanh.f32 %v2704_v35  ;;  %v3963_v45 = vmul.f32 -1.442695, %v2704_v35 }
0x1edc   :  { %4143 = vpow2.f32 %v3963_v45 }
0x1ee0   :  { %v4142_v54 = vpop.eup %4141 }
0x1ee1   :  { %2727 = vrot.lane.b32.xlu1 %v4142_v54, %s4398_s30 }
0x1ee2   :  { %v4144_v27 = vpop.eup %4143 }
0x1ee3   :  { %v2708_v63 = vadd.f32 1.0, %v4144_v27 }
0x1ee5   :  { %4145 = vrcp.f32 %v2708_v63  ;;  %v2720_v19 = vand.u32 2147483648, %v2708_v63  ;;  %vm2714_vm3 = vweird.f32 %v2708_v63  ;;  %v2718_v51 = vand.u32 2147483647, %v2708_v63 }
0x1ee7   :  { %v2721_v31 = vor.u32 1.1754944e-38, %v2720_v19  ;;  %vm2719_vm5 = vcmp.eq.f32.partialorder %v2718_v51, 8.507059e+37 }
0x1eeb   :  { %v4146_v9 = vpop.eup %4145 }
0x1eec   :  { %v2710_v20 = vmul.f32 %v4146_v9, %v2708_v63  ;;  %vm2715_vm1 = vweird.f32 %v4146_v9 }
0x1eed   :  { %vm2716_vm4 = vmor %vm2714_vm3, %vm2715_vm1 }
0x1eee   :  { %v2711_v21 = vsub.f32 1.0, %v2710_v20 }
0x1ef0   :  { %v2712_v26 = vmul.f32 %v4146_v9, %v2711_v21 }
0x1ef2   :  { %v2713_v12 = vadd.f32 %v4146_v9, %v2712_v26 }
0x1ef4   :  { %v2717_v37 = vsel %vm2716_vm4, %v4146_v9, %v2713_v12 }
0x1ef5   :  { %v2722_v38 = vsel %vm2719_vm5, %v2721_v31, %v2717_v37 }
0x1ef6   :  { %v2725_v29 = vmul.f32 %v2722_v38, %v5411_v36  ;;  %v4253_v36 = vld [vmem:[%s5982_s15 + $0x38] sm:$0xff] }
0x1f53   :  { %v2728_v3 = vpop.permute.xlu1 %2727 }
0x1f54   :  { %v2730_v39 = vmul.f32 %v2728_v3, %v2722_v38 }
0x1f56   :  { %2732 = vrot.lane.b32.xlu0 %v2730_v39, %s4399_s4 }
0x1fc8   :  { %v2733_v32 = vpop.permute.xlu0 %2732 }
0x1fc9   :  { %v5609_v28 = vadd.f32 %v2733_v32, %v2725_v29 }
0x1fcb   :  { %4147 = vtanh.f32 %v5609_v28 }
0x1fd1   :  { %v4148_v41 = vpop.eup %4147 }
0x1fd2   :  { %2738 = vrot.lane.b32.xlu2 %v4148_v41, %s4398_s30 }
0x202c   :  { %v2739_v46 = vpop.permute.xlu2 %2738 }
0x202d   :  { %v2741_v11 = vmul.f32 %v2739_v46, %v2722_v38 }
0x202f   :  { %2743 = vrot.lane.b32.xlu1 %v2741_v11, %s4399_s4 }
0x20a1   :  { %v2744_v17 = vpop.permute.xlu1 %2743 }
0x20a2   :  { %2747 = vst.msk [vmem:[#allocation12 + $0x6] sm:$0x3] %vm1009_vm2, %v2744_v17  ;;  %3964 = vmatmul.msk.f32.vlgmr.msra.gmra.mxu1 %vm141_vm0, %v2744_v17 }
0x20a3   :  { %3829 = vmatpush.msra.mxu1 %v4253_v36  ;;  %v4258_v36 = vld [vmem:[%s5982_s15 + $0x10] sm:$0xff] }
0x20a5   :  { %3830 = vmatpush.msra.mxu1 %v4254_v43  ;;  %v4259_v43 = vld [vmem:[%s5982_s15 + $0x8] sm:$0xff] }
0x20a7   :  { %3831 = vmatpush.msra.mxu1 %v4255_v42  ;;  %v4260_v42 = vld [vmem:[%s5982_s15] sm:$0xff] }
0x20a9   :  { %3832 = vmatpush.msra.mxu1 %v4256_v33 }
0x211f   :  { %v2767_v58 = vpop.f32.mrf.mxu1 }
0x2120   :  { %v2768_v40 = vadd.f32 %v2767_v58, %v4564_v24  ;;  %v5654_v58 = vld [vmem:[%s5979_s12] ss:$0 sm:$0xff] }
0x2122   :  { %v2771_v60 = vadd.f32 %v2770_v2, %v2768_v40 }
0x2124   :  { %4149 = vtanh.f32 %v2771_v60  ;;  %v3965_v54 = vmul.f32 -1.442695, %v2771_v60 }
0x2126   :  { %4151 = vpow2.f32 %v3965_v54 }
0x212a   :  { %v4150_v35 = vpop.eup %4149 }
0x212b   :  { %2794 = vrot.lane.b32.xlu2 %v4150_v35, %s4398_s30 }
0x212c   :  { %v4152_v45 = vpop.eup %4151 }
0x212d   :  { %v2775_v27 = vadd.f32 1.0, %v4152_v45 }
0x212f   :  { %4153 = vrcp.f32 %v2775_v27  ;;  %v2787_v12 = vand.u32 2147483648, %v2775_v27  ;;  %vm2781_vm14 = vweird.f32 %v2775_v27  ;;  %v2785_v19 = vand.u32 2147483647, %v2775_v27 }
0x2131   :  { %v2788_v37 = vor.u32 1.1754944e-38, %v2787_v12  ;;  %vm2786_vm1 = vcmp.eq.f32.partialorder %v2785_v19, 8.507059e+37 }
0x2135   :  { %v4154_v63 = vpop.eup %4153 }
0x2136   :  { %v2777_v9 = vmul.f32 %v4154_v63, %v2775_v27  ;;  %vm2782_vm13 = vweird.f32 %v4154_v63 }
0x2137   :  { %vm2783_vm15 = vmor %vm2781_vm14, %vm2782_vm13 }
0x2138   :  { %v2778_v20 = vsub.f32 1.0, %v2777_v9 }
0x213a   :  { %v2779_v21 = vmul.f32 %v4154_v63, %v2778_v20 }
0x213c   :  { %v2780_v26 = vadd.f32 %v4154_v63, %v2779_v21 }
0x213e   :  { %v2784_v51 = vsel %vm2783_vm15, %v4154_v63, %v2780_v26 }
0x213f   :  { %v2789_v3 = vsel %vm2786_vm1, %v2788_v37, %v2784_v51 }
0x2140   :  { %v2792_v39 = vmul.f32 %v2789_v3, %v5426_v10  ;;  %v4257_v10 = vld [vmem:[%s5982_s15 + $0x18] sm:$0xff] }
0x2185   :  { %v2795_v31 = vpop.permute.xlu2 %2794 }
0x2186   :  { %v2797_v38 = vmul.f32 %v2795_v31, %v2789_v3 }
0x2188   :  { %2799 = vrot.lane.b32.xlu1 %v2797_v38, %s4399_s4 }
0x21fa   :  { %v2800_v29 = vpop.permute.xlu1 %2799 }
0x21fb   :  { %v5632_v32 = vadd.f32 %v2800_v29, %v2792_v39 }
0x21fd   :  { %4155 = vtanh.f32 %v5632_v32 }
0x2203   :  { %v4156_v41 = vpop.eup %4155 }
0x2204   :  { %2805 = vrot.lane.b32.xlu2 %v4156_v41, %s4398_s30 }
0x225e   :  { %v2806_v46 = vpop.permute.xlu2 %2805 }
0x225f   :  { %v2808_v11 = vmul.f32 %v2806_v46, %v2789_v3 }
0x2261   :  { %2810 = vrot.lane.b32.xlu0 %v2808_v11, %s4399_s4 }
0x22d3   :  { %v2811_v17 = vpop.permute.xlu0 %2810 }
0x22d4   :  { %3966 = vmatmul.msk.f32.vlgmr.msra.gmra.mxu2 %vm141_vm0, %v2811_v17  ;;  %3967 = vmatmul.msk.f32.vlgmr.msrb.gmra.mxu0 %vm141_vm0, %v2811_v17 }
0x22d5   :  { %3854 = vmatpush.msra.mxu2 %v4257_v10 }
0x22d7   :  { %3855 = vmatpush.msra.mxu2 %v4258_v36 }
0x22d9   :  { %3856 = vmatpush.msra.mxu2 %v4259_v43 }
0x22db   :  { %3857 = vmatpush.msra.mxu2 %v4260_v42 }
0x2357   :  { %v2831_v33 = vpop.f32.mrf.mxu2 }
0x2358   :  { %v2832_v40 = vadd.f32 %v5654_v58, %v2831_v33 }
0x235a   :  { %v2836_v2 = vperm.slane %v2832_v40, 0  ;;  %v2835_v35 = vrot.slane %v2832_v40, 1 }
0x235c   :  { %v2840_v60 = vrot.slane %v2836_v2, 4  ;;  %v2844_v54 = vadd.f32 %v2836_v2, %v4713_v14  ;;  %v2846_v27 = vadd.f32 %v2836_v2, %v4715_v16  ;;  %v2848_v9 = vadd.f32 %v2836_v2, %v6077_v47 }
0x235d   :  { %v2837_v20 = vperm.slane %v2835_v35, 0  ;;  %v2850_v26 = vadd.f32 %v2836_v2, %v6079_v49  ;;  %v2852_v17 = vadd.f32 %v2836_v2, %v6082_v22 }
0x235e   :  { %v2845_v45 = vadd.f32 %v2840_v60, %v4723_v48  ;;  %v2847_v63 = vadd.f32 %v2840_v60, %v6076_v34  ;;  %v2849_v21 = vadd.f32 %v2840_v60, %v6078_v44  ;;  %v2862_v12 = vmax.f32 %v2844_v54, 0.0 }
0x235f   :  { %v2864_v51 = vmax.f32 %v2846_v27, 0.0  ;;  %v2851_v37 = vadd.f32 %v2840_v60, %v6080_v6  ;;  %v2866_v3 = vmax.f32 %v2848_v9, 0.0  ;;  %v2841_v38 = vrot.slane %v2837_v20, 4  ;;  %v6093_v27 = vld [vmem:[#allocation30_spill] sm:$0xff] }
0x2360   :  { %v2863_v19 = vmax.f32 %v2845_v45, 0.0  ;;  %v2865_v31 = vmax.f32 %v2847_v63, 0.0  ;;  %v2867_v39 = vmax.f32 %v2849_v21, 0.0  ;;  %v2868_v29 = vmax.f32 %v2850_v26, 0.0  ;;  %v6094_v21 = vld [vmem:[#allocation29_spill] sm:$0xff] }
0x2361   :  { %v2880_v41 = vmul.f32 %v5461_v18, %v2862_v12  ;;  %v2882_v11 = vmul.f32 %v5461_v18, %v2864_v51  ;;  %v2869_v10 = vmax.f32 %v2851_v37, 0.0  ;;  %v2884_v43 = vmul.f32 %v5461_v18, %v2866_v3  ;;  %v6096_v3 = vld [vmem:[#allocation31_spill] sm:$0xff] }
0x2362   :  { %v2881_v46 = vmul.f32 %v2863_v19, %v6081_v55  ;;  %v2883_v36 = vmul.f32 %v2865_v31, %v6081_v55  ;;  %v2853_v42 = vadd.f32 %v2837_v20, %v6083_v30  ;;  %v2885_v33 = vmul.f32 %v2867_v39, %v6081_v55  ;;  %v6095_v19 = vld [vmem:[#allocation32_spill] sm:$0xff] }
0x2363   :  { %2916 = vst [vmem:[#allocation1] ss:$2 sm:$0xff] %v2880_v41  ;;  %v2854_v40 = vadd.f32 %v2841_v38, %v6084_v15  ;;  %v2886_v60 = vmul.f32 %v5461_v18, %v2868_v29  ;;  %v2855_v35 = vadd.f32 %v2837_v20, %v6085_v8  ;;  %v2870_v54 = vmax.f32 %v2852_v17, 0.0 }
0x2364   :  { %2918 = vst [vmem:[#allocation1 + $0x1] ss:$2 sm:$0xff] %v2881_v46  ;;  %v2887_v2 = vmul.f32 %v2869_v10, %v6081_v55  ;;  %v2856_v45 = vadd.f32 %v2841_v38, %v6086_v25  ;;  %v2857_v63 = vadd.f32 %v2837_v20, %v6093_v27  ;;  %v2871_v9 = vmax.f32 %v2853_v42, 0.0  ;;  %v6097_v10 = vld [vmem:[#allocation33_spill] sm:$0xff] }
0x2365   :  { %2920 = vst [vmem:[#allocation1 + $0x10] ss:$2 sm:$0xff] %v2882_v11  ;;  %v2858_v26 = vadd.f32 %v2841_v38, %v6094_v21  ;;  %v2872_v12 = vmax.f32 %v2854_v40, 0.0  ;;  %v2859_v51 = vadd.f32 %v2837_v20, %v6095_v19  ;;  %v2873_v37 = vmax.f32 %v2855_v35, 0.0 }
0x2366   :  { %2922 = vst [vmem:[#allocation1 + $0x11] ss:$2 sm:$0xff] %v2883_v36  ;;  %v2888_v31 = vmul.f32 %v5461_v18, %v2870_v54  ;;  %v2860_v39 = vadd.f32 %v2841_v38, %v6096_v3  ;;  %v2874_v29 = vmax.f32 %v2856_v45, 0.0  ;;  %v2875_v46 = vmax.f32 %v2857_v63, 0.0 }
0x2367   :  { %2924 = vst [vmem:[#allocation1 + $0x20] ss:$2 sm:$0xff] %v2884_v43  ;;  %v2889_v11 = vmul.f32 %v5461_v18, %v2871_v9  ;;  %v2861_v36 = vadd.f32 %v2837_v20, %v6097_v10  ;;  %v2876_v43 = vmax.f32 %v2858_v26, 0.0  ;;  %v2890_v42 = vmul.f32 %v2872_v12, %v6081_v55 }
0x2368   :  { %2926 = vst [vmem:[#allocation1 + $0x21] ss:$2 sm:$0xff] %v2885_v33  ;;  %v2877_v40 = vmax.f32 %v2859_v51, 0.0  ;;  %v2878_v35 = vmax.f32 %v2860_v39, 0.0  ;;  %v2892_v54 = vmul.f32 %v2874_v29, %v6081_v55  ;;  %v2893_v45 = vmul.f32 %v5461_v18, %v2875_v46 }
0x2369   :  { %2928 = vst [vmem:[#allocation1 + $0x30] ss:$2 sm:$0xff] %v2886_v60  ;;  %v2891_v60 = vmul.f32 %v5461_v18, %v2873_v37  ;;  %v2879_v20 = vmax.f32 %v2861_v36, 0.0  ;;  %v2894_v63 = vmul.f32 %v2876_v43, %v6081_v55 }
0x236a   :  { %2930 = vst [vmem:[#allocation1 + $0x31] ss:$2 sm:$0xff] %v2887_v2  ;;  %v2895_v26 = vmul.f32 %v5461_v18, %v2877_v40  ;;  %v2896_v12 = vmul.f32 %v2878_v35, %v6081_v55 }
0x236b   :  { %v2931_v41 = vld.sshfl [vmem:[#allocation1] sm:$0xff pattern:$0x75316420] }
0x236c   :  { %v2961_v17 = vsel %vm141_vm0, %v2931_v41, 0.0  ;;  %2935 = vst [vmem:[#allocation1] ss:$2 sm:$0xff] %v2888_v31  ;;  %v2897_v31 = vmul.f32 %v5461_v18, %v2879_v20  ;;  %v6098_v20 = vld [vmem:[#allocation35_spill] sm:$0xff] }
0x236d   :  { %v2932_v33 = vld.sshfl [vmem:[#allocation1 + $0x10] sm:$0xff pattern:$0x75316420]  ;;  %2962 = vadd.xlane.f32.xlu1 %v2961_v17 }
0x236e   :  { %v2964_v38 = vsel %vm141_vm0, %v2932_v33, 0.0  ;;  %2937 = vst [vmem:[#allocation1 + $0x10] ss:$2 sm:$0xff] %v2889_v11 }
0x236f   :  { %2965 = vadd.xlane.f32.xlu2 %v2964_v38  ;;  %2938 = vst [vmem:[#allocation1 + $0x11] ss:$2 sm:$0xff] %v2890_v42  ;;  %v2933_v2 = vld.sshfl [vmem:[#allocation1 + $0x20] sm:$0xff pattern:$0x75316420] }
0x2370   :  { %2939 = vst [vmem:[#allocation1 + $0x20] ss:$2 sm:$0xff] %v2891_v60  ;;  %v2967_v39 = vsel %vm141_vm0, %v2933_v2, 0.0 }
0x2371   :  { %2940 = vst [vmem:[#allocation1 + $0x21] ss:$2 sm:$0xff] %v2892_v54  ;;  %v2934_v9 = vld.sshfl [vmem:[#allocation1 + $0x30] sm:$0xff pattern:$0x75316420] }
0x2372   :  { %2941 = vst [vmem:[#allocation1 + $0x30] ss:$2 sm:$0xff] %v2893_v45  ;;  %v2970_v37 = vsel %vm141_vm0, %v2934_v9, 0.0 }
0x2373   :  { %v2936_v51 = vld.sshfl [vmem:[#allocation1] sm:$0xff pattern:$0x75316420]  ;;  %2942 = vst [vmem:[#allocation1 + $0x31] ss:$2 sm:$0xff] %v2894_v63 }
0x2374   :  { %2946 = vst [vmem:[#allocation1] ss:$2 sm:$0xff] %v2895_v26  ;;  %v2973_v40 = vsel %vm634_vm6, %v2936_v51, 0.0 }
0x2375   :  { %2947 = vst [vmem:[#allocation1 + $0x1] ss:$2 sm:$0xff] %v2896_v12  ;;  %2971 = vadd.xlane.f32.xlu1 %v2970_v37 }
0x2376   :  { %v2943_v29 = vld.sshfl [vmem:[#allocation1 + $0x10] sm:$0xff pattern:$0x75316420] }
0x2377   :  { %2968 = vadd.xlane.f32.xlu2 %v2967_v39  ;;  %v2976_v41 = vsel %vm141_vm0, %v2943_v29, 0.0  ;;  %2948 = vst [vmem:[#allocation1 + $0x10] ss:$2 sm:$0xff] %v2897_v31 }
0x2378   :  { %2977 = vadd.xlane.f32.xlu0 %v2976_v41  ;;  %v2944_v46 = vld.sshfl [vmem:[#allocation1 + $0x20] sm:$0xff pattern:$0x75316420] }
0x2379   :  { %v2979_v11 = vsel %vm141_vm0, %v2944_v46, 0.0 }
0x237a   :  { %v2945_v36 = vld.sshfl [vmem:[#allocation1 + $0x30] sm:$0xff pattern:$0x75316420] }
0x237b   :  { %v2982_v18 = vsel %vm141_vm0, %v2945_v36, 0.0 }
0x237c   :  { %v2949_v17 = vld.sshfl [vmem:[#allocation1] sm:$0xff pattern:$0x75316420] }
0x237d   :  { %v2985_v43 = vsel %vm141_vm0, %v2949_v17, 0.0  ;;  %2980 = vadd.xlane.f32.xlu1 %v2979_v11 }
0x237e   :  { %v2950_v42 = vld.sshfl [vmem:[#allocation1 + $0x10] sm:$0xff pattern:$0x75316420] }
0x237f   :  { %2986 = vadd.xlane.f32.xlu2 %v2985_v43  ;;  %v2988_v33 = vsel %vm634_vm6, %v2950_v42, 0.0 }
0x2380   :  { %2983 = vadd.xlane.f32.xlu0 %v2982_v18 }
0x2385   :  { %2989 = vadd.xlane.f32.xlu1 %v2988_v33 }
0x2388   :  { %2974 = vadd.xlane.f32.xlu0 %v2973_v40 }
0x23e0   :  { %v2963_v60 = vpop.xlane.xlu1 %2962 }
0x23e1   :  { %v2991_v26 = vadd.f32 %v2963_v60, %v6098_v20 }
0x23e2   :  { %v2966_v38 = vpop.xlane.xlu2 %2965 }
0x23e3   :  { %v2992_v12 = vadd.f32 %v2966_v38, %v6098_v20  ;;  %v3011_v46 = vperm.slane %v2991_v26, %v4813_v59 }
0x23e5   :  { %v3012_v17 = vperm.slane %v2992_v12, %v4816_v13 }
0x23e7   :  { %v3013_v38 = vsel %vm684_vm7, %v3012_v17, %v3011_v46 }
0x23e8   :  { %v2972_v35 = vpop.xlane.xlu1 %2971 }
0x23e9   :  { %v2994_v36 = vadd.f32 %v2972_v35, %v6098_v20 }
0x23ea   :  { %v2969_v54 = vpop.xlane.xlu2 %2968 }
0x23eb   :  { %v2978_v2 = vpop.xlane.xlu0 %2977  ;;  %v2993_v51 = vadd.f32 %v2969_v54, %v6098_v20  ;;  %v3016_v54 = vperm.slane %v2994_v36, %v4824_v5 }
0x23ec   :  { %v2996_v63 = vadd.f32 %v2978_v2, %v6098_v20 }
0x23ed   :  { %v3014_v42 = vperm.slane %v2993_v51, %v4821_v1 }
0x23ee   :  { %v3020_v41 = vperm.slane %v2996_v63, %v4813_v59 }
0x23f0   :  { %v2981_v45 = vpop.xlane.xlu1 %2980 }
0x23f1   :  { %v2997_v9 = vadd.f32 %v2981_v45, %v6098_v20 }
0x23f2   :  { %v2987_v39 = vpop.xlane.xlu2 %2986 }
0x23f3   :  { %v3021_v37 = vperm.slane %v2997_v9, %v4816_v13  ;;  %v2984_v31 = vpop.xlane.xlu0 %2983  ;;  %v2999_v43 = vadd.f32 %v2987_v39, %v6098_v20 }
0x23f4   :  { %v2998_v29 = vadd.f32 %v2984_v31, %v6098_v20  ;;  %v3015_v31 = vsel %vm688_vm8, %v3014_v42, %v3013_v38 }
0x23f5   :  { %v3022_v18 = vsel %vm684_vm7, %v3021_v37, %v3020_v41  ;;  %v3025_v2 = vperm.slane %v2999_v43, %v4824_v5 }
0x23f6   :  { %v3023_v11 = vperm.slane %v2998_v29, %v4821_v1 }
0x23f8   :  { %v2990_v33 = vpop.xlane.xlu1 %2989  ;;  %v3024_v60 = vsel %vm688_vm8, %v3023_v11, %v3022_v18  ;;  %v3017_v11 = vsel %vm692_vm9, %v3016_v54, %v3015_v31 }
0x23f9   :  { %v3000_v40 = vadd.f32 %v2990_v33, %v6098_v20  ;;  %v3026_v39 = vsel %vm692_vm9, %v3025_v2, %v3024_v60 }
0x23fb   :  { %v2975_v45 = vpop.xlane.xlu0 %2974  ;;  %v3027_v35 = vperm.slane %v3000_v40, %v4827_v50 }
0x23fc   :  { %v2995_v37 = vadd.f32 %v2975_v45, %v6098_v20 }
0x23fd   :  { %v3028_v33 = vsel %vm696_vm10, %v3027_v35, %v3026_v39 }
0x23fe   :  { %v3018_v41 = vperm.slane %v2995_v37, %v4827_v50 }
0x2400   :  { %v3019_v46 = vsel %vm696_vm10, %v3018_v41, %v3017_v11 }
0x2401   :  { %v3029_v17 = vsel %vm707_vm11, %v3028_v33, %v3019_v46 }
0x2402   :  { %v3031_v18 = vsel %vm710_vm12, %v3029_v17, -inf }
0x2403   :  { %3032 = vmax.xlane.f32.xlu2 %v3031_v18 }
0x2476   :  { %v3033_v10 = vpop.xlane.xlu2 %3032 }
0x2477   :  { %v3035_v3 = vperm.slane %v3033_v10, 0  ;;  %v3036_v42 = vperm.slane %v3033_v10, 1 }
0x2479   :  { %v3039_v38 = vsub.f32 %v2991_v26, %v3035_v3  ;;  %v3040_v45 = vsub.f32 %v2992_v12, %v3035_v3  ;;  %v3044_v20 = vsub.f32 %v2996_v63, %v3036_v42  ;;  %v3045_v19 = vsub.f32 %v2997_v9, %v3036_v42 }
0x247a   :  { %v3041_v35 = vsub.f32 %v2993_v51, %v3035_v3  ;;  %v3046_v39 = vsub.f32 %v2998_v29, %v3036_v42  ;;  %v3042_v10 = vsub.f32 %v2994_v36, %v3035_v3  ;;  %v3047_v63 = vsub.f32 %v2999_v43, %v3036_v42 }
0x247b   :  { %v3049_v60 = vmul.f32 1.442695, %v3039_v38  ;;  %v3051_v2 = vmul.f32 1.442695, %v3040_v45  ;;  %v3059_v54 = vmul.f32 1.442695, %v3044_v20  ;;  %v3048_v46 = vsub.f32 %v3000_v40, %v3036_v42 }
0x247c   :  { %v3061_v31 = vmul.f32 1.442695, %v3045_v19  ;;  %v3053_v41 = vmul.f32 1.442695, %v3041_v35  ;;  %v3063_v9 = vmul.f32 1.442695, %v3046_v39  ;;  %v3043_v19 = vsub.f32 %v2995_v37, %v3035_v3 }
0x247d   :  { %4157 = vpow2.f32 %v3049_v60  ;;  %v3055_v20 = vmul.f32 1.442695, %v3042_v10  ;;  %v3065_v12 = vmul.f32 1.442695, %v3047_v63  ;;  %v3067_v17 = vmul.f32 1.442695, %v3048_v46 }
0x247e   :  { %4159 = vpow2.f32 %v3051_v2  ;;  %v3057_v36 = vmul.f32 1.442695, %v3043_v19 }
0x247f   :  { %4161 = vpow2.f32 %v3059_v54 }
0x2480   :  { %4163 = vpow2.f32 %v3061_v31 }
0x2481   :  { %4165 = vpow2.f32 %v3053_v41 }
0x2482   :  { %4167 = vpow2.f32 %v3063_v9 }
0x2483   :  { %v5733_v33 = vpop.eup %4157  ;;  %4169 = vpow2.f32 %v3055_v20 }
0x2484   :  { %v5735_v11 = vpop.eup %4159  ;;  %3080 = vperm.xlu0 %3988, %v5733_v33   ;;  %4171 = vpow2.f32 %v3065_v12 }
0x2485   :  { %3083 = vperm.xlu1 %3987, %v5735_v11   ;;  %v5739_v26 = vpop.eup %4161  ;;  %4173 = vpow2.f32 %v3057_v36 }
0x2486   :  { %3095 = vperm.xlu2 %3989, %v5739_v26   ;;  %v4164_v51 = vpop.eup %4163  ;;  %4175 = vpow2.f32 %v3067_v17 }
0x2487   :  { %v5742_v29 = vpop.eup %4165 }
0x2488   :  { %v4168_v43 = vpop.eup %4167 }
0x2489   :  { %v4170_v18 = vpop.eup %4169 }
0x248a   :  { %v4172_v38 = vpop.eup %4171 }
0x248b   :  { %v4174_v3 = vpop.eup %4173 }
0x248c   :  { %3098 = vperm.xlu0 %3988, %v4164_v51   ;;  %v4176_v37 = vpop.eup %4175 }
0x248d   :  { %3086 = vperm.xlu1 %3987, %v5742_v29  }
0x248e   :  { %3101 = vperm.xlu2 %3989, %v4168_v43  }
0x2494   :  { %3089 = vperm.xlu0 %3988, %v4170_v18  }
0x2495   :  { %3104 = vperm.xlu1 %3987, %v4172_v38  }
0x2496   :  { %3092 = vperm.xlu2 %3989, %v4174_v3  }
0x249c   :  { %3107 = vperm.xlu0 %3988, %v4176_v37  }
0x24e0   :  { %v3096_v42 = vpop.permute.xlu2 %3095 }
0x24e1   :  { %v3118_v9 = vperm.slane %v3096_v42, %v4813_v59 }
0x24e8   :  { %v3102_v35 = vpop.permute.xlu2 %3101 }
0x24e9   :  { %v3121_v17 = vperm.slane %v3102_v35, %v4821_v1 }
0x24f0   :  { %v3093_v19 = vpop.permute.xlu2 %3092 }
0x24f6   :  { %v3081_v45 = vpop.permute.xlu0 %3080 }
0x24f7   :  { %v3084_v40 = vpop.permute.xlu1 %3083  ;;  %v3109_v39 = vperm.slane %v3081_v45, %v4813_v59 }
0x24f8   :  { %v3110_v31 = vperm.slane %v3084_v40, %v4816_v13 }
0x24fa   :  { %v3111_v12 = vsel %vm684_vm7, %v3110_v31, %v3109_v39 }
0x24fe   :  { %v3099_v60 = vpop.permute.xlu0 %3098 }
0x24ff   :  { %v3087_v2 = vpop.permute.xlu1 %3086  ;;  %v3119_v41 = vperm.slane %v3099_v60, %v4816_v13 }
0x2500   :  { %v3112_v10 = vperm.slane %v3087_v2, %v4821_v1  ;;  %v3116_v2 = vperm.slane %v3093_v19, %v4827_v50 }
0x2501   :  { %v3120_v46 = vsel %vm684_vm7, %v3119_v41, %v3118_v9 }
0x2502   :  { %v3113_v45 = vsel %vm688_vm8, %v3112_v10, %v3111_v12  ;;  %v3122_v42 = vsel %vm688_vm8, %v3121_v17, %v3120_v46 }
0x2506   :  { %v3090_v54 = vpop.permute.xlu0 %3089 }
0x2507   :  { %v3105_v63 = vpop.permute.xlu1 %3104  ;;  %v3114_v20 = vperm.slane %v3090_v54, %v4824_v5 }
0x2508   :  { %v3123_v36 = vperm.slane %v3105_v63, %v4824_v5 }
0x2509   :  { %v3115_v40 = vsel %vm692_vm9, %v3114_v20, %v3113_v45 }
0x250a   :  { %v3124_v59 = vsel %vm692_vm9, %v3123_v36, %v3122_v42  ;;  %v3117_v31 = vsel %vm696_vm10, %v3116_v2, %v3115_v40 }
0x250e   :  { %v3108_v60 = vpop.permute.xlu0 %3107 }
0x250f   :  { %v3125_v54 = vperm.slane %v3108_v60, %v4827_v50 }
0x2511   :  { %v3126_v39 = vsel %vm696_vm10, %v3125_v54, %v3124_v59 }
0x2512   :  { %v3127_v41 = vsel %vm707_vm11, %v3126_v39, %v3117_v31 }
0x2513   :  { %v3129_v35 = vsel %vm710_vm12, %v3127_v41, 0.0 }
0x2514   :  { %3130 = vadd.xlane.f32.xlu1 %v3129_v35 }
0x2587   :  { %v3131_v10 = vpop.xlane.xlu1 %3130 }
0x2588   :  { %4177 = vrcp.f32 %v3131_v10 }
0x258e   :  { %v4178_v63 = vpop.eup %4177 }
0x258f   :  { %v3134_v9 = vperm.slane %v4178_v63, 0  ;;  %v3135_v12 = vperm.slane %v4178_v63, 1 }
0x2591   :  { %v3139_v20 = vmul.f32 %v5735_v11, %v3134_v9  ;;  %v3138_v19 = vmul.f32 %v5733_v33, %v3134_v9  ;;  %v3144_v46 = vmul.f32 %v4164_v51, %v3135_v12  ;;  %v3143_v36 = vmul.f32 %v5739_v26, %v3135_v12 }
0x2592   :  { %v3145_v59 = vmul.f32 %v4168_v43, %v3135_v12  ;;  %v3140_v17 = vmul.f32 %v5742_v29, %v3134_v9  ;;  %v3146_v45 = vmul.f32 %v4172_v38, %v3135_v12  ;;  %v3141_v40 = vmul.f32 %v4170_v18, %v3134_v9 }
0x2593   :  { %3155 = vperm.xlu0 %3988, %v3139_v20   ;;  %3150 = vperm.xlu2 %3989, %v3138_v19   ;;  %v3147_v11 = vmul.f32 %v4176_v37, %v3135_v12  ;;  %v3142_v60 = vmul.f32 %v4174_v3, %v3134_v9 }
0x259b   :  { %3180 = vperm.xlu0 %3988, %v3144_v46   ;;  %3175 = vperm.xlu2 %3989, %v3143_v36  }
0x25a3   :  { %3185 = vperm.xlu0 %3988, %v3145_v59   ;;  %3160 = vperm.xlu2 %3989, %v3140_v17  }
0x25ab   :  { %3190 = vperm.xlu0 %3988, %v3146_v45   ;;  %3165 = vperm.xlu2 %3989, %v3141_v40  }
0x25b3   :  { %3195 = vperm.xlu0 %3988, %v3147_v11   ;;  %3170 = vperm.xlu2 %3989, %v3142_v60  }
0x25ed   :  { %v3151_v33 = vpop.permute.xlu2 %3150 }
0x25ee   :  { %v3198_v29 = vmul.f32 %v3151_v33, %v4576_v52 }
0x25f0   :  { %v3208_v18 = vsel %vm141_vm0, %v3198_v29, 0.0 }
0x25f5   :  { %v3176_v2 = vpop.permute.xlu2 %3175 }
0x25f6   :  { %v3203_v59 = vmul.f32 %v3176_v2, %v4609_v62 }
0x25f8   :  { %v3223_v60 = vsel %vm141_vm0, %v3203_v59, 0.0  ;;  %v5794_v59 = vld [vmem:[%s5983_s16] ss:$0 sm:$0xff] }
0x25fd   :  { %v3161_v51 = vpop.permute.xlu2 %3160 }
0x25fe   :  { %v3200_v38 = vmul.f32 %v3161_v51, %v4589_v56 }
0x2600   :  { %v3211_v41 = vsel %vm141_vm0, %v3200_v38, 0.0 }
0x2605   :  { %v3156_v42 = vpop.permute.xlu0 %3155  ;;  %v3166_v26 = vpop.permute.xlu2 %3165 }
0x2606   :  { %v3199_v54 = vmul.f32 %v3156_v42, %v4581_v53  ;;  %v3201_v35 = vmul.f32 %v3166_v26, %v4594_v57 }
0x2608   :  { %v3209_v31 = vsel %vm141_vm0, %v3199_v54, 0.0  ;;  %v3213_v9 = vsel %vm141_vm0, %v3201_v35, 0.0 }
0x2609   :  { %v3210_v37 = vadd.f32 %v3209_v31, %v3208_v18 }
0x260b   :  { %v3212_v63 = vadd.f32 %v3211_v41, %v3210_v37 }
0x260d   :  { %v3181_v43 = vpop.permute.xlu0 %3180  ;;  %v3171_v3 = vpop.permute.xlu2 %3170  ;;  %v3214_v19 = vadd.f32 %v3213_v9, %v3212_v63 }
0x260e   :  { %v3202_v10 = vmul.f32 %v3171_v3, %v4604_v61  ;;  %v3204_v12 = vmul.f32 %v3181_v43, %v4616_v0 }
0x2610   :  { %v3215_v20 = vsel %vm634_vm6, %v3202_v10, 0.0  ;;  %v3224_v45 = vsel %vm141_vm0, %v3204_v12, 0.0  ;;  %v3255_v12 = vpop.f32.mrf.mxu0 }
0x2611   :  { %v3216_v46 = vadd.f32 %v3215_v20, %v3214_v19  ;;  %v3225_v51 = vadd.f32 %v3224_v45, %v3223_v60 }
0x2613   :  { %v3217_v11 = vrot.slane %v3216_v46, 4 }
0x2615   :  { %v3186_v39 = vpop.permute.xlu0 %3185  ;;  %v3218_v26 = vadd.f32 %v3217_v11, %v3216_v46 }
0x2616   :  { %v3205_v17 = vmul.f32 %v3186_v39, %v4625_v4 }
0x2617   :  { %v3219_v18 = vrot.slane %v3218_v26, 2 }
0x2618   :  { %v3226_v33 = vsel %vm141_vm0, %v3205_v17, 0.0 }
0x2619   :  { %v3227_v54 = vadd.f32 %v3226_v33, %v3225_v51  ;;  %v3220_v3 = vadd.f32 %v3219_v18, %v3218_v26 }
0x261b   :  { %v3221_v35 = vrot.slane %v3220_v3, 1 }
0x261d   :  { %v3191_v36 = vpop.permute.xlu0 %3190  ;;  %v3222_v9 = vadd.f32 %v3221_v35, %v3220_v3 }
0x261e   :  { %v3206_v40 = vmul.f32 %v3191_v36, %v4633_v7 }
0x2620   :  { %v3228_v42 = vsel %vm141_vm0, %v3206_v40, 0.0 }
0x2621   :  { %v3229_v2 = vadd.f32 %v3228_v42, %v3227_v54 }
0x2625   :  { %v3196_v43 = vpop.permute.xlu0 %3195 }
0x2626   :  { %v3207_v29 = vmul.f32 %v3196_v43, %v4663_v23 }
0x2628   :  { %v3230_v31 = vsel %vm634_vm6, %v3207_v29, 0.0 }
0x2629   :  { %v3231_v38 = vadd.f32 %v3230_v31, %v3229_v2 }
0x262b   :  { %v3232_v37 = vrot.slane %v3231_v38, 4 }
0x262d   :  { %v3233_v39 = vadd.f32 %v3232_v37, %v3231_v38 }
0x262f   :  { %v3234_v41 = vrot.slane %v3233_v39, 2 }
0x2631   :  { %v3235_v10 = vadd.f32 %v3234_v41, %v3233_v39 }
0x2633   :  { %v3236_v63 = vrot.slane %v3235_v10, 1 }
0x2635   :  { %v3237_v20 = vadd.f32 %v3236_v63, %v3235_v10 }
0x2637   :  { %v3260_v19 = vsel %vm707_vm11, %v3237_v20, %v3222_v9 }
0x2638   :  { %3968 = vmatmul.msk.f32.vlgmr.msrb.gmra.mxu1 %vm141_vm0, %v3260_v19  ;;  %v3349_v19 = vld [vmem:[#allocation2 + $0xa] sm:$0x3] }
0x26b5   :  { %v3280_v46 = vpop.f32.mrf.mxu1 }
0x26b6   :  { %v3281_v36 = vadd.f32 %v3280_v46, %v3255_v12 }
0x26b8   :  { %v3283_v17 = vadd.f32 %v5794_v59, %v3281_v36 }
0x26ba   :  { %4179 = vtanh.f32 %v3283_v17  ;;  %v3969_v40 = vmul.f32 -1.442695, %v3283_v17 }
0x26bc   :  { %4181 = vpow2.f32 %v3969_v40 }
0x26c0   :  { %v4180_v45 = vpop.eup %4179 }
0x26c1   :  { %3306 = vrot.lane.b32.xlu2 %v4180_v45, %s4398_s30 }
0x26c2   :  { %v4182_v11 = vpop.eup %4181 }
0x26c3   :  { %v3287_v60 = vadd.f32 1.0, %v4182_v11 }
0x26c5   :  { %4183 = vrcp.f32 %v3287_v60  ;;  %v3299_v43 = vand.u32 2147483648, %v3287_v60  ;;  %vm3293_vm4 = vweird.f32 %v3287_v60  ;;  %v3297_v29 = vand.u32 2147483647, %v3287_v60 }
0x26c7   :  { %v3300_v31 = vor.u32 1.1754944e-38, %v3299_v43  ;;  %vm3298_vm13 = vcmp.eq.f32.partialorder %v3297_v29, 8.507059e+37 }
0x26cb   :  { %v4184_v33 = vpop.eup %4183 }
0x26cc   :  { %v3289_v51 = vmul.f32 %v4184_v33, %v3287_v60  ;;  %vm3294_vm3 = vweird.f32 %v4184_v33 }
0x26cd   :  { %vm3295_vm5 = vmor %vm3293_vm4, %vm3294_vm3 }
0x26ce   :  { %v3290_v42 = vsub.f32 1.0, %v3289_v51 }
0x26d0   :  { %v3291_v26 = vmul.f32 %v4184_v33, %v3290_v42 }
0x26d2   :  { %v3292_v54 = vadd.f32 %v4184_v33, %v3291_v26 }
0x26d4   :  { %v3296_v2 = vsel %vm3295_vm5, %v4184_v33, %v3292_v54 }
0x26d5   :  { %v3301_v38 = vsel %vm3298_vm13, %v3300_v31, %v3296_v2 }
0x26d6   :  { %v3304_v3 = vmul.f32 %v3301_v38, %v5609_v28 }
0x271b   :  { %v3307_v18 = vpop.permute.xlu2 %3306 }
0x271c   :  { %v3309_v37 = vmul.f32 %v3307_v18, %v3301_v38 }
0x271e   :  { %3311 = vrot.lane.b32.xlu0 %v3309_v37, %s4399_s4 }
0x2790   :  { %v3312_v39 = vpop.permute.xlu0 %3311 }
0x2791   :  { %v5800_v41 = vadd.f32 %v3312_v39, %v3304_v3 }
0x2793   :  { %4185 = vtanh.f32 %v5800_v41 }
0x2799   :  { %v4186_v35 = vpop.eup %4185 }
0x279a   :  { %3317 = vrot.lane.b32.xlu1 %v4186_v35, %s4398_s30 }
0x280c   :  { %v3318_v10 = vpop.permute.xlu1 %3317 }
0x280d   :  { %v3320_v63 = vmul.f32 %v3318_v10, %v3301_v38 }
0x280f   :  { %3322 = vrot.lane.b32.xlu2 %v3320_v63, %s4399_s4 }
0x2869   :  { %v3323_v9 = vpop.permute.xlu2 %3322 }
0x286a   :  { %3326 = vst.msk [vmem:[#allocation12 + $0x8] sm:$0x3] %vm1009_vm2, %v3323_v9  ;;  %3970 = vmatmul.msk.f32.vlgmr.msrb.gmra.mxu2 %vm141_vm0, %v3323_v9 }
0x28ed   :  { %v3346_v20 = vpop.f32.mrf.mxu2 }
0x28ee   :  { %v3347_v28 = vadd.f32 %v3346_v20, %v4564_v24 }
0x28f0   :  { %v3350_v12 = vadd.f32 %v3349_v19, %v3347_v28 }
0x28f2   :  { %4187 = vtanh.f32 %v3350_v12  ;;  %v3971_v36 = vmul.f32 -1.442695, %v3350_v12 }
0x28f4   :  { %4189 = vpow2.f32 %v3971_v36 }
0x28f8   :  { %v4188_v46 = vpop.eup %4187 }
0x28f9   :  { %3373 = vrot.lane.b32.xlu0 %v4188_v46, %s4398_s30 }
0x28fa   :  { %v4190_v17 = vpop.eup %4189 }
0x28fb   :  { %v3354_v45 = vadd.f32 1.0, %v4190_v17 }
0x28fd   :  { %4191 = vrcp.f32 %v3354_v45  ;;  %v3366_v42 = vand.u32 2147483648, %v3354_v45  ;;  %vm3360_vm15 = vweird.f32 %v3354_v45  ;;  %v3364_v24 = vand.u32 2147483647, %v3354_v45 }
0x28ff   :  { %v3367_v54 = vor.u32 1.1754944e-38, %v3366_v42  ;;  %vm3365_vm3 = vcmp.eq.f32.partialorder %v3364_v24, 8.507059e+37 }
0x2903   :  { %v4192_v40 = vpop.eup %4191 }
0x2904   :  { %v3356_v11 = vmul.f32 %v4192_v40, %v3354_v45  ;;  %vm3361_vm14 = vweird.f32 %v4192_v40 }
0x2905   :  { %vm3362_vm1 = vmor %vm3360_vm15, %vm3361_vm14 }
0x2906   :  { %v3357_v60 = vsub.f32 1.0, %v3356_v11 }
0x2908   :  { %v3358_v33 = vmul.f32 %v4192_v40, %v3357_v60 }
0x290a   :  { %v3359_v51 = vadd.f32 %v4192_v40, %v3358_v33 }
0x290c   :  { %v3363_v26 = vsel %vm3362_vm1, %v4192_v40, %v3359_v51 }
0x290d   :  { %v3368_v29 = vsel %vm3365_vm3, %v3367_v54, %v3363_v26 }
0x290e   :  { %v3371_v31 = vmul.f32 %v3368_v29, %v5632_v32 }
0x296b   :  { %v3374_v43 = vpop.permute.xlu0 %3373 }
0x296c   :  { %v3376_v2 = vmul.f32 %v3374_v43, %v3368_v29 }
0x296e   :  { %3378 = vrot.lane.b32.xlu2 %v3376_v2, %s4399_s4 }
0x29c8   :  { %v3379_v18 = vpop.permute.xlu2 %3378 }
0x29c9   :  { %v3381_v38 = vadd.f32 %v3379_v18, %v3371_v31 }
0x29cb   :  { %4193 = vtanh.f32 %v3381_v38 }
0x29d1   :  { %v4194_v37 = vpop.eup %4193 }
0x29d2   :  { %3384 = vrot.lane.b32.xlu0 %v4194_v37, %s4398_s30 }
0x2a44   :  { %v3385_v3 = vpop.permute.xlu0 %3384 }
0x2a45   :  { %v3387_v39 = vmul.f32 %v3385_v3, %v3368_v29 }
0x2a47   :  { %3389 = vrot.lane.b32.xlu2 %v3387_v39, %s4399_s4 }
0x2aa1   :  { %v3390_v35 = vpop.permute.xlu2 %3389 }
0x2aa2   :  { %3972 = vmatmul.msk.f32.vlgmr.msra.gmra.mxu0 %vm141_vm0, %v3390_v35  ;;  %3973 = vmatmul.msk.f32.vlgmr.msra.gmra.mxu1 %vm141_vm0, %v3390_v35 }
0x2b1f   :  { %v3410_v10 = vpop.f32.mrf.mxu0 }
0x2b20   :  { %v3411_v63 = vadd.f32 %v5654_v58, %v3410_v10 }
0x2b22   :  { %v3415_v9 = vperm.slane %v3411_v63, 0  ;;  %v3414_v20 = vrot.slane %v3411_v63, 1 }
0x2b24   :  { %v3419_v32 = vrot.slane %v3415_v9, 4  ;;  %v3423_v28 = vadd.f32 %v3415_v9, %v4713_v14  ;;  %v3425_v12 = vadd.f32 %v3415_v9, %v4715_v16  ;;  %v3427_v36 = vadd.f32 %v3415_v9, %v6077_v47  ;;  %v5827_v16 = vld [vmem:[%s5980_s13] ss:$0 sm:$0xff] }
0x2b25   :  { %v3416_v17 = vperm.slane %v3414_v20, 0  ;;  %v3429_v40 = vadd.f32 %v3415_v9, %v6079_v49  ;;  %v3431_v49 = vadd.f32 %v3415_v9, %v6082_v22  ;;  %v6100_v9 = vld [vmem:[#allocation31_spill] sm:$0xff] }
0x2b26   :  { %v3424_v19 = vadd.f32 %v3419_v32, %v4723_v48  ;;  %v3426_v46 = vadd.f32 %v3419_v32, %v6076_v34  ;;  %v3428_v45 = vadd.f32 %v3419_v32, %v6078_v44  ;;  %v3441_v11 = vmax.f32 %v3423_v28, 0.0 }
0x2b27   :  { %v3443_v60 = vmax.f32 %v3425_v12, 0.0  ;;  %v3430_v33 = vadd.f32 %v3419_v32, %v6080_v6  ;;  %v3445_v14 = vmax.f32 %v3427_v36, 0.0  ;;  %v3420_v42 = vrot.slane %v3416_v17, 4  ;;  %v6101_v12 = vld [vmem:[#allocation33_spill] sm:$0xff] }
0x2b28   :  { %v3442_v58 = vmax.f32 %v3424_v19, 0.0  ;;  %v3444_v51 = vmax.f32 %v3426_v46, 0.0  ;;  %v3446_v48 = vmax.f32 %v3428_v45, 0.0  ;;  %v3447_v24 = vmax.f32 %v3429_v40, 0.0 }
0x2b29   :  { %v3459_v34 = vmul.f32 %v5827_v16, %v3441_v11  ;;  %v3461_v44 = vmul.f32 %v5827_v16, %v3443_v60  ;;  %v3448_v26 = vmax.f32 %v3430_v33, 0.0  ;;  %v3463_v54 = vmul.f32 %v5827_v16, %v3445_v14 }
0x2b2a   :  { %v3460_v47 = vmul.f32 %v3442_v58, %v6081_v55  ;;  %v3462_v6 = vmul.f32 %v3444_v51, %v6081_v55  ;;  %v3432_v43 = vadd.f32 %v3416_v17, %v6083_v30  ;;  %v3464_v29 = vmul.f32 %v3446_v48, %v6081_v55 }
0x2b2b   :  { %3495 = vst [vmem:[#allocation1] ss:$2 sm:$0xff] %v3459_v34  ;;  %v3433_v2 = vadd.f32 %v3420_v42, %v6084_v15  ;;  %v3465_v31 = vmul.f32 %v5827_v16, %v3447_v24  ;;  %v3434_v18 = vadd.f32 %v3416_v17, %v6085_v8  ;;  %v3449_v38 = vmax.f32 %v3431_v49, 0.0  ;;  %v6099_v15 = vld [vmem:[#allocation32_spill] sm:$0xff] }
0x2b2c   :  { %3497 = vst [vmem:[#allocation1 + $0x1] ss:$2 sm:$0xff] %v3460_v47  ;;  %v3466_v22 = vmul.f32 %v3448_v26, %v6081_v55  ;;  %v3435_v37 = vadd.f32 %v3420_v42, %v6086_v25  ;;  %v3436_v3 = vadd.f32 %v3416_v17, %v6093_v27  ;;  %v3450_v30 = vmax.f32 %v3432_v43, 0.0 }
0x2b2d   :  { %3499 = vst [vmem:[#allocation1 + $0x10] ss:$2 sm:$0xff] %v3461_v44  ;;  %v3437_v39 = vadd.f32 %v3420_v42, %v6094_v21  ;;  %v3451_v35 = vmax.f32 %v3433_v2, 0.0  ;;  %v3438_v10 = vadd.f32 %v3416_v17, %v6099_v15  ;;  %v3452_v63 = vmax.f32 %v3434_v18, 0.0 }
0x2b2e   :  { %3501 = vst [vmem:[#allocation1 + $0x11] ss:$2 sm:$0xff] %v3462_v6  ;;  %v3467_v8 = vmul.f32 %v5827_v16, %v3449_v38  ;;  %v3439_v32 = vadd.f32 %v3420_v42, %v6100_v9  ;;  %v3453_v20 = vmax.f32 %v3435_v37, 0.0  ;;  %v3454_v25 = vmax.f32 %v3436_v3, 0.0 }
0x2b2f   :  { %3503 = vst [vmem:[#allocation1 + $0x20] ss:$2 sm:$0xff] %v3463_v54  ;;  %v3468_v19 = vmul.f32 %v5827_v16, %v3450_v30  ;;  %v3440_v21 = vadd.f32 %v3416_v17, %v6101_v12  ;;  %v3455_v46 = vmax.f32 %v3437_v39, 0.0  ;;  %v3469_v36 = vmul.f32 %v3451_v35, %v6081_v55  ;;  %v6103_v12 = vld [vmem:[#allocation34_spill] sm:$0xff] }
0x2b30   :  { %3505 = vst [vmem:[#allocation1 + $0x21] ss:$2 sm:$0xff] %v3464_v29  ;;  %v3456_v40 = vmax.f32 %v3438_v10, 0.0  ;;  %v3470_v11 = vmul.f32 %v5827_v16, %v3452_v63  ;;  %v3457_v60 = vmax.f32 %v3439_v32, 0.0  ;;  %v3471_v33 = vmul.f32 %v3453_v20, %v6081_v55  ;;  %v6102_v10 = vld [vmem:[#allocation35_spill] sm:$0xff] }
0x2b31   :  { %3507 = vst [vmem:[#allocation1 + $0x30] ss:$2 sm:$0xff] %v3465_v31  ;;  %v3472_v14 = vmul.f32 %v5827_v16, %v3454_v25  ;;  %v3458_v17 = vmax.f32 %v3440_v21, 0.0  ;;  %v3473_v42 = vmul.f32 %v3455_v46, %v6081_v55 }
0x2b32   :  { %3509 = vst [vmem:[#allocation1 + $0x31] ss:$2 sm:$0xff] %v3466_v22  ;;  %v3474_v24 = vmul.f32 %v5827_v16, %v3456_v40  ;;  %v3475_v34 = vmul.f32 %v3457_v60, %v6081_v55 }
0x2b33   :  { %v3510_v28 = vld.sshfl [vmem:[#allocation1] sm:$0xff pattern:$0x75316420]  ;;  %v3476_v49 = vmul.f32 %v5827_v16, %v3458_v17 }
0x2b34   :  { %v3540_v27 = vsel %vm141_vm0, %v3510_v28, 0.0  ;;  %3514 = vst [vmem:[#allocation1] ss:$2 sm:$0xff] %v3467_v8 }
0x2b35   :  { %v3511_v45 = vld.sshfl [vmem:[#allocation1 + $0x10] sm:$0xff pattern:$0x75316420]  ;;  %3541 = vadd.xlane.f32.xlu0 %v3540_v27 }
0x2b36   :  { %v3543_v58 = vsel %vm141_vm0, %v3511_v45, 0.0  ;;  %3516 = vst [vmem:[#allocation1 + $0x10] ss:$2 sm:$0xff] %v3468_v19 }
0x2b37   :  { %3544 = vadd.xlane.f32.xlu1 %v3543_v58  ;;  %3517 = vst [vmem:[#allocation1 + $0x11] ss:$2 sm:$0xff] %v3469_v36  ;;  %v3512_v51 = vld.sshfl [vmem:[#allocation1 + $0x20] sm:$0xff pattern:$0x75316420] }
0x2b38   :  { %3518 = vst [vmem:[#allocation1 + $0x20] ss:$2 sm:$0xff] %v3470_v11  ;;  %v3546_v26 = vsel %vm141_vm0, %v3512_v51, 0.0 }
0x2b39   :  { %3519 = vst [vmem:[#allocation1 + $0x21] ss:$2 sm:$0xff] %v3471_v33  ;;  %v3513_v48 = vld.sshfl [vmem:[#allocation1 + $0x30] sm:$0xff pattern:$0x75316420] }
0x2b3a   :  { %3520 = vst [vmem:[#allocation1 + $0x30] ss:$2 sm:$0xff] %v3472_v14  ;;  %v3549_v44 = vsel %vm141_vm0, %v3513_v48, 0.0 }
0x2b3b   :  { %v3515_v47 = vld.sshfl [vmem:[#allocation1] sm:$0xff pattern:$0x75316420]  ;;  %3521 = vst [vmem:[#allocation1 + $0x31] ss:$2 sm:$0xff] %v3473_v42 }
0x2b3c   :  { %3525 = vst [vmem:[#allocation1] ss:$2 sm:$0xff] %v3474_v24  ;;  %v3552_v22 = vsel %vm634_vm6, %v3515_v47, 0.0 }
0x2b3d   :  { %3526 = vst [vmem:[#allocation1 + $0x1] ss:$2 sm:$0xff] %v3475_v34  ;;  %3550 = vadd.xlane.f32.xlu0 %v3549_v44 }
0x2b3e   :  { %v3522_v6 = vld.sshfl [vmem:[#allocation1 + $0x10] sm:$0xff pattern:$0x75316420] }
0x2b3f   :  { %3547 = vadd.xlane.f32.xlu1 %v3546_v26  ;;  %v3555_v54 = vsel %vm141_vm0, %v3522_v6, 0.0  ;;  %3527 = vst [vmem:[#allocation1 + $0x10] ss:$2 sm:$0xff] %v3476_v49 }
0x2b40   :  { %3556 = vadd.xlane.f32.xlu2 %v3555_v54  ;;  %v3523_v43 = vld.sshfl [vmem:[#allocation1 + $0x20] sm:$0xff pattern:$0x75316420] }
0x2b41   :  { %v3558_v55 = vsel %vm141_vm0, %v3523_v43, 0.0 }
0x2b42   :  { %v3524_v2 = vld.sshfl [vmem:[#allocation1 + $0x30] sm:$0xff pattern:$0x75316420] }
0x2b43   :  { %v3561_v16 = vsel %vm141_vm0, %v3524_v2, 0.0 }
0x2b44   :  { %v3528_v29 = vld.sshfl [vmem:[#allocation1] sm:$0xff pattern:$0x75316420] }
0x2b45   :  { %v3564_v31 = vsel %vm141_vm0, %v3528_v29, 0.0  ;;  %3559 = vadd.xlane.f32.xlu0 %v3558_v55 }
0x2b46   :  { %v3529_v18 = vld.sshfl [vmem:[#allocation1 + $0x10] sm:$0xff pattern:$0x75316420] }
0x2b47   :  { %3565 = vadd.xlane.f32.xlu1 %v3564_v31  ;;  %v3567_v38 = vsel %vm634_vm6, %v3529_v18, 0.0 }
0x2b48   :  { %3562 = vadd.xlane.f32.xlu2 %v3561_v16 }
0x2b4d   :  { %3568 = vadd.xlane.f32.xlu0 %v3567_v38 }
0x2b50   :  { %3553 = vadd.xlane.f32.xlu2 %v3552_v22 }
0x2ba8   :  { %v3542_v37 = vpop.xlane.xlu0 %3541 }
0x2ba9   :  { %v3570_v9 = vadd.f32 %v3542_v37, %v6102_v10 }
0x2baa   :  { %v3545_v3 = vpop.xlane.xlu1 %3544 }
0x2bab   :  { %v3571_v32 = vadd.f32 %v3545_v3, %v6102_v10  ;;  %v3590_v46 = vperm.slane %v3570_v9, %v6103_v12 }
0x2bad   :  { %v3591_v45 = vperm.slane %v3571_v32, %v4816_v13 }
0x2baf   :  { %v3592_v17 = vsel %vm684_vm7, %v3591_v45, %v3590_v46 }
0x2bb0   :  { %v3551_v30 = vpop.xlane.xlu0 %3550 }
0x2bb1   :  { %v3573_v40 = vadd.f32 %v3551_v30, %v6102_v10 }
0x2bb2   :  { %v3548_v39 = vpop.xlane.xlu1 %3547 }
0x2bb3   :  { %v3557_v35 = vpop.xlane.xlu2 %3556  ;;  %v3572_v25 = vadd.f32 %v3548_v39, %v6102_v10  ;;  %v3595_v42 = vperm.slane %v3573_v40, %v4824_v5 }
0x2bb4   :  { %v3575_v63 = vadd.f32 %v3557_v35, %v6102_v10 }
0x2bb5   :  { %v3593_v60 = vperm.slane %v3572_v25, %v4821_v1 }
0x2bb6   :  { %v3599_v21 = vperm.slane %v3575_v63, %v6103_v12 }
0x2bb7   :  { %v3594_v47 = vsel %vm688_vm8, %v3593_v60, %v3592_v17 }
0x2bb8   :  { %v3560_v15 = vpop.xlane.xlu0 %3559  ;;  %v3596_v54 = vsel %vm692_vm9, %v3595_v42, %v3594_v47 }
0x2bb9   :  { %v3576_v8 = vadd.f32 %v3560_v15, %v6102_v10 }
0x2bba   :  { %v3566_v19 = vpop.xlane.xlu1 %3565 }
0x2bbb   :  { %v3600_v20 = vperm.slane %v3576_v8, %v4816_v13  ;;  %v3563_v28 = vpop.xlane.xlu2 %3562  ;;  %v3578_v11 = vadd.f32 %v3566_v19, %v6102_v10 }
0x2bbc   :  { %v3577_v27 = vadd.f32 %v3563_v28, %v6102_v10 }
0x2bbd   :  { %v3601_v58 = vsel %vm684_vm7, %v3600_v20, %v3599_v21  ;;  %v3604_v48 = vperm.slane %v3578_v11, %v4824_v5 }
0x2bbe   :  { %v3602_v36 = vperm.slane %v3577_v27, %v4821_v1 }
0x2bc0   :  { %v3569_v33 = vpop.xlane.xlu0 %3568  ;;  %v3603_v14 = vsel %vm688_vm8, %v3602_v36, %v3601_v58 }
0x2bc1   :  { %v3579_v51 = vadd.f32 %v3569_v33, %v6102_v10  ;;  %v3605_v49 = vsel %vm692_vm9, %v3604_v48, %v3603_v14 }
0x2bc3   :  { %v3554_v24 = vpop.xlane.xlu2 %3553  ;;  %v3606_v34 = vperm.slane %v3579_v51, %v4827_v50 }
0x2bc4   :  { %v3574_v44 = vadd.f32 %v3554_v24, %v6102_v10 }
0x2bc5   :  { %v3607_v6 = vsel %vm696_vm10, %v3606_v34, %v3605_v49 }
0x2bc6   :  { %v3597_v26 = vperm.slane %v3574_v44, %v4827_v50 }
0x2bc8   :  { %v3598_v43 = vsel %vm696_vm10, %v3597_v26, %v3596_v54 }
0x2bc9   :  { %v3608_v55 = vsel %vm707_vm11, %v3607_v6, %v3598_v43 }
0x2bca   :  { %v3610_v29 = vsel %vm710_vm12, %v3608_v55, -inf }
0x2bcb   :  { %3611 = vmax.xlane.f32.xlu1 %v3610_v29 }
0x2c3e   :  { %v3612_v2 = vpop.xlane.xlu1 %3611 }
0x2c3f   :  { %v3614_v31 = vperm.slane %v3612_v2, 0  ;;  %v3615_v16 = vperm.slane %v3612_v2, 1 }
0x2c41   :  { %v3618_v18 = vsub.f32 %v3570_v9, %v3614_v31  ;;  %v3619_v38 = vsub.f32 %v3571_v32, %v3614_v31  ;;  %v3623_v22 = vsub.f32 %v3575_v63, %v3615_v16  ;;  %v3620_v30 = vsub.f32 %v3572_v25, %v3614_v31 }
0x2c42   :  { %v3624_v39 = vsub.f32 %v3576_v8, %v3615_v16  ;;  %v3625_v10 = vsub.f32 %v3577_v27, %v3615_v16  ;;  %v3626_v9 = vsub.f32 %v3578_v11, %v3615_v16  ;;  %v3621_v63 = vsub.f32 %v3573_v40, %v3614_v31 }
0x2c43   :  { %v3628_v37 = vmul.f32 1.442695, %v3618_v18  ;;  %v3630_v3 = vmul.f32 1.442695, %v3619_v38  ;;  %v3638_v35 = vmul.f32 1.442695, %v3623_v22  ;;  %v3622_v27 = vsub.f32 %v3574_v44, %v3614_v31 }
0x2c44   :  { %v3632_v15 = vmul.f32 1.442695, %v3620_v30  ;;  %v3640_v20 = vmul.f32 1.442695, %v3624_v39  ;;  %v3642_v32 = vmul.f32 1.442695, %v3625_v10  ;;  %v3627_v45 = vsub.f32 %v3579_v51, %v3615_v16 }
0x2c45   :  { %4195 = vpow2.f32 %v3628_v37  ;;  %v3644_v25 = vmul.f32 1.442695, %v3626_v9  ;;  %v3634_v21 = vmul.f32 1.442695, %v3621_v63  ;;  %v3636_v40 = vmul.f32 1.442695, %v3622_v27 }
0x2c46   :  { %4197 = vpow2.f32 %v3630_v3  ;;  %v3646_v58 = vmul.f32 1.442695, %v3627_v45 }
0x2c47   :  { %4199 = vpow2.f32 %v3638_v35 }
0x2c48   :  { %4201 = vpow2.f32 %v3632_v15 }
0x2c49   :  { %4203 = vpow2.f32 %v3640_v20 }
0x2c4a   :  { %4205 = vpow2.f32 %v3642_v32 }
0x2c4b   :  { %v5897_v28 = vpop.eup %4195  ;;  %4207 = vpow2.f32 %v3644_v25 }
0x2c4c   :  { %v5899_v19 = vpop.eup %4197  ;;  %3659 = vperm.xlu2 %3989, %v5897_v28   ;;  %4209 = vpow2.f32 %v3634_v21 }
0x2c4d   :  { %3662 = vperm.xlu0 %3988, %v5899_v19   ;;  %v5903_v8 = vpop.eup %4199  ;;  %4211 = vpow2.f32 %v3636_v40 }
0x2c4e   :  { %3674 = vperm.xlu1 %3987, %v5903_v8   ;;  %v5906_v46 = vpop.eup %4201  ;;  %4213 = vpow2.f32 %v3646_v58 }
0x2c4f   :  { %v4204_v36 = vpop.eup %4203 }
0x2c50   :  { %v4206_v11 = vpop.eup %4205 }
0x2c51   :  { %v4208_v60 = vpop.eup %4207 }
0x2c52   :  { %v4210_v33 = vpop.eup %4209 }
0x2c53   :  { %v4212_v14 = vpop.eup %4211 }
0x2c54   :  { %3665 = vperm.xlu2 %3989, %v5906_v46   ;;  %v4214_v17 = vpop.eup %4213 }
0x2c55   :  { %3677 = vperm.xlu0 %3988, %v4204_v36  }
0x2c56   :  { %3680 = vperm.xlu1 %3987, %v4206_v11  }
0x2c5c   :  { %3683 = vperm.xlu2 %3989, %v4208_v60  }
0x2c5d   :  { %3668 = vperm.xlu0 %3988, %v4210_v33  }
0x2c5e   :  { %3671 = vperm.xlu1 %3987, %v4212_v14  }
0x2c65   :  { %3686 = vperm.xlu0 %3988, %v4214_v17  }
0x2ca6   :  { %v3660_v48 = vpop.permute.xlu2 %3659 }
0x2ca7   :  { %v3688_v6 = vperm.slane %v3660_v48, %v6103_v12 }
0x2cae   :  { %v3666_v51 = vpop.permute.xlu2 %3665 }
0x2caf   :  { %v3691_v16 = vperm.slane %v3666_v51, %v4821_v1 }
0x2cb6   :  { %v3684_v18 = vpop.permute.xlu2 %3683 }
0x2cbf   :  { %v3663_v42 = vpop.permute.xlu0 %3662 }
0x2cc0   :  { %v3675_v24 = vpop.permute.xlu1 %3674  ;;  %v3689_v44 = vperm.slane %v3663_v42, %v4816_v13 }
0x2cc1   :  { %v3697_v54 = vperm.slane %v3675_v24, %v6103_v12  ;;  %v3702_v12 = vperm.slane %v3684_v18, %v4824_v5 }
0x2cc2   :  { %v3690_v55 = vsel %vm684_vm7, %v3689_v44, %v3688_v6 }
0x2cc3   :  { %v3692_v22 = vsel %vm688_vm8, %v3691_v16, %v3690_v55 }
0x2cc7   :  { %v3678_v34 = vpop.permute.xlu0 %3677 }
0x2cc8   :  { %v3681_v47 = vpop.permute.xlu1 %3680  ;;  %v3698_v49 = vperm.slane %v3678_v34, %v4816_v13 }
0x2cc9   :  { %v3700_v43 = vperm.slane %v3681_v47, %v4821_v1 }
0x2cca   :  { %v3699_v29 = vsel %vm684_vm7, %v3698_v49, %v3697_v54 }
0x2ccb   :  { %v3701_v38 = vsel %vm688_vm8, %v3700_v43, %v3699_v29 }
0x2ccc   :  { %v3703_v39 = vsel %vm692_vm9, %v3702_v12, %v3701_v38 }
0x2ccf   :  { %v3669_v26 = vpop.permute.xlu0 %3668 }
0x2cd0   :  { %v3672_v2 = vpop.permute.xlu1 %3671  ;;  %v3693_v31 = vperm.slane %v3669_v26, %v4824_v5 }
0x2cd1   :  { %v3695_v13 = vperm.slane %v3672_v2, %v4827_v50 }
0x2cd2   :  { %v3694_v37 = vsel %vm692_vm9, %v3693_v31, %v3692_v22 }
0x2cd3   :  { %v3696_v35 = vsel %vm696_vm10, %v3695_v13, %v3694_v37 }
0x2cd7   :  { %v3687_v3 = vpop.permute.xlu0 %3686 }
0x2cd8   :  { %v3704_v30 = vperm.slane %v3687_v3, %v4827_v50 }
0x2cda   :  { %v3705_v1 = vsel %vm696_vm10, %v3704_v30, %v3703_v39 }
0x2cdb   :  { %v3706_v15 = vsel %vm707_vm11, %v3705_v1, %v3696_v35 }
0x2cdc   :  { %v3708_v10 = vsel %vm710_vm12, %v3706_v15, 0.0 }
0x2cdd   :  { %3709 = vadd.xlane.f32.xlu2 %v3708_v10 }
0x2d50   :  { %v3710_v20 = vpop.xlane.xlu2 %3709 }
0x2d51   :  { %4215 = vrcp.f32 %v3710_v20 }
0x2d57   :  { %v4216_v9 = vpop.eup %4215 }
0x2d58   :  { %v3713_v5 = vperm.slane %v4216_v9, 0  ;;  %v3714_v50 = vperm.slane %v4216_v9, 1 }
0x2d5a   :  { %v3718_v63 = vmul.f32 %v5899_v19, %v3713_v5  ;;  %v3717_v32 = vmul.f32 %v5897_v28, %v3713_v5  ;;  %v3723_v25 = vmul.f32 %v4204_v36, %v3714_v50  ;;  %v3722_v27 = vmul.f32 %v5903_v8, %v3714_v50 }
0x2d5b   :  { %v3724_v21 = vmul.f32 %v4206_v11, %v3714_v50  ;;  %v3719_v45 = vmul.f32 %v5906_v46, %v3713_v5  ;;  %v3725_v40 = vmul.f32 %v4208_v60, %v3714_v50  ;;  %v3720_v58 = vmul.f32 %v4210_v33, %v3713_v5 }
0x2d5c   :  { %3734 = vperm.xlu0 %3988, %v3718_v63   ;;  %3729 = vperm.xlu1 %3987, %v3717_v32   ;;  %v3726_v19 = vmul.f32 %v4214_v17, %v3714_v50  ;;  %v3721_v42 = vmul.f32 %v4212_v14, %v3713_v5  ;;  %v3834_v63 = vpop.f32.mrf.mxu1 }
0x2d64   :  { %3759 = vperm.xlu0 %3988, %v3723_v25   ;;  %3754 = vperm.xlu1 %3987, %v3722_v27  }
0x2d6c   :  { %3764 = vperm.xlu0 %3988, %v3724_v21   ;;  %3739 = vperm.xlu1 %3987, %v3719_v45  }
0x2d74   :  { %3769 = vperm.xlu0 %3988, %v3725_v40   ;;  %3744 = vperm.xlu1 %3987, %v3720_v58  }
0x2d7c   :  { %3774 = vperm.xlu0 %3988, %v3726_v19   ;;  %3749 = vperm.xlu1 %3987, %v3721_v42  }
0x2dce   :  { %v3735_v28 = vpop.permute.xlu0 %3734  ;;  %v3730_v48 = vpop.permute.xlu1 %3729 }
0x2dcf   :  { %v3778_v11 = vmul.f32 %v3735_v28, %v4581_v53  ;;  %v3777_v46 = vmul.f32 %v3730_v48, %v4576_v52 }
0x2dd1   :  { %v3788_v44 = vsel %vm141_vm0, %v3778_v11, 0.0  ;;  %v3787_v49 = vsel %vm141_vm0, %v3777_v46, 0.0 }
0x2dd2   :  { %v3789_v54 = vadd.f32 %v3788_v44, %v3787_v49 }
0x2dd6   :  { %v3760_v36 = vpop.permute.xlu0 %3759  ;;  %v3755_v24 = vpop.permute.xlu1 %3754 }
0x2dd7   :  { %v3783_v51 = vmul.f32 %v3760_v36, %v4616_v0  ;;  %v3782_v60 = vmul.f32 %v3755_v24, %v4609_v62 }
0x2dd9   :  { %v3803_v26 = vsel %vm141_vm0, %v3783_v51, 0.0  ;;  %v3802_v53 = vsel %vm141_vm0, %v3782_v60, 0.0 }
0x2dde   :  { %v3765_v8 = vpop.permute.xlu0 %3764  ;;  %v3740_v34 = vpop.permute.xlu1 %3739 }
0x2ddf   :  { %v3784_v14 = vmul.f32 %v3765_v8, %v4625_v4  ;;  %v3779_v17 = vmul.f32 %v3740_v34, %v4589_v56  ;;  %v3804_v4 = vadd.f32 %v3803_v26, %v3802_v53 }
0x2de1   :  { %v3805_v62 = vsel %vm141_vm0, %v3784_v14, 0.0  ;;  %v3790_v6 = vsel %vm141_vm0, %v3779_v17, 0.0 }
0x2de2   :  { %v3806_v55 = vadd.f32 %v3805_v62, %v3804_v4  ;;  %v3791_v29 = vadd.f32 %v3790_v6, %v3789_v54 }
0x2de6   :  { %v3770_v33 = vpop.permute.xlu0 %3769  ;;  %v3745_v47 = vpop.permute.xlu1 %3744 }
0x2de7   :  { %v3785_v52 = vmul.f32 %v3770_v33, %v4633_v7  ;;  %v3780_v0 = vmul.f32 %v3745_v47, %v4594_v57 }
0x2de9   :  { %v3807_v56 = vsel %vm141_vm0, %v3785_v52, 0.0  ;;  %v3792_v43 = vsel %vm141_vm0, %v3780_v0, 0.0 }
0x2dea   :  { %v3808_v18 = vadd.f32 %v3807_v56, %v3806_v55  ;;  %v3793_v57 = vadd.f32 %v3792_v43, %v3791_v29 }
0x2dee   :  { %v3775_v2 = vpop.permute.xlu0 %3774  ;;  %v3750_v31 = vpop.permute.xlu1 %3749 }
0x2def   :  { %v3786_v16 = vmul.f32 %v3775_v2, %v4663_v23  ;;  %v3781_v7 = vmul.f32 %v3750_v31, %v4604_v61 }
0x2df1   :  { %v3809_v38 = vsel %vm634_vm6, %v3786_v16, 0.0  ;;  %v3794_v13 = vsel %vm634_vm6, %v3781_v7, 0.0 }
0x2df2   :  { %v3810_v22 = vadd.f32 %v3809_v38, %v3808_v18  ;;  %v3795_v12 = vadd.f32 %v3794_v13, %v3793_v57 }
0x2df4   :  { %v3811_v37 = vrot.slane %v3810_v22, 4  ;;  %v3796_v3 = vrot.slane %v3795_v12, 4 }
0x2df6   :  { %v3812_v30 = vadd.f32 %v3811_v37, %v3810_v22  ;;  %v3797_v39 = vadd.f32 %v3796_v3, %v3795_v12 }
0x2df8   :  { %v3813_v35 = vrot.slane %v3812_v30, 2  ;;  %v3798_v1 = vrot.slane %v3797_v39, 2 }
0x2dfa   :  { %v3814_v15 = vadd.f32 %v3813_v35, %v3812_v30  ;;  %v3799_v10 = vadd.f32 %v3798_v1, %v3797_v39 }
0x2dfc   :  { %v3815_v20 = vrot.slane %v3814_v15, 1  ;;  %v3800_v23 = vrot.slane %v3799_v10, 1 }
0x2dfe   :  { %v3816_v9 = vadd.f32 %v3815_v20, %v3814_v15  ;;  %v3801_v61 = vadd.f32 %v3800_v23, %v3799_v10 }
0x2e00   :  { %v3839_v5 = vsel %vm707_vm11, %v3816_v9, %v3801_v61 }
0x2e01   :  { %3974 = vmatmul.msk.f32.vlgmr.msra.gmra.mxu2 %vm141_vm0, %v3839_v5 }
0x2e84   :  { %v3859_v32 = vpop.f32.mrf.mxu2 }
0x2e85   :  { %v3860_v50 = vadd.f32 %v3859_v32, %v3834_v63 }
0x2e87   :  { %v3862_v25 = vadd.f32 %v5794_v59, %v3860_v50 }
0x2e89   :  { %4217 = vtanh.f32 %v3862_v25  ;;  %v3975_v21 = vmul.f32 -1.442695, %v3862_v25 }
0x2e8b   :  { %4219 = vpow2.f32 %v3975_v21 }
0x2e8f   :  { %v4218_v27 = vpop.eup %4217 }
0x2e90   :  { %3885 = vrot.lane.b32.xlu2 %v4218_v27, %s4398_s30 }
0x2e91   :  { %v4220_v45 = vpop.eup %4219 }
0x2e92   :  { %v3866_v40 = vadd.f32 1.0, %v4220_v45 }
0x2e94   :  { %4221 = vrcp.f32 %v3866_v40  ;;  %v3878_v36 = vand.u32 2147483648, %v3866_v40  ;;  %vm3872_vm6 = vweird.f32 %v3866_v40  ;;  %v3876_v24 = vand.u32 2147483647, %v3866_v40 }
0x2e96   :  { %v3879_v8 = vor.u32 1.1754944e-38, %v3878_v36  ;;  %vm3877_vm8 = vcmp.eq.f32.partialorder %v3876_v24, 8.507059e+37 }
0x2e9a   :  { %v4222_v58 = vpop.eup %4221 }
0x2e9b   :  { %v3868_v19 = vmul.f32 %v4222_v58, %v3866_v40  ;;  %vm3873_vm0 = vweird.f32 %v4222_v58 }
0x2e9c   :  { %vm3874_vm7 = vmor %vm3872_vm6, %vm3873_vm0 }
0x2e9d   :  { %v3869_v42 = vsub.f32 1.0, %v3868_v19 }
0x2e9f   :  { %v3870_v28 = vmul.f32 %v4222_v58, %v3869_v42 }
0x2ea1   :  { %v3871_v48 = vadd.f32 %v4222_v58, %v3870_v28 }
0x2ea3   :  { %v3875_v59 = vsel %vm3874_vm7, %v4222_v58, %v3871_v48 }
0x2ea4   :  { %v3880_v11 = vsel %vm3877_vm8, %v3879_v8, %v3875_v59 }
0x2ea5   :  { %v3883_v51 = vmul.f32 %v3880_v11, %v5800_v41 }
0x2eea   :  { %v3886_v34 = vpop.permute.xlu2 %3885 }
0x2eeb   :  { %v3888_v46 = vmul.f32 %v3886_v34, %v3880_v11 }
0x2eed   :  { %3890 = vrot.lane.b32.xlu1 %v3888_v46, %s4399_s4 }
0x2f5f   :  { %v3891_v60 = vpop.permute.xlu1 %3890 }
0x2f60   :  { %v3893_v33 = vadd.f32 %v3891_v60, %v3883_v51 }
0x2f62   :  { %4223 = vtanh.f32 %v3893_v33 }
0x2f68   :  { %v4224_v47 = vpop.eup %4223 }
0x2f69   :  { %3896 = vrot.lane.b32.xlu0 %v4224_v47, %s4398_s30 }
0x2fdb   :  { %v3897_v14 = vpop.permute.xlu0 %3896 }
0x2fdc   :  { %v3899_v17 = vmul.f32 %v3897_v14, %v3880_v11 }
0x2fde   :  { %3901 = vrot.lane.b32.xlu1 %v3899_v17, %s4399_s4 }
0x3050   :  { %v3902_v44 = vpop.permute.xlu1 %3901 }
0x3051   :  { %3905 = vst.msk [vmem:[#allocation12 + $0xa] sm:$0x3] %vm1009_vm2, %v3902_v44 }
0x3052   :  { %3918 = dma.vmem_to_hbm [thread:$0]  %s3911_s5, 192, %s3913_s6, [#allocation6], %s4399_s4, %s4399_s4, %s4402_s9  }
0x3053   :  { %4390 = dma.done.wait [#allocation6], 192  }
0x3054   :  { %4391 = vsyncadd [#allocation6], 4294967104 }
0x3055   :  { %3923 = vsyncpa [#allocation5], 1 }
0x3056   :  { %3924 = vsyncpa [#allocation8], 1 }
0x3057   :  { %3925 = vsyncpa [#allocation11], 1 }
0x3058   :  { %3926 = vsyncpa [#allocation6], 1 }

</bundles_post_ra>
